<compile_context>
chip_gen: v6e
topology: v6e:2x2x1
jax: 0.10.0
libtpu: 0.0.40
codegen_flags: <defaults>
</compile_context>

<pallas_src>
import jax
import jax.numpy as jnp
from jax.experimental import pallas as pl
from jax.experimental.pallas import tpu as pltpu

IN_DIM = 8 * 32   # 256
HID = 512
OUT_DIM = 32
OUT_PAD = 128     # lane-dense padded output width (multiple of 128)
EPS = 1e-5        # torch LayerNorm default


def _round_up(x, m):
    return (x + m - 1) // m * m


def _layer(h_bf16, w_ref, b_ref, g_ref, be_ref):
    """Linear (bf16 MXU, f32 accumulate) + LayerNorm (f32 stats) + ReLU (bf16)."""
    z = jnp.dot(h_bf16, w_ref[...],
                preferred_element_type=jnp.float32) + b_ref[...]
    inv_n = 1.0 / z.shape[-1]
    s1 = jnp.sum(z, axis=-1, keepdims=True)          # one-pass stats: one XLU chain
    s2 = jnp.sum(z * z, axis=-1, keepdims=True)
    mu = s1 * inv_n
    var = jnp.maximum(s2 * inv_n - mu * mu, 0.0)     # clamp: cancellation can go < 0
    zn = (z - mu) * jax.lax.rsqrt(var + EPS)
    # Affine + ReLU in bf16: halves VPU passes on v6e/v7x, feeds MXU directly.
    h = zn.astype(jnp.bfloat16) * g_ref[...] + be_ref[...]
    return jnp.maximum(h, 0)


def mlp_kernel(x_ref,
               w1, b1, g1, be1,
               w2, b2, g2, be2,
               w3, b3, g3, be3,
               w4, b4, g4, be4,
               w5, b5,
               o_ref):
    h = x_ref[...].astype(jnp.bfloat16)
    h = _layer(h, w1, b1, g1, be1)
    h = _layer(h, w2, b2, g2, be2)
    h = _layer(h, w3, b3, g3, be3)
    h = _layer(h, w4, b4, g4, be4)
    # Final Linear (lane-dense, padded to 128 cols); dropout is identity.
    o_ref[...] = (jnp.dot(h, w5[...], preferred_element_type=jnp.float32)
                  + b5[...]).astype(o_ref.dtype)


def prepare_params(params):
    """One-time weight prep: bf16 casts for MXU/VPU, final layer padded 32->128
    output columns (zeros) for unmasked lane-dense stores.  Call once, reuse."""
    prep = []
    for l in (1, 2, 3, 4):
        prep += [params[f"w{l}"].astype(jnp.bfloat16),
                 params[f"b{l}"].astype(jnp.float32),       # bias add stays f32
                 params[f"g{l}"].astype(jnp.bfloat16),       # bf16 LN affine
                 params[f"beta{l}"].astype(jnp.bfloat16)]
    w5 = jnp.pad(params["w5"], ((0, 0), (0, OUT_PAD - OUT_DIM))).astype(jnp.bfloat16)
    b5 = jnp.pad(params["b5"], ((0, 0), (0, OUT_PAD - OUT_DIM))).astype(jnp.float32)
    prep += [w5, b5]
    return tuple(prep)


def mlp_forward(x, prepared, *, tile_m=1024):
    """x: (B, 256) f32 -> (B, 32) f32. `prepared` = prepare_params(params)."""
    B = x.shape[0]
    Bp = _round_up(B, 8)              # pad only to sublane multiple, never a tile
    if Bp != B:
        x = jnp.pad(x, ((0, Bp - B), (0, 0)))

    if Bp <= 512:
        tile = Bp                      # small batch: single grid step
    else:
        # At least 2 grid steps so the "parallel" axis can span both v7x
        # TensorCores; cap the per-step tile at tile_m for big batches.
        tile = min(tile_m, _round_up(-(-Bp // 2), 8))
    grid = pl.cdiv(Bp, tile)           # ragged last block is masked by Pallas

    def const_spec(shape):
        # Constant (grid-invariant) weight blocks: whole array, block index 0.
        return pl.BlockSpec(shape, lambda i: (0,) * len(shape))

    in_specs = [pl.BlockSpec((tile, IN_DIM), lambda i: (i, 0))]
    in_specs += [const_spec(p.shape) for p in prepared]
    out_spec = pl.BlockSpec((tile, OUT_PAD), lambda i: (i, 0))

    out = pl.pallas_call(
        mlp_kernel,
        out_shape=jax.ShapeDtypeStruct((Bp, OUT_PAD), jnp.float32),
        grid_spec=pltpu.PrefetchScalarGridSpec(
            num_scalar_prefetch=0,
            grid=(grid,),
            in_specs=in_specs,
            out_specs=out_spec,
        ),
        compiler_params=pltpu.CompilerParams(
            dimension_semantics=("parallel",),
            # 1024-row tile: ~2 MB x input (x2 bufs) + ~1 MB out (x2) +
            # ~3.9 MB double-buffered bf16 weights + <12 MB f32 intermediates.
            vmem_limit_bytes=32 * 1024 * 1024,
        ),
    )(x, *prepared)
    return out[:B, :OUT_DIM]


def init_params(key):
    """Deterministic init mimicking nn.Linear (uniform +-1/sqrt(fan_in)) and
    nn.LayerNorm (gamma=1, beta=0). Weights stored as (in, out) for x @ W."""
    params = {}
    dims = [(IN_DIM, HID), (HID, HID), (HID, HID), (HID, HID), (HID, OUT_DIM)]
    for idx, (fan_in, fan_out) in enumerate(dims, start=1):
        key, kw, kb = jax.random.split(key, 3)
        bound = 1.0 / jnp.sqrt(float(fan_in))
        params[f"w{idx}"] = jax.random.uniform(
            kw, (fan_in, fan_out), jnp.float32, -bound, bound)
        params[f"b{idx}"] = jax.random.uniform(
            kb, (1, fan_out), jnp.float32, -bound, bound)
        if idx <= 4:
            params[f"g{idx}"] = jnp.ones((1, fan_out), jnp.float32)
            params[f"beta{idx}"] = jnp.zeros((1, fan_out), jnp.float32)
    return params


def mlp_reference(x, params):
    """Pure-JAX f32 reference for correctness checking."""
    h = x
    for l in (1, 2, 3, 4):
        h = h @ params[f"w{l}"] + params[f"b{l}"]
        mu = jnp.mean(h, axis=-1, keepdims=True)
        var = jnp.mean((h - mu) ** 2, axis=-1, keepdims=True)
        h = (h - mu) / jnp.sqrt(var + EPS)
        h = h * params[f"g{l}"] + params[f"beta{l}"]
        h = jnp.maximum(h, 0.0)
    return h @ params["w5"] + params["b5"]


if __name__ == "__main__":
    key = jax.random.PRNGKey(0)
    key, kx, kp = jax.random.split(key, 3)
    params = init_params(kp)
    prepared = prepare_params(params)   # one-time bf16 cast / padding

    # B=8: exact sublane multiple, single tile.
    # B=13: batch padded 13 -> 16.
    # B=600: 2 grid steps with a ragged (masked) last block.
    for B in (8, 13, 600):
        kx, sub = jax.random.split(kx)
        x = jax.random.normal(sub, (B, IN_DIM), jnp.float32)

        out = jax.block_until_ready(mlp_forward(x, prepared))
        ref = mlp_reference(x, params)

        assert out.shape == (B, OUT_DIM)
        assert jnp.all(jnp.isfinite(out)), f"non-finite output at B={B}"
        # bf16 MXU operands over 5 layers -> loosened tolerance vs f32 reference.
        assert jnp.allclose(out, ref, atol=3e-2, rtol=3e-2), (
            f"mismatch vs reference at B={B}: "
            f"max abs diff {jnp.max(jnp.abs(out - ref))}")

    print("KERNEL_OK")
</pallas_src>

<mosaic_0001>
module attributes {stable_mosaic.version = 11 : i64} {
  func.func @mlp_kernel(%arg0: i32, %arg1: memref<8x256xf32, #tpu.memory_space<vmem>>, %arg2: memref<256x512xbf16, #tpu.memory_space<vmem>>, %arg3: memref<1x512xf32, #tpu.memory_space<vmem>>, %arg4: memref<1x512xbf16, #tpu.memory_space<vmem>>, %arg5: memref<1x512xbf16, #tpu.memory_space<vmem>>, %arg6: memref<512x512xbf16, #tpu.memory_space<vmem>>, %arg7: memref<1x512xf32, #tpu.memory_space<vmem>>, %arg8: memref<1x512xbf16, #tpu.memory_space<vmem>>, %arg9: memref<1x512xbf16, #tpu.memory_space<vmem>>, %arg10: memref<512x512xbf16, #tpu.memory_space<vmem>>, %arg11: memref<1x512xf32, #tpu.memory_space<vmem>>, %arg12: memref<1x512xbf16, #tpu.memory_space<vmem>>, %arg13: memref<1x512xbf16, #tpu.memory_space<vmem>>, %arg14: memref<512x512xbf16, #tpu.memory_space<vmem>>, %arg15: memref<1x512xf32, #tpu.memory_space<vmem>>, %arg16: memref<1x512xbf16, #tpu.memory_space<vmem>>, %arg17: memref<1x512xbf16, #tpu.memory_space<vmem>>, %arg18: memref<512x128xbf16, #tpu.memory_space<vmem>>, %arg19: memref<1x128xf32, #tpu.memory_space<vmem>>, %arg20: memref<8x128xf32, #tpu.memory_space<vmem>>) attributes {dimension_semantics = [#tpu.dimension_semantics<parallel>], iteration_bounds = array<i64: 1>, scalar_prefetch = 0 : i64, scratch_operands = 0 : i64, tpu.core_type = #tpu.core_type<tc>, window_params = [{transform_indices = @transform_0, window_bounds = array<i64: 8, 256>}, {pipeline_mode = #tpu.pipeline_mode<synchronous>, transform_indices = @transform_1, window_bounds = array<i64: 256, 512>}, {pipeline_mode = #tpu.pipeline_mode<synchronous>, transform_indices = @transform_2, window_bounds = array<i64: 1, 512>}, {pipeline_mode = #tpu.pipeline_mode<synchronous>, transform_indices = @transform_3, window_bounds = array<i64: 1, 512>}, {pipeline_mode = #tpu.pipeline_mode<synchronous>, transform_indices = @transform_4, window_bounds = array<i64: 1, 512>}, {pipeline_mode = #tpu.pipeline_mode<synchronous>, transform_indices = @transform_5, window_bounds = array<i64: 512, 512>}, {pipeline_mode = #tpu.pipeline_mode<synchronous>, transform_indices = @transform_6, window_bounds = array<i64: 1, 512>}, {pipeline_mode = #tpu.pipeline_mode<synchronous>, transform_indices = @transform_7, window_bounds = array<i64: 1, 512>}, {pipeline_mode = #tpu.pipeline_mode<synchronous>, transform_indices = @transform_8, window_bounds = array<i64: 1, 512>}, {pipeline_mode = #tpu.pipeline_mode<synchronous>, transform_indices = @transform_9, window_bounds = array<i64: 512, 512>}, {pipeline_mode = #tpu.pipeline_mode<synchronous>, transform_indices = @transform_10, window_bounds = array<i64: 1, 512>}, {pipeline_mode = #tpu.pipeline_mode<synchronous>, transform_indices = @transform_11, window_bounds = array<i64: 1, 512>}, {pipeline_mode = #tpu.pipeline_mode<synchronous>, transform_indices = @transform_12, window_bounds = array<i64: 1, 512>}, {pipeline_mode = #tpu.pipeline_mode<synchronous>, transform_indices = @transform_13, window_bounds = array<i64: 512, 512>}, {pipeline_mode = #tpu.pipeline_mode<synchronous>, transform_indices = @transform_14, window_bounds = array<i64: 1, 512>}, {pipeline_mode = #tpu.pipeline_mode<synchronous>, transform_indices = @transform_15, window_bounds = array<i64: 1, 512>}, {pipeline_mode = #tpu.pipeline_mode<synchronous>, transform_indices = @transform_16, window_bounds = array<i64: 1, 512>}, {pipeline_mode = #tpu.pipeline_mode<synchronous>, transform_indices = @transform_17, window_bounds = array<i64: 512, 128>}, {pipeline_mode = #tpu.pipeline_mode<synchronous>, transform_indices = @transform_18, window_bounds = array<i64: 1, 128>}, {transform_indices = @transform_19, window_bounds = array<i64: 8, 128>}]} {
    %c0 = arith.constant 0 : index
    %c0_0 = arith.constant 0 : index
    %0 = vector.load %arg1[%c0, %c0_0] : memref<8x256xf32, #tpu.memory_space<vmem>>, vector<8x256xf32>
    %1 = arith.truncf %0 : vector<8x256xf32> to vector<8x256xbf16>
    %c0_1 = arith.constant 0 : index
    %c0_2 = arith.constant 0 : index
    %2 = vector.load %arg2[%c0_1, %c0_2] : memref<256x512xbf16, #tpu.memory_space<vmem>>, vector<256x512xbf16>
    %cst = arith.constant dense<0.000000e+00> : vector<8x512xf32>
    %3 = tpu.matmul %1, %2, %cst {dimension_numbers = #tpu.dot_dimension_numbers<[1], [0], [0], [1], [0, 0, 1, 1], [], []>} : vector<8x256xbf16>, vector<256x512xbf16>, vector<8x512xf32> -> vector<8x512xf32>
    %c0_3 = arith.constant 0 : index
    %c0_4 = arith.constant 0 : index
    %4 = vector.load %arg3[%c0_3, %c0_4] : memref<1x512xf32, #tpu.memory_space<vmem>>, vector<1x512xf32>
    %5 = vector.broadcast %4 : vector<1x512xf32> to vector<8x512xf32>
    %6 = arith.addf %3, %5 : vector<8x512xf32>
    %cst_5 = arith.constant dense<0.000000e+00> : vector<8xf32>
    %7 = vector.multi_reduction <add>, %6, %cst_5 [1] : vector<8x512xf32> to vector<8xf32>
    %8 = vector.shape_cast %7 : vector<8xf32> to vector<8x1xf32>
    %9 = arith.mulf %6, %6 : vector<8x512xf32>
    %cst_6 = arith.constant dense<0.000000e+00> : vector<8xf32>
    %10 = vector.multi_reduction <add>, %9, %cst_6 [1] : vector<8x512xf32> to vector<8xf32>
    %11 = vector.shape_cast %10 : vector<8xf32> to vector<8x1xf32>
    %cst_7 = arith.constant 0.001953125 : f32
    %12 = vector.broadcast %cst_7 : f32 to vector<8x1xf32>
    %13 = arith.mulf %8, %12 : vector<8x1xf32>
    %cst_8 = arith.constant 0.001953125 : f32
    %14 = vector.broadcast %cst_8 : f32 to vector<8x1xf32>
    %15 = arith.mulf %11, %14 : vector<8x1xf32>
    %16 = arith.mulf %13, %13 : vector<8x1xf32>
    %17 = arith.subf %15, %16 : vector<8x1xf32>
    %cst_9 = arith.constant 0.000000e+00 : f32
    %18 = vector.broadcast %cst_9 : f32 to vector<8x1xf32>
    %19 = arith.maximumf %17, %18 : vector<8x1xf32>
    %20 = vector.broadcast %13 : vector<8x1xf32> to vector<8x512xf32>
    %21 = arith.subf %6, %20 : vector<8x512xf32>
    %cst_10 = arith.constant 9.99999974E-6 : f32
    %22 = vector.broadcast %cst_10 : f32 to vector<8x1xf32>
    %23 = arith.addf %19, %22 : vector<8x1xf32>
    %24 = math.rsqrt %23 : vector<8x1xf32>
    %25 = vector.broadcast %24 : vector<8x1xf32> to vector<8x512xf32>
    %26 = arith.mulf %21, %25 : vector<8x512xf32>
    %27 = arith.truncf %26 : vector<8x512xf32> to vector<8x512xbf16>
    %c0_11 = arith.constant 0 : index
    %c0_12 = arith.constant 0 : index
    %28 = vector.load %arg4[%c0_11, %c0_12] : memref<1x512xbf16, #tpu.memory_space<vmem>>, vector<1x512xbf16>
    %29 = vector.broadcast %28 : vector<1x512xbf16> to vector<8x512xbf16>
    %30 = arith.mulf %27, %29 : vector<8x512xbf16>
    %c0_13 = arith.constant 0 : index
    %c0_14 = arith.constant 0 : index
    %31 = vector.load %arg5[%c0_13, %c0_14] : memref<1x512xbf16, #tpu.memory_space<vmem>>, vector<1x512xbf16>
    %32 = vector.broadcast %31 : vector<1x512xbf16> to vector<8x512xbf16>
    %33 = arith.addf %30, %32 : vector<8x512xbf16>
    %cst_15 = arith.constant 0.000000e+00 : bf16
    %34 = vector.broadcast %cst_15 : bf16 to vector<8x512xbf16>
    %35 = arith.maximumf %33, %34 : vector<8x512xbf16>
    %c0_16 = arith.constant 0 : index
    %c0_17 = arith.constant 0 : index
    %36 = vector.load %arg6[%c0_16, %c0_17] : memref<512x512xbf16, #tpu.memory_space<vmem>>, vector<512x512xbf16>
    %cst_18 = arith.constant dense<0.000000e+00> : vector<8x512xf32>
    %37 = tpu.matmul %35, %36, %cst_18 {dimension_numbers = #tpu.dot_dimension_numbers<[1], [0], [0], [1], [0, 0, 1, 1], [], []>} : vector<8x512xbf16>, vector<512x512xbf16>, vector<8x512xf32> -> vector<8x512xf32>
    %c0_19 = arith.constant 0 : index
    %c0_20 = arith.constant 0 : index
    %38 = vector.load %arg7[%c0_19, %c0_20] : memref<1x512xf32, #tpu.memory_space<vmem>>, vector<1x512xf32>
    %39 = vector.broadcast %38 : vector<1x512xf32> to vector<8x512xf32>
    %40 = arith.addf %37, %39 : vector<8x512xf32>
    %cst_21 = arith.constant dense<0.000000e+00> : vector<8xf32>
    %41 = vector.multi_reduction <add>, %40, %cst_21 [1] : vector<8x512xf32> to vector<8xf32>
    %42 = vector.shape_cast %41 : vector<8xf32> to vector<8x1xf32>
    %43 = arith.mulf %40, %40 : vector<8x512xf32>
    %cst_22 = arith.constant dense<0.000000e+00> : vector<8xf32>
    %44 = vector.multi_reduction <add>, %43, %cst_22 [1] : vector<8x512xf32> to vector<8xf32>
    %45 = vector.shape_cast %44 : vector<8xf32> to vector<8x1xf32>
    %cst_23 = arith.constant 0.001953125 : f32
    %46 = vector.broadcast %cst_23 : f32 to vector<8x1xf32>
    %47 = arith.mulf %42, %46 : vector<8x1xf32>
    %cst_24 = arith.constant 0.001953125 : f32
    %48 = vector.broadcast %cst_24 : f32 to vector<8x1xf32>
    %49 = arith.mulf %45, %48 : vector<8x1xf32>
    %50 = arith.mulf %47, %47 : vector<8x1xf32>
    %51 = arith.subf %49, %50 : vector<8x1xf32>
    %cst_25 = arith.constant 0.000000e+00 : f32
    %52 = vector.broadcast %cst_25 : f32 to vector<8x1xf32>
    %53 = arith.maximumf %51, %52 : vector<8x1xf32>
    %54 = vector.broadcast %47 : vector<8x1xf32> to vector<8x512xf32>
    %55 = arith.subf %40, %54 : vector<8x512xf32>
    %cst_26 = arith.constant 9.99999974E-6 : f32
    %56 = vector.broadcast %cst_26 : f32 to vector<8x1xf32>
    %57 = arith.addf %53, %56 : vector<8x1xf32>
    %58 = math.rsqrt %57 : vector<8x1xf32>
    %59 = vector.broadcast %58 : vector<8x1xf32> to vector<8x512xf32>
    %60 = arith.mulf %55, %59 : vector<8x512xf32>
    %61 = arith.truncf %60 : vector<8x512xf32> to vector<8x512xbf16>
    %c0_27 = arith.constant 0 : index
    %c0_28 = arith.constant 0 : index
    %62 = vector.load %arg8[%c0_27, %c0_28] : memref<1x512xbf16, #tpu.memory_space<vmem>>, vector<1x512xbf16>
    %63 = vector.broadcast %62 : vector<1x512xbf16> to vector<8x512xbf16>
    %64 = arith.mulf %61, %63 : vector<8x512xbf16>
    %c0_29 = arith.constant 0 : index
    %c0_30 = arith.constant 0 : index
    %65 = vector.load %arg9[%c0_29, %c0_30] : memref<1x512xbf16, #tpu.memory_space<vmem>>, vector<1x512xbf16>
    %66 = vector.broadcast %65 : vector<1x512xbf16> to vector<8x512xbf16>
    %67 = arith.addf %64, %66 : vector<8x512xbf16>
    %cst_31 = arith.constant 0.000000e+00 : bf16
    %68 = vector.broadcast %cst_31 : bf16 to vector<8x512xbf16>
    %69 = arith.maximumf %67, %68 : vector<8x512xbf16>
    %c0_32 = arith.constant 0 : index
    %c0_33 = arith.constant 0 : index
    %70 = vector.load %arg10[%c0_32, %c0_33] : memref<512x512xbf16, #tpu.memory_space<vmem>>, vector<512x512xbf16>
    %cst_34 = arith.constant dense<0.000000e+00> : vector<8x512xf32>
    %71 = tpu.matmul %69, %70, %cst_34 {dimension_numbers = #tpu.dot_dimension_numbers<[1], [0], [0], [1], [0, 0, 1, 1], [], []>} : vector<8x512xbf16>, vector<512x512xbf16>, vector<8x512xf32> -> vector<8x512xf32>
    %c0_35 = arith.constant 0 : index
    %c0_36 = arith.constant 0 : index
    %72 = vector.load %arg11[%c0_35, %c0_36] : memref<1x512xf32, #tpu.memory_space<vmem>>, vector<1x512xf32>
    %73 = vector.broadcast %72 : vector<1x512xf32> to vector<8x512xf32>
    %74 = arith.addf %71, %73 : vector<8x512xf32>
    %cst_37 = arith.constant dense<0.000000e+00> : vector<8xf32>
    %75 = vector.multi_reduction <add>, %74, %cst_37 [1] : vector<8x512xf32> to vector<8xf32>
    %76 = vector.shape_cast %75 : vector<8xf32> to vector<8x1xf32>
    %77 = arith.mulf %74, %74 : vector<8x512xf32>
    %cst_38 = arith.constant dense<0.000000e+00> : vector<8xf32>
    %78 = vector.multi_reduction <add>, %77, %cst_38 [1] : vector<8x512xf32> to vector<8xf32>
    %79 = vector.shape_cast %78 : vector<8xf32> to vector<8x1xf32>
    %cst_39 = arith.constant 0.001953125 : f32
    %80 = vector.broadcast %cst_39 : f32 to vector<8x1xf32>
    %81 = arith.mulf %76, %80 : vector<8x1xf32>
    %cst_40 = arith.constant 0.001953125 : f32
    %82 = vector.broadcast %cst_40 : f32 to vector<8x1xf32>
    %83 = arith.mulf %79, %82 : vector<8x1xf32>
    %84 = arith.mulf %81, %81 : vector<8x1xf32>
    %85 = arith.subf %83, %84 : vector<8x1xf32>
    %cst_41 = arith.constant 0.000000e+00 : f32
    %86 = vector.broadcast %cst_41 : f32 to vector<8x1xf32>
    %87 = arith.maximumf %85, %86 : vector<8x1xf32>
    %88 = vector.broadcast %81 : vector<8x1xf32> to vector<8x512xf32>
    %89 = arith.subf %74, %88 : vector<8x512xf32>
    %cst_42 = arith.constant 9.99999974E-6 : f32
    %90 = vector.broadcast %cst_42 : f32 to vector<8x1xf32>
    %91 = arith.addf %87, %90 : vector<8x1xf32>
    %92 = math.rsqrt %91 : vector<8x1xf32>
    %93 = vector.broadcast %92 : vector<8x1xf32> to vector<8x512xf32>
    %94 = arith.mulf %89, %93 : vector<8x512xf32>
    %95 = arith.truncf %94 : vector<8x512xf32> to vector<8x512xbf16>
    %c0_43 = arith.constant 0 : index
    %c0_44 = arith.constant 0 : index
    %96 = vector.load %arg12[%c0_43, %c0_44] : memref<1x512xbf16, #tpu.memory_space<vmem>>, vector<1x512xbf16>
    %97 = vector.broadcast %96 : vector<1x512xbf16> to vector<8x512xbf16>
    %98 = arith.mulf %95, %97 : vector<8x512xbf16>
    %c0_45 = arith.constant 0 : index
    %c0_46 = arith.constant 0 : index
    %99 = vector.load %arg13[%c0_45, %c0_46] : memref<1x512xbf16, #tpu.memory_space<vmem>>, vector<1x512xbf16>
    %100 = vector.broadcast %99 : vector<1x512xbf16> to vector<8x512xbf16>
    %101 = arith.addf %98, %100 : vector<8x512xbf16>
    %cst_47 = arith.constant 0.000000e+00 : bf16
    %102 = vector.broadcast %cst_47 : bf16 to vector<8x512xbf16>
    %103 = arith.maximumf %101, %102 : vector<8x512xbf16>
    %c0_48 = arith.constant 0 : index
    %c0_49 = arith.constant 0 : index
    %104 = vector.load %arg14[%c0_48, %c0_49] : memref<512x512xbf16, #tpu.memory_space<vmem>>, vector<512x512xbf16>
    %cst_50 = arith.constant dense<0.000000e+00> : vector<8x512xf32>
    %105 = tpu.matmul %103, %104, %cst_50 {dimension_numbers = #tpu.dot_dimension_numbers<[1], [0], [0], [1], [0, 0, 1, 1], [], []>} : vector<8x512xbf16>, vector<512x512xbf16>, vector<8x512xf32> -> vector<8x512xf32>
    %c0_51 = arith.constant 0 : index
    %c0_52 = arith.constant 0 : index
    %106 = vector.load %arg15[%c0_51, %c0_52] : memref<1x512xf32, #tpu.memory_space<vmem>>, vector<1x512xf32>
    %107 = vector.broadcast %106 : vector<1x512xf32> to vector<8x512xf32>
    %108 = arith.addf %105, %107 : vector<8x512xf32>
    %cst_53 = arith.constant dense<0.000000e+00> : vector<8xf32>
    %109 = vector.multi_reduction <add>, %108, %cst_53 [1] : vector<8x512xf32> to vector<8xf32>
    %110 = vector.shape_cast %109 : vector<8xf32> to vector<8x1xf32>
    %111 = arith.mulf %108, %108 : vector<8x512xf32>
    %cst_54 = arith.constant dense<0.000000e+00> : vector<8xf32>
    %112 = vector.multi_reduction <add>, %111, %cst_54 [1] : vector<8x512xf32> to vector<8xf32>
    %113 = vector.shape_cast %112 : vector<8xf32> to vector<8x1xf32>
    %cst_55 = arith.constant 0.001953125 : f32
    %114 = vector.broadcast %cst_55 : f32 to vector<8x1xf32>
    %115 = arith.mulf %110, %114 : vector<8x1xf32>
    %cst_56 = arith.constant 0.001953125 : f32
    %116 = vector.broadcast %cst_56 : f32 to vector<8x1xf32>
    %117 = arith.mulf %113, %116 : vector<8x1xf32>
    %118 = arith.mulf %115, %115 : vector<8x1xf32>
    %119 = arith.subf %117, %118 : vector<8x1xf32>
    %cst_57 = arith.constant 0.000000e+00 : f32
    %120 = vector.broadcast %cst_57 : f32 to vector<8x1xf32>
    %121 = arith.maximumf %119, %120 : vector<8x1xf32>
    %122 = vector.broadcast %115 : vector<8x1xf32> to vector<8x512xf32>
    %123 = arith.subf %108, %122 : vector<8x512xf32>
    %cst_58 = arith.constant 9.99999974E-6 : f32
    %124 = vector.broadcast %cst_58 : f32 to vector<8x1xf32>
    %125 = arith.addf %121, %124 : vector<8x1xf32>
    %126 = math.rsqrt %125 : vector<8x1xf32>
    %127 = vector.broadcast %126 : vector<8x1xf32> to vector<8x512xf32>
    %128 = arith.mulf %123, %127 : vector<8x512xf32>
    %129 = arith.truncf %128 : vector<8x512xf32> to vector<8x512xbf16>
    %c0_59 = arith.constant 0 : index
    %c0_60 = arith.constant 0 : index
    %130 = vector.load %arg16[%c0_59, %c0_60] : memref<1x512xbf16, #tpu.memory_space<vmem>>, vector<1x512xbf16>
    %131 = vector.broadcast %130 : vector<1x512xbf16> to vector<8x512xbf16>
    %132 = arith.mulf %129, %131 : vector<8x512xbf16>
    %c0_61 = arith.constant 0 : index
    %c0_62 = arith.constant 0 : index
    %133 = vector.load %arg17[%c0_61, %c0_62] : memref<1x512xbf16, #tpu.memory_space<vmem>>, vector<1x512xbf16>
    %134 = vector.broadcast %133 : vector<1x512xbf16> to vector<8x512xbf16>
    %135 = arith.addf %132, %134 : vector<8x512xbf16>
    %cst_63 = arith.constant 0.000000e+00 : bf16
    %136 = vector.broadcast %cst_63 : bf16 to vector<8x512xbf16>
    %137 = arith.maximumf %135, %136 : vector<8x512xbf16>
    %c0_64 = arith.constant 0 : index
    %c0_65 = arith.constant 0 : index
    %138 = vector.load %arg18[%c0_64, %c0_65] : memref<512x128xbf16, #tpu.memory_space<vmem>>, vector<512x128xbf16>
    %cst_66 = arith.constant dense<0.000000e+00> : vector<8x128xf32>
    %139 = tpu.matmul %137, %138, %cst_66 {dimension_numbers = #tpu.dot_dimension_numbers<[1], [0], [0], [1], [0, 0, 1, 1], [], []>} : vector<8x512xbf16>, vector<512x128xbf16>, vector<8x128xf32> -> vector<8x128xf32>
    %c0_67 = arith.constant 0 : index
    %c0_68 = arith.constant 0 : index
    %140 = vector.load %arg19[%c0_67, %c0_68] : memref<1x128xf32, #tpu.memory_space<vmem>>, vector<1x128xf32>
    %141 = vector.broadcast %140 : vector<1x128xf32> to vector<8x128xf32>
    %142 = arith.addf %139, %141 : vector<8x128xf32>
    %c0_69 = arith.constant 0 : index
    %c0_70 = arith.constant 0 : index
    %143 = vector.load %arg20[%c0_69, %c0_70] : memref<8x128xf32, #tpu.memory_space<vmem>>, vector<8x128xf32>
    tpu.vector_store %arg20[%c0_69, %c0_70], %142 {strides = array<i32>} : memref<8x128xf32, #tpu.memory_space<vmem>>, vector<8x128xf32>,
    return
  }
  func.func @transform_0(%arg0: i32) -> (i32, i32) {
    %c0_i32 = arith.constant 0 : i32
    %c0_i32_0 = arith.constant 0 : i32
    return %arg0, %c0_i32 : i32, i32
  }
  func.func @transform_1(%arg0: i32) -> (i32, i32) {
    %c0_i32 = arith.constant 0 : i32
    %c0_i32_0 = arith.constant 0 : i32
    %c0_i32_1 = arith.constant 0 : i32
    return %c0_i32, %c0_i32_0 : i32, i32
  }
  func.func @transform_2(%arg0: i32) -> (i32, i32) {
    %c0_i32 = arith.constant 0 : i32
    %c0_i32_0 = arith.constant 0 : i32
    %c0_i32_1 = arith.constant 0 : i32
    return %c0_i32, %c0_i32_0 : i32, i32
  }
  func.func @transform_3(%arg0: i32) -> (i32, i32) {
    %c0_i32 = arith.constant 0 : i32
    %c0_i32_0 = arith.constant 0 : i32
    %c0_i32_1 = arith.constant 0 : i32
    return %c0_i32, %c0_i32_0 : i32, i32
  }
  func.func @transform_4(%arg0: i32) -> (i32, i32) {
    %c0_i32 = arith.constant 0 : i32
    %c0_i32_0 = arith.constant 0 : i32
    %c0_i32_1 = arith.constant 0 : i32
    return %c0_i32, %c0_i32_0 : i32, i32
  }
  func.func @transform_5(%arg0: i32) -> (i32, i32) {
    %c0_i32 = arith.constant 0 : i32
    %c0_i32_0 = arith.constant 0 : i32
    %c0_i32_1 = arith.constant 0 : i32
    return %c0_i32, %c0_i32_0 : i32, i32
  }
  func.func @transform_6(%arg0: i32) -> (i32, i32) {
    %c0_i32 = arith.constant 0 : i32
    %c0_i32_0 = arith.constant 0 : i32
    %c0_i32_1 = arith.constant 0 : i32
    return %c0_i32, %c0_i32_0 : i32, i32
  }
  func.func @transform_7(%arg0: i32) -> (i32, i32) {
    %c0_i32 = arith.constant 0 : i32
    %c0_i32_0 = arith.constant 0 : i32
    %c0_i32_1 = arith.constant 0 : i32
    return %c0_i32, %c0_i32_0 : i32, i32
  }
  func.func @transform_8(%arg0: i32) -> (i32, i32) {
    %c0_i32 = arith.constant 0 : i32
    %c0_i32_0 = arith.constant 0 : i32
    %c0_i32_1 = arith.constant 0 : i32
    return %c0_i32, %c0_i32_0 : i32, i32
  }
  func.func @transform_9(%arg0: i32) -> (i32, i32) {
    %c0_i32 = arith.constant 0 : i32
    %c0_i32_0 = arith.constant 0 : i32
    %c0_i32_1 = arith.constant 0 : i32
    return %c0_i32, %c0_i32_0 : i32, i32
  }
  func.func @transform_10(%arg0: i32) -> (i32, i32) {
    %c0_i32 = arith.constant 0 : i32
    %c0_i32_0 = arith.constant 0 : i32
    %c0_i32_1 = arith.constant 0 : i32
    return %c0_i32, %c0_i32_0 : i32, i32
  }
  func.func @transform_11(%arg0: i32) -> (i32, i32) {
    %c0_i32 = arith.constant 0 : i32
    %c0_i32_0 = arith.constant 0 : i32
    %c0_i32_1 = arith.constant 0 : i32
    return %c0_i32, %c0_i32_0 : i32, i32
  }
  func.func @transform_12(%arg0: i32) -> (i32, i32) {
    %c0_i32 = arith.constant 0 : i32
    %c0_i32_0 = arith.constant 0 : i32
    %c0_i32_1 = arith.constant 0 : i32
    return %c0_i32, %c0_i32_0 : i32, i32
  }
  func.func @transform_13(%arg0: i32) -> (i32, i32) {
    %c0_i32 = arith.constant 0 : i32
    %c0_i32_0 = arith.constant 0 : i32
    %c0_i32_1 = arith.constant 0 : i32
    return %c0_i32, %c0_i32_0 : i32, i32
  }
  func.func @transform_14(%arg0: i32) -> (i32, i32) {
    %c0_i32 = arith.constant 0 : i32
    %c0_i32_0 = arith.constant 0 : i32
    %c0_i32_1 = arith.constant 0 : i32
    return %c0_i32, %c0_i32_0 : i32, i32
  }
  func.func @transform_15(%arg0: i32) -> (i32, i32) {
    %c0_i32 = arith.constant 0 : i32
    %c0_i32_0 = arith.constant 0 : i32
    %c0_i32_1 = arith.constant 0 : i32
    return %c0_i32, %c0_i32_0 : i32, i32
  }
  func.func @transform_16(%arg0: i32) -> (i32, i32) {
    %c0_i32 = arith.constant 0 : i32
    %c0_i32_0 = arith.constant 0 : i32
    %c0_i32_1 = arith.constant 0 : i32
    return %c0_i32, %c0_i32_0 : i32, i32
  }
  func.func @transform_17(%arg0: i32) -> (i32, i32) {
    %c0_i32 = arith.constant 0 : i32
    %c0_i32_0 = arith.constant 0 : i32
    %c0_i32_1 = arith.constant 0 : i32
    return %c0_i32, %c0_i32_0 : i32, i32
  }
  func.func @transform_18(%arg0: i32) -> (i32, i32) {
    %c0_i32 = arith.constant 0 : i32
    %c0_i32_0 = arith.constant 0 : i32
    %c0_i32_1 = arith.constant 0 : i32
    return %c0_i32, %c0_i32_0 : i32, i32
  }
  func.func @transform_19(%arg0: i32) -> (i32, i32) {
    %c0_i32 = arith.constant 0 : i32
    %c0_i32_0 = arith.constant 0 : i32
    return %arg0, %c0_i32 : i32, i32
  }
}

</mosaic_0001>

<bundles_post_ra>
// kernel: tpu_custom_call.1
= control target key start
LH: loop header
LB: loop body
LE: loop exit
PB: predicated region body
PF: predicated region fallthrough
CT: control target
= control target key end

     0   :  { %s6455_s0 = inlined_call_operand.hbm [shape: f32[8,256], index: 0, kind: input, shape index: {}]   ;;  %s6456_s1 = inlined_call_operand.hbm [shape: bf16[256,512], index: 1, kind: input, shape index: {}]   ;;  %s6457_s2 = inlined_call_operand.hbm [shape: f32[1,512], index: 2, kind: input, shape index: {}]   ;;  %s6458_s3 = inlined_call_operand.vmem [shape: bf16[1,512], index: 3, kind: input, shape index: {}]   ;;  %s6459_s4 = inlined_call_operand.hbm [shape: bf16[1,512], index: 4, kind: input, shape index: {}]   ;;  %s6460_s5 = inlined_call_operand.hbm [shape: bf16[512,512], index: 5, kind: input, shape index: {}]   ;;  %s6461_s6 = inlined_call_operand.vmem [shape: f32[1,512], index: 6, kind: input, shape index: {}]   ;;  %s6462_s7 = inlined_call_operand.vmem [shape: bf16[1,512], index: 7, kind: input, shape index: {}]   ;;  %s6463_s8 = inlined_call_operand.hbm [shape: bf16[1,512], index: 8, kind: input, shape index: {}]   ;;  %s6464_s9 = inlined_call_operand.hbm [shape: bf16[512,512], index: 9, kind: input, shape index: {}]   ;;  %s6465_s10 = inlined_call_operand.vmem [shape: f32[1,512], index: 10, kind: input, shape index: {}]   ;;  %s6466_s11 = inlined_call_operand.vmem [shape: bf16[1,512], index: 11, kind: input, shape index: {}]   ;;  %s6467_s12 = inlined_call_operand.hbm [shape: bf16[1,512], index: 12, kind: input, shape index: {}]   ;;  %s6468_s13 = inlined_call_operand.hbm [shape: bf16[512,512], index: 13, kind: input, shape index: {}]   ;;  %s6469_s14 = inlined_call_operand.vmem [shape: f32[1,512], index: 14, kind: input, shape index: {}]   ;;  %s6470_s15 = inlined_call_operand.hbm [shape: bf16[1,512], index: 15, kind: input, shape index: {}]   ;;  %s6471_s16 = inlined_call_operand.vmem [shape: bf16[1,512], index: 16, kind: input, shape index: {}]   ;;  %s6472_s17 = inlined_call_operand.hbm [shape: bf16[512,128], index: 17, kind: input, shape index: {}]   ;;  %s6473_s18 = inlined_call_operand.vmem [shape: f32[1,128], index: 18, kind: input, shape index: {}]   ;;  %s6474_s19 = inlined_call_operand.hbm [shape: f32[8,128], index: 19, kind: output, shape index: {}]  }
   0x1   :  { %6475 = sst [smem:[#allocation28_spill]] %s6455_s0 }
   0x2   :  { %6476 = sst [smem:[#allocation29_spill]] %s6456_s1 }
   0x3   :  { %6477 = sst [smem:[#allocation30_spill]] %s6457_s2 }
   0x4   :  { %6478 = sst [smem:[#allocation31_spill]] %s6458_s3 }
   0x5   :  { %24 = vsyncpa [#allocation3], 0 }
   0x6   :  { %25 = vsyncpa [#allocation6], 0 }
   0x7   :  { %26 = vsyncpa [#allocation9], 0 }
   0x8   :  { %27 = vsyncpa [#allocation12], 0 }
   0x9   :  { %28 = vsyncpa [#allocation15], 0 }
   0xa   :  { %29 = vsyncpa [#allocation18], 0 }
   0xb   :  { %30 = vsyncpa [#allocation4], 0  ;;  %s6048_s0 = smov [#allocation5]  }
   0xc   :  { %s46_s30 = sshll.u32 %s6048_s0, 4  ;;  %s47_s30 = int_to_ptr.vmem [resolvable:$true] %s46_s30 }
   0xd   :  { %s5802_s20 = scalar_lea.vmem %s47_s30, 8192  ;;  %p5807_p1 = scmp.lt.s32.totalorder %s47_s30, %s47_s30 }
   0xe   :  { %p5803_p0 = scmp.ne.s32.totalorder %s47_s30, %s5802_s20  ;;  %p5808_p2 = scmp.lt.s32.totalorder %s5802_s20, %s5802_s20 }
  0x10   :  { %p5809_p3 = por %p5808_p2, %p5807_p1 }
  0x12   :  { %p5810_p4 = pnand %p5809_p3, %p5803_p0 }
  0x14   :  { %5813 = shalt.err (!%p5810_p4)
}
  0x15   :  { %s6049_s21 = smov 256   ;;  %s6050_s1 = smov 16  }
  0x16   :  { %s6479_s23 = sld [smem:[#allocation29_spill]]  ;;  %s6051_s24 = smov [#allocation8]  }
  0x17   :  { %s71_s25 = sshll.u32 %s6051_s24, 4  ;;  %s6052_s3 = smov [#allocation11]   ;;  %s72_s25 = int_to_ptr.vmem [resolvable:$true] %s71_s25 }
  0x18   :  { %s97_s26 = sshll.u32 %s6052_s3, 4  ;;  %s5822_s27 = scalar_lea.vmem %s72_s25, 64  ;;  %s98_s26 = int_to_ptr.vmem [resolvable:$true] %s97_s26 }
  0x19   :  { %p5823_p5 = scmp.ne.s32.totalorder %s72_s25, %s5822_s27  ;;  %p5827_p6 = scmp.lt.s32.totalorder %s72_s25, %s72_s25 }
  0x1a   :  { %p5828_p7 = scmp.lt.s32.totalorder %s5822_s27, %s5822_s27 }
  0x1c   :  { %52 = dma.hbm_to_vmem [thread:$0]  %s6479_s23, 8192, %s47_s30, [#allocation6], %s6049_s21, %s6049_s21, %s6050_s1  }
  0x1d   :  { %p5829_p8 = por %p5828_p7, %p5827_p6 }
  0x1f   :  { %p5830_p9 = pnand %p5829_p8, %p5823_p5 }
  0x21   :  { %5833 = shalt.err (!%p5830_p9)
}
  0x22   :  { %74 = dma.hbm_to_vmem [thread:$0]  %s6459_s4, 64, %s72_s25, [#allocation9]  }
  0x23   :  { %s5842_s0 = scalar_lea.vmem %s98_s26, 64  ;;  %p5847_p11 = scmp.lt.s32.totalorder %s98_s26, %s98_s26 }
  0x24   :  { %p5843_p10 = scmp.ne.s32.totalorder %s98_s26, %s5842_s0  ;;  %p5848_p12 = scmp.lt.s32.totalorder %s5842_s0, %s5842_s0 }
  0x26   :  { %p5849_p13 = por %p5848_p12, %p5847_p11 }
  0x28   :  { %p5850_p0 = pnand %p5849_p13, %p5843_p10 }
  0x2a   :  { %5853 = shalt.err (!%p5850_p0)
}
  0x2b   :  { %100 = dma.hbm_to_vmem [thread:$0]  %s6463_s8, 64, %s98_s26, [#allocation12]  }
  0x2c   :  { %s6053_s22 = smov [#allocation14]   ;;  %s6054_s23 = smov [#allocation17]  }
  0x2d   :  { %s123_s2 = sshll.u32 %s6053_s22, 4  ;;  %s147_s24 = sshll.u32 %s6054_s23, 4  ;;  %s124_s2 = int_to_ptr.vmem [resolvable:$true] %s123_s2  ;;  %s148_s24 = int_to_ptr.vmem [resolvable:$true] %s147_s24 }
  0x2e   :  { %s5862_s3 = scalar_lea.vmem %s124_s2, 64  ;;  %p5867_p2 = scmp.lt.s32.totalorder %s124_s2, %s124_s2 }
  0x2f   :  { %p5863_p1 = scmp.ne.s32.totalorder %s124_s2, %s5862_s3  ;;  %p5868_p3 = scmp.lt.s32.totalorder %s5862_s3, %s5862_s3 }
  0x31   :  { %p5869_p4 = por %p5868_p3, %p5867_p2 }
  0x33   :  { %p5870_p5 = pnand %p5869_p4, %p5863_p1 }
  0x35   :  { %5873 = shalt.err (!%p5870_p5)
}
  0x36   :  { %126 = dma.hbm_to_vmem [thread:$0]  %s6467_s12, 64, %s124_s2, [#allocation15]  }
  0x37   :  { %s5882_s27 = scalar_lea.vmem %s148_s24, 64  ;;  %p5887_p7 = scmp.lt.s32.totalorder %s148_s24, %s148_s24 }
  0x38   :  { %p5883_p6 = scmp.ne.s32.totalorder %s148_s24, %s5882_s27  ;;  %p5888_p8 = scmp.lt.s32.totalorder %s5882_s27, %s5882_s27 }
  0x3a   :  { %p5889_p9 = por %p5888_p8, %p5887_p7 }
  0x3c   :  { %p5890_p10 = pnand %p5889_p9, %p5883_p6 }
  0x3e   :  { %5893 = shalt.err (!%p5890_p10)
}
  0x3f   :  { %150 = dma.hbm_to_vmem [thread:$0]  %s6470_s15, 64, %s148_s24, [#allocation18]  }
  0x40   :  { %s6055_s28 = smov [#allocation2]   ;;  %s6056_s0 = smov [#allocation7]  }
  0x41   :  { %s37_s29 = sshll.u32 %s6055_s28, 4  ;;  %s59_s30 = sshll.u32 %s6056_s0, 4  ;;  %s38_s29 = int_to_ptr.vmem [resolvable:$true] %s37_s29  ;;  %s60_s30 = int_to_ptr.vmem [resolvable:$true] %s59_s30 }
  0x42   :  { %s5902_s20 = scalar_lea.vmem %s38_s29, 256  ;;  %p5907_p12 = scmp.lt.s32.totalorder %s38_s29, %s38_s29 }
  0x43   :  { %p5903_p11 = scmp.ne.s32.totalorder %s38_s29, %s5902_s20  ;;  %p5908_p13 = scmp.lt.s32.totalorder %s5902_s20, %s5902_s20 }
  0x45   :  { %p5909_p0 = por %p5908_p13, %p5907_p12 }
  0x47   :  { %p5910_p1 = pnand %p5909_p0, %p5903_p11 }
  0x49   :  { %5913 = shalt.err (!%p5910_p1)
}
  0x4a   :  { %s6480_s2 = sld [smem:[#allocation28_spill]]  ;;  %s5922_s23 = scalar_lea.vmem %s60_s30, 64 }
  0x4b   :  { %p5923_p2 = scmp.ne.s32.totalorder %s60_s30, %s5922_s23  ;;  %p5927_p3 = scmp.lt.s32.totalorder %s60_s30, %s60_s30 }
  0x4c   :  { %p5928_p4 = scmp.lt.s32.totalorder %s5922_s23, %s5922_s23 }
  0x4e   :  { %p5929_p5 = por %p5928_p4, %p5927_p3 }
  0x50   :  { %40 = dma.hbm_to_vmem [thread:$0]  %s6480_s2, 256, %s38_s29, [#allocation3]  }
  0x51   :  { %p5930_p6 = pnand %p5929_p5, %p5923_p2 }
  0x53   :  { %5933 = shalt.err (!%p5930_p6)
}
  0x54   :  { %s6481_s3 = sld [smem:[#allocation30_spill]]  ;;  %s6057_s4 = smov [#allocation10]  }
  0x55   :  { %s80_s25 = sshll.u32 %s6057_s4, 4  ;;  %s6058_s27 = smov [#allocation13]   ;;  %s81_s25 = int_to_ptr.vmem [resolvable:$true] %s80_s25 }
  0x56   :  { %s106_s8 = sshll.u32 %s6058_s27, 4  ;;  %s5942_s26 = scalar_lea.vmem %s81_s25, 16384  ;;  %s107_s8 = int_to_ptr.vmem [resolvable:$true] %s106_s8 }
  0x57   :  { %p5943_p7 = scmp.ne.s32.totalorder %s81_s25, %s5942_s26  ;;  %p5947_p8 = scmp.lt.s32.totalorder %s81_s25, %s81_s25 }
  0x58   :  { %p5948_p9 = scmp.lt.s32.totalorder %s5942_s26, %s5942_s26 }
  0x5a   :  { %62 = dma.hbm_to_vmem [thread:$0]  %s6481_s3, 64, %s60_s30, [#allocation6]  }
  0x5b   :  { %p5949_p10 = por %p5948_p9, %p5947_p8 }
  0x5d   :  { %p5950_p11 = pnand %p5949_p10, %p5943_p7 }
  0x5f   :  { %5953 = shalt.err (!%p5950_p11)
}
  0x60   :  { %86 = dma.hbm_to_vmem [thread:$0]  %s6460_s5, 16384, %s81_s25, [#allocation9], %s6049_s21, %s6049_s21, %s6050_s1  }
  0x61   :  { %s5962_s0 = scalar_lea.vmem %s107_s8, 16384  ;;  %p5967_p13 = scmp.lt.s32.totalorder %s107_s8, %s107_s8 }
  0x62   :  { %p5963_p12 = scmp.ne.s32.totalorder %s107_s8, %s5962_s0  ;;  %p5968_p0 = scmp.lt.s32.totalorder %s5962_s0, %s5962_s0 }
  0x64   :  { %p5969_p1 = por %p5968_p0, %p5967_p13 }
  0x66   :  { %p5970_p2 = pnand %p5969_p1, %p5963_p12 }
  0x68   :  { %5973 = shalt.err (!%p5970_p2)
}
  0x69   :  { %112 = dma.hbm_to_vmem [thread:$0]  %s6464_s9, 16384, %s107_s8, [#allocation12], %s6049_s21, %s6049_s21, %s6050_s1  }
  0x6a   :  { %s6059_s12 = smov [#allocation16]   ;;  %s6060_s2 = smov [#allocation19]  }
  0x6b   :  { %s132_s22 = sshll.u32 %s6059_s12, 4  ;;  %s158_s5 = sshll.u32 %s6060_s2, 4  ;;  %s133_s22 = int_to_ptr.vmem [resolvable:$true] %s132_s22  ;;  %s159_s5 = int_to_ptr.vmem [resolvable:$true] %s158_s5 }
  0x6c   :  { %s5982_s23 = scalar_lea.vmem %s133_s22, 16384  ;;  %p5987_p4 = scmp.lt.s32.totalorder %s133_s22, %s133_s22 }
  0x6d   :  { %p5983_p3 = scmp.ne.s32.totalorder %s133_s22, %s5982_s23  ;;  %p5988_p5 = scmp.lt.s32.totalorder %s5982_s23, %s5982_s23 }
  0x6f   :  { %p5989_p6 = por %p5988_p5, %p5987_p4 }
  0x71   :  { %p5990_p7 = pnand %p5989_p6, %p5983_p3 }
  0x73   :  { %5993 = shalt.err (!%p5990_p7)
}
  0x74   :  { %138 = dma.hbm_to_vmem [thread:$0]  %s6468_s13, 16384, %s133_s22, [#allocation15], %s6049_s21, %s6049_s21, %s6050_s1  }
  0x75   :  { %s6002_s9 = scalar_lea.vmem %s159_s5, 4096  ;;  %p6007_p9 = scmp.lt.s32.totalorder %s159_s5, %s159_s5 }
  0x76   :  { %p6003_p8 = scmp.ne.s32.totalorder %s159_s5, %s6002_s9  ;;  %p6008_p10 = scmp.lt.s32.totalorder %s6002_s9, %s6002_s9 }
  0x78   :  { %p6009_p11 = por %p6008_p10, %p6007_p9 }
  0x7a   :  { %p6010_p12 = pnand %p6009_p11, %p6003_p8 }
  0x7c   :  { %6013 = shalt.err (!%p6010_p12)
}
  0x7d   :  { %s6061_s3 = smov 64   ;;  %s6062_s4 = smov 4  }
  0x7e   :  { %164 = dma.hbm_to_vmem [thread:$0]  %s6472_s17, 4096, %s159_s5, [#allocation18], %s6061_s3, %s6061_s3, %s6062_s4  }
  0x7f   :  { %6034 = dma.done.wait [#allocation3], 256  }
  0x80   :  { %6035 = vsyncadd [#allocation3], 4294967040 }
  0x81   :  { %6036 = dma.done.wait [#allocation6], 8256  }
  0x82   :  { %6037 = vsyncadd [#allocation6], 4294959040 }
  0x83   :  { %6038 = dma.done.wait [#allocation9], 16448  }
  0x84   :  { %6039 = vsyncadd [#allocation9], 4294950848 }
  0x85   :  { %6040 = dma.done.wait [#allocation12], 16448  }
  0x86   :  { %6041 = vsyncadd [#allocation12], 4294950848 }
  0x87   :  { %6042 = dma.done.wait [#allocation15], 16448  }
  0x88   :  { %6043 = vsyncadd [#allocation15], 4294950848 }
  0x89   :  { %6044 = dma.done.wait [#allocation18], 4160  }
  0x8a   :  { %6045 = vsyncadd [#allocation18], 4294963136  ;;  %v5082_v0 = vld [vmem:[#allocation5 + $0xe4] ss:$16 sps:$4 sm:$0xff]   ;;  %v5084_v1 = vld [vmem:[#allocation5 + $0xec] ss:$16 sps:$4 sm:$0xff]  }
  0x8b   :  { %611 = vmatprep.subr.bf16.mxu0 %v5082_v0  ;;  %v5086_v2 = vld [vmem:[#allocation5 + $0xe0] ss:$16 sps:$4 sm:$0xff]   ;;  %v5087_v3 = vld [vmem:[#allocation5 + $0xe8] ss:$16 sps:$4 sm:$0xff]   ;;  %652 = vmatprep.subr.bf16.mxu1 %v5084_v1  ;;  %v5088_v4 = vld [vmem:[#allocation5 + $0xc4] ss:$16 sps:$4 sm:$0xff]  }
  0x8c   :  { %612 = vmatpush1.bf16.msra.mxu0 %v5086_v2  ;;  %653 = vmatpush1.bf16.msra.mxu1 %v5087_v3  ;;  %v5090_v5 = vld [vmem:[#allocation5 + $0xcc] ss:$16 sps:$4 sm:$0xff]   ;;  %v5092_v6 = vld [vmem:[#allocation5 + $0xc0] ss:$16 sps:$4 sm:$0xff]   ;;  %v5093_v7 = vld [vmem:[#allocation5 + $0xc8] ss:$16 sps:$4 sm:$0xff]  }
  0x8d   :  { %613 = vmatprep.subr.bf16.mxu0 %v5088_v4  ;;  %654 = vmatprep.subr.bf16.mxu1 %v5090_v5  ;;  %v5094_v8 = vld [vmem:[#allocation5 + $0xa4] ss:$16 sps:$4 sm:$0xff]   ;;  %v5096_v9 = vld [vmem:[#allocation5 + $0xac] ss:$16 sps:$4 sm:$0xff]   ;;  %v5098_v10 = vld [vmem:[#allocation5 + $0xa0] ss:$16 sps:$4 sm:$0xff]  }
  0x8e   :  { %v5099_v11 = vld [vmem:[#allocation5 + $0xa8] ss:$16 sps:$4 sm:$0xff]   ;;  %v5100_v12 = vld [vmem:[#allocation5 + $0x84] ss:$16 sps:$4 sm:$0xff]   ;;  %v5102_v13 = vld [vmem:[#allocation5 + $0x8c] ss:$16 sps:$4 sm:$0xff]  }
  0x8f   :  { %v5104_v14 = vld [vmem:[#allocation5 + $0x80] ss:$16 sps:$4 sm:$0xff]   ;;  %v5105_v15 = vld [vmem:[#allocation5 + $0x88] ss:$16 sps:$4 sm:$0xff]   ;;  %v5106_v16 = vld [vmem:[#allocation5 + $0x64] ss:$16 sps:$4 sm:$0xff]  }
  0x90   :  { %614 = vmatpush1.bf16.msra.mxu0 %v5092_v6  ;;  %655 = vmatpush1.bf16.msra.mxu1 %v5093_v7  ;;  %v5108_v17 = vld [vmem:[#allocation5 + $0x6c] ss:$16 sps:$4 sm:$0xff]   ;;  %v5110_v18 = vld [vmem:[#allocation5 + $0x60] ss:$16 sps:$4 sm:$0xff]   ;;  %v5111_v19 = vld [vmem:[#allocation5 + $0x68] ss:$16 sps:$4 sm:$0xff]  }
  0x91   :  { %615 = vmatprep.subr.bf16.mxu0 %v5094_v8  ;;  %656 = vmatprep.subr.bf16.mxu1 %v5096_v9  ;;  %v5112_v20 = vld [vmem:[#allocation5 + $0x44] ss:$16 sps:$4 sm:$0xff]   ;;  %v5114_v21 = vld [vmem:[#allocation5 + $0x4c] ss:$16 sps:$4 sm:$0xff]   ;;  %v5116_v22 = vld [vmem:[#allocation5 + $0x40] ss:$16 sps:$4 sm:$0xff]  }
  0x92   :  { %v5117_v23 = vld [vmem:[#allocation5 + $0x48] ss:$16 sps:$4 sm:$0xff]   ;;  %v5118_v24 = vld [vmem:[#allocation5 + $0x24] ss:$16 sps:$4 sm:$0xff]   ;;  %v5120_v25 = vld [vmem:[#allocation5 + $0x2c] ss:$16 sps:$4 sm:$0xff]  }
  0x93   :  { %v5122_v26 = vld [vmem:[#allocation5 + $0x20] ss:$16 sps:$4 sm:$0xff]   ;;  %v5123_v27 = vld [vmem:[#allocation5 + $0x28] ss:$16 sps:$4 sm:$0xff]   ;;  %v5124_v28 = vld [vmem:[#allocation5 + $0x4] ss:$16 sps:$4 sm:$0xff]  }
  0x94   :  { %616 = vmatpush1.bf16.msra.mxu0 %v5098_v10  ;;  %657 = vmatpush1.bf16.msra.mxu1 %v5099_v11  ;;  %v5126_v29 = vld [vmem:[#allocation5 + $0xc] ss:$16 sps:$4 sm:$0xff]   ;;  %v5128_v30 = vld [vmem:[#allocation5] ss:$16 sps:$4 sm:$0xff]   ;;  %v5129_v31 = vld [vmem:[#allocation5 + $0x8] ss:$16 sps:$4 sm:$0xff]  }
  0x95   :  { %617 = vmatprep.subr.bf16.mxu0 %v5100_v12  ;;  %658 = vmatprep.subr.bf16.mxu1 %v5102_v13  ;;  %v5130_v32 = vld [vmem:[#allocation5 + $0x1e4] ss:$16 sps:$4 sm:$0xff]   ;;  %v5132_v33 = vld [vmem:[#allocation5 + $0x1ec] ss:$16 sps:$4 sm:$0xff]   ;;  %v5134_v34 = vld [vmem:[#allocation5 + $0x1e0] ss:$16 sps:$4 sm:$0xff]  }
  0x96   :  { %v5135_v35 = vld [vmem:[#allocation5 + $0x1e8] ss:$16 sps:$4 sm:$0xff]   ;;  %v5136_v36 = vld [vmem:[#allocation5 + $0x1c4] ss:$16 sps:$4 sm:$0xff]   ;;  %v5138_v37 = vld [vmem:[#allocation5 + $0x1cc] ss:$16 sps:$4 sm:$0xff]  }
  0x97   :  { %v5140_v38 = vld [vmem:[#allocation5 + $0x1c0] ss:$16 sps:$4 sm:$0xff]   ;;  %v5141_v39 = vld [vmem:[#allocation5 + $0x1c8] ss:$16 sps:$4 sm:$0xff]   ;;  %v5142_v40 = vld [vmem:[#allocation5 + $0x1a4] ss:$16 sps:$4 sm:$0xff]  }
  0x98   :  { %618 = vmatpush1.bf16.msra.mxu0 %v5104_v14  ;;  %659 = vmatpush1.bf16.msra.mxu1 %v5105_v15  ;;  %v5144_v41 = vld [vmem:[#allocation5 + $0x1ac] ss:$16 sps:$4 sm:$0xff]   ;;  %v5146_v42 = vld [vmem:[#allocation5 + $0x1a0] ss:$16 sps:$4 sm:$0xff]   ;;  %v5147_v43 = vld [vmem:[#allocation5 + $0x1a8] ss:$16 sps:$4 sm:$0xff]  }
  0x99   :  { %619 = vmatprep.subr.bf16.mxu0 %v5106_v16  ;;  %660 = vmatprep.subr.bf16.mxu1 %v5108_v17  ;;  %v5148_v44 = vld [vmem:[#allocation5 + $0x184] ss:$16 sps:$4 sm:$0xff]   ;;  %v5150_v45 = vld [vmem:[#allocation5 + $0x18c] ss:$16 sps:$4 sm:$0xff]   ;;  %v5152_v46 = vld [vmem:[#allocation5 + $0x180] ss:$16 sps:$4 sm:$0xff]  }
  0x9a   :  { %v5153_v47 = vld [vmem:[#allocation5 + $0x188] ss:$16 sps:$4 sm:$0xff]   ;;  %v5154_v49 = vld [vmem:[#allocation5 + $0x164] ss:$16 sps:$4 sm:$0xff]   ;;  %v5156_v50 = vld [vmem:[#allocation5 + $0x16c] ss:$16 sps:$4 sm:$0xff]  }
  0x9b   :  { %v202_v48 = vld [vmem:[#allocation2 + $0x8] sm:$0xff]  ;;  %v5158_v52 = vld [vmem:[#allocation5 + $0x160] ss:$16 sps:$4 sm:$0xff]   ;;  %v5160_v54 = vld [vmem:[#allocation5 + $0x144] ss:$16 sps:$4 sm:$0xff]   ;;  %s6482_s21 = sld [smem:[#allocation31_spill]] }
  0x9c   :  { %620 = vmatpush1.bf16.msra.mxu0 %v5110_v18  ;;  %661 = vmatpush1.bf16.msra.mxu1 %v5111_v19  ;;  %v204_v51 = vpack.c.bf16 %v202_v48, %v202_v48  ;;  %v5159_v53 = vld [vmem:[#allocation5 + $0x168] ss:$16 sps:$4 sm:$0xff]   ;;  %v5162_v55 = vld [vmem:[#allocation5 + $0x14c] ss:$16 sps:$4 sm:$0xff]   ;;  %v5164_v56 = vld [vmem:[#allocation5 + $0x140] ss:$16 sps:$4 sm:$0xff]  }
  0x9d   :  { %621 = vmatprep.subr.bf16.mxu0 %v5112_v20  ;;  %662 = vmatprep.subr.bf16.mxu1 %v5114_v21  ;;  %v5165_v57 = vld [vmem:[#allocation5 + $0x148] ss:$16 sps:$4 sm:$0xff]   ;;  %v5166_v58 = vld [vmem:[#allocation5 + $0x124] ss:$16 sps:$4 sm:$0xff]   ;;  %v5168_v59 = vld [vmem:[#allocation5 + $0x12c] ss:$16 sps:$4 sm:$0xff]  }
  0x9e   :  { %643 = vmatprep.mubr.bf16.mxu0 %v204_v51  ;;  %684 = vmatprep.mubr.bf16.mxu1 %v204_v51  ;;  %v5170_v60 = vld [vmem:[#allocation5 + $0x120] ss:$16 sps:$4 sm:$0xff]   ;;  %v5171_v61 = vld [vmem:[#allocation5 + $0x128] ss:$16 sps:$4 sm:$0xff]   ;;  %v5172_v62 = vld [vmem:[#allocation5 + $0x104] ss:$16 sps:$4 sm:$0xff]  }
  0x9f   :  { %v5174_v63 = vld [vmem:[#allocation5 + $0x10c] ss:$16 sps:$4 sm:$0xff]   ;;  %v5176_v0 = vld [vmem:[#allocation5 + $0x100] ss:$16 sps:$4 sm:$0xff]   ;;  %v5177_v1 = vld [vmem:[#allocation5 + $0x108] ss:$16 sps:$4 sm:$0xff]  }
  0xa0   :  { %622 = vmatpush1.bf16.msra.mxu0 %v5116_v22  ;;  %663 = vmatpush1.bf16.msra.mxu1 %v5117_v23  ;;  %v201_v2 = vld [vmem:[#allocation2] sm:$0xff]  ;;  %v5178_v4 = vld [vmem:[#allocation10 + $0xe0] ss:$16 sps:$4 sm:$0xff]   ;;  %v5180_v5 = vld [vmem:[#allocation10 + $0xe4] ss:$16 sps:$4 sm:$0xff]   ;;  %s6065_s12 = smov [#allocation20]  }
  0xa1   :  { %623 = vmatprep.subr.bf16.mxu0 %v5118_v24  ;;  %664 = vmatprep.subr.bf16.mxu1 %v5120_v25  ;;  %v203_v3 = vpack.c.bf16 %v201_v2, %v201_v2  ;;  %v5181_v6 = vld [vmem:[#allocation10 + $0x2e0] ss:$16 sps:$4 sm:$0xff]   ;;  %v5183_v7 = vld [vmem:[#allocation10 + $0x2e4] ss:$16 sps:$4 sm:$0xff]   ;;  %s4517_s22 = sshll.u32 %s6065_s12, 4  ;;  %s4518_s22 = int_to_ptr.vmem [resolvable:$true] %s4517_s22 }
  0xa2   :  { %v5186_v8 = vld [vmem:[#allocation10 + $0xc4] ss:$16 sps:$4 sm:$0xff]   ;;  %v5184_v10 = vld [vmem:[#allocation10 + $0xc0] ss:$16 sps:$4 sm:$0xff]   ;;  %s6014_s2 = scalar_lea.vmem %s4518_s22, 128  ;;  %p6019_p0 = scmp.lt.s32.totalorder %s4518_s22, %s4518_s22 }
  0xa3   :  { %v5189_v9 = vld [vmem:[#allocation10 + $0x2c4] ss:$16 sps:$4 sm:$0xff]   ;;  %v5187_v11 = vld [vmem:[#allocation10 + $0x2c0] ss:$16 sps:$4 sm:$0xff]   ;;  %p6015_p13 = scmp.ne.s32.totalorder %s4518_s22, %s6014_s2  ;;  %p6020_p1 = scmp.lt.s32.totalorder %s6014_s2, %s6014_s2 }
  0xa4   :  { %624 = vmatpush1.bf16.msra.mxu0 %v5122_v26  ;;  %665 = vmatpush1.bf16.msra.mxu1 %v5123_v27  ;;  %v5192_v12 = vld [vmem:[#allocation10 + $0xa4] ss:$16 sps:$4 sm:$0xff]   ;;  %v5190_v14 = vld [vmem:[#allocation10 + $0xa0] ss:$16 sps:$4 sm:$0xff]  }
  0xa5   :  { %625 = vmatprep.subr.bf16.mxu0 %v5124_v28  ;;  %666 = vmatprep.subr.bf16.mxu1 %v5126_v29  ;;  %v5195_v13 = vld [vmem:[#allocation10 + $0x2a4] ss:$16 sps:$4 sm:$0xff]   ;;  %v5193_v15 = vld [vmem:[#allocation10 + $0x2a0] ss:$16 sps:$4 sm:$0xff]   ;;  %p6021_p2 = por %p6020_p1, %p6019_p0 }
  0xa6   :  { %v5198_v16 = vld [vmem:[#allocation10 + $0x84] ss:$16 sps:$4 sm:$0xff]   ;;  %v5196_v17 = vld [vmem:[#allocation10 + $0x80] ss:$16 sps:$4 sm:$0xff]  }
  0xa7   :  { %v5201_v18 = vld [vmem:[#allocation10 + $0x284] ss:$16 sps:$4 sm:$0xff]   ;;  %v5199_v19 = vld [vmem:[#allocation10 + $0x280] ss:$16 sps:$4 sm:$0xff]   ;;  %p6022_p3 = pnand %p6021_p2, %p6015_p13 }
  0xa8   :  { %626 = vmatpush1.bf16.msra.mxu0 %v5128_v30  ;;  %667 = vmatpush1.bf16.msra.mxu1 %v5129_v31  ;;  %v5204_v20 = vld [vmem:[#allocation10 + $0x64] ss:$16 sps:$4 sm:$0xff]   ;;  %v5202_v22 = vld [vmem:[#allocation10 + $0x60] ss:$16 sps:$4 sm:$0xff]  }
  0xa9   :  { %627 = vmatprep.subr.bf16.mxu0 %v5130_v32  ;;  %668 = vmatprep.subr.bf16.mxu1 %v5132_v33  ;;  %v5207_v21 = vld [vmem:[#allocation10 + $0x264] ss:$16 sps:$4 sm:$0xff]   ;;  %v5205_v23 = vld [vmem:[#allocation10 + $0x260] ss:$16 sps:$4 sm:$0xff]   ;;  %v271_v32 = vlaneseq }
  0xaa   :  { %v5210_v24 = vld [vmem:[#allocation10 + $0x44] ss:$16 sps:$4 sm:$0xff]   ;;  %v5208_v26 = vld [vmem:[#allocation10 + $0x40] ss:$16 sps:$4 sm:$0xff]  }
  0xab   :  { %v5213_v25 = vld [vmem:[#allocation10 + $0x244] ss:$16 sps:$4 sm:$0xff]   ;;  %v5211_v27 = vld [vmem:[#allocation10 + $0x240] ss:$16 sps:$4 sm:$0xff]   ;;  %v6211_v33 = vshrl.u32 %v271_v32, 7 }
  0xac   :  { %628 = vmatpush2.bf16.msra.mxu0 %v5134_v34  ;;  %669 = vmatpush2.bf16.msra.mxu1 %v5135_v35  ;;  %v5216_v28 = vld [vmem:[#allocation10 + $0x24] ss:$16 sps:$4 sm:$0xff]   ;;  %v5214_v30 = vld [vmem:[#allocation10 + $0x20] ss:$16 sps:$4 sm:$0xff]  }
  0xad   :  { %629 = vmatprep.subr.bf16.mxu0 %v5136_v36  ;;  %670 = vmatprep.subr.bf16.mxu1 %v5138_v37  ;;  %v5219_v29 = vld [vmem:[#allocation10 + $0x224] ss:$16 sps:$4 sm:$0xff]   ;;  %v5217_v31 = vld [vmem:[#allocation10 + $0x220] ss:$16 sps:$4 sm:$0xff]   ;;  %v6214_v34 = vsub.s32 0, %v6211_v33  ;;  %v6217_v35 = vsub.s32 2, %v6211_v33 }
  0xae   :  { %v269_v36 = vld [vmem:[#allocation7] sm:$0xf]  ;;  %v6220_v37 = vsub.s32 1, %v6211_v33  ;;  %v5225_v2 = vld [vmem:[#allocation10 + $0x204] ss:$16 sps:$4 sm:$0xff]  }
  0xaf   :  { %v5265_v32 = vld [vmem:[#allocation10 + $0x320] ss:$16 sps:$4 sm:$0xff]  }
  0xb0   :  { %630 = vmatpush2.bf16.msra.mxu0 %v5140_v38  ;;  %671 = vmatpush2.bf16.msra.mxu1 %v5141_v39  ;;  %v274_v38 = vrot.slane %v269_v36, %v6214_v34  ;;  %v282_v39 = vrot.slane %v269_v36, %v6217_v35 }
  0xb1   :  { %631 = vmatprep.subr.bf16.mxu0 %v5142_v40  ;;  %672 = vmatprep.subr.bf16.mxu1 %v5144_v41  ;;  %v278_v40 = vrot.slane %v269_v36, %v6220_v37  ;;  %v6226_v41 = vsub.s32 3, %v6211_v33 }
  0xb4   :  { %632 = vmatpush2.bf16.msra.mxu0 %v5146_v42  ;;  %673 = vmatpush2.bf16.msra.mxu1 %v5147_v43 }
  0xb5   :  { %633 = vmatprep.subr.bf16.mxu0 %v5148_v44  ;;  %674 = vmatprep.subr.bf16.mxu1 %v5150_v45 }
  0xb8   :  { %634 = vmatpush2.bf16.msra.mxu0 %v5152_v46  ;;  %675 = vmatpush2.bf16.msra.mxu1 %v5153_v47 }
  0xb9   :  { %635 = vmatprep.subr.bf16.mxu0 %v5154_v49  ;;  %676 = vmatprep.subr.bf16.mxu1 %v5156_v50  ;;  %v286_v49 = vrot.slane %v269_v36, %v6226_v41  ;;  %v5270_v36 = vld [vmem:[#allocation10 + $0x104] ss:$16 sps:$4 sm:$0xff]  }
  0xbc   :  { %636 = vmatpush2.bf16.msra.mxu0 %v5158_v52  ;;  %677 = vmatpush2.bf16.msra.mxu1 %v5159_v53 }
  0xbd   :  { %637 = vmatprep.subr.bf16.mxu0 %v5160_v54  ;;  %678 = vmatprep.subr.bf16.mxu1 %v5162_v55 }
  0xc0   :  { %638 = vmatpush2.bf16.msra.mxu0 %v5164_v56  ;;  %679 = vmatpush2.bf16.msra.mxu1 %v5165_v57 }
  0xc1   :  { %639 = vmatprep.subr.bf16.mxu0 %v5166_v58  ;;  %680 = vmatprep.subr.bf16.mxu1 %v5168_v59 }
  0xc4   :  { %640 = vmatpush2.bf16.msra.mxu0 %v5170_v60  ;;  %681 = vmatpush2.bf16.msra.mxu1 %v5171_v61 }
  0xc5   :  { %641 = vmatprep.subr.bf16.mxu0 %v5172_v62  ;;  %682 = vmatprep.subr.bf16.mxu1 %v5174_v63 }
  0xc8   :  { %642 = vmatpush2.bf16.msra.mxu0 %v5176_v0  ;;  %683 = vmatpush2.bf16.msra.mxu1 %v5177_v1  ;;  %v5222_v1 = vld [vmem:[#allocation10 + $0x4] ss:$16 sps:$4 sm:$0xff]  }
  0xc9   :  { %1636 = vmatprep.subr.bf16.mxu0 %v5180_v5  ;;  %1677 = vmatprep.subr.bf16.mxu1 %v5183_v7  ;;  %v5228_v5 = vld [vmem:[#allocation10 + $0x1e4] ss:$16 sps:$4 sm:$0xff]   ;;  %v5226_v7 = vld [vmem:[#allocation10 + $0x1e0] ss:$16 sps:$4 sm:$0xff]  }
  0xcb   :  { %644 = vmatmul.mubr.bf16.vlgmr.msra.gmra.mxu0 %v203_v3  ;;  %685 = vmatmul.mubr.bf16.vlgmr.msra.gmra.mxu1 %v203_v3  ;;  %v5220_v3 = vld [vmem:[#allocation10] ss:$16 sps:$4 sm:$0xff]  }
  0xcc   :  { %1637 = vmatpush1.bf16.msra.mxu0 %v5178_v4  ;;  %1678 = vmatpush1.bf16.msra.mxu1 %v5181_v6  ;;  %v5223_v4 = vld [vmem:[#allocation10 + $0x200] ss:$16 sps:$4 sm:$0xff]   ;;  %v5231_v6 = vld [vmem:[#allocation10 + $0x3e4] ss:$16 sps:$4 sm:$0xff]  }
  0xcd   :  { %1638 = vmatprep.subr.bf16.mxu0 %v5186_v8  ;;  %1679 = vmatprep.subr.bf16.mxu1 %v5189_v9  ;;  %v5229_v8 = vld [vmem:[#allocation10 + $0x3e0] ss:$16 sps:$4 sm:$0xff]   ;;  %v5234_v9 = vld [vmem:[#allocation10 + $0x1c4] ss:$16 sps:$4 sm:$0xff]  }
  0xd0   :  { %1639 = vmatpush1.bf16.msra.mxu0 %v5184_v10  ;;  %1680 = vmatpush1.bf16.msra.mxu1 %v5187_v11  ;;  %v5237_v10 = vld [vmem:[#allocation10 + $0x3c4] ss:$16 sps:$4 sm:$0xff]   ;;  %v5232_v11 = vld [vmem:[#allocation10 + $0x1c0] ss:$16 sps:$4 sm:$0xff]  }
  0xd1   :  { %1640 = vmatprep.subr.bf16.mxu0 %v5192_v12  ;;  %1681 = vmatprep.subr.bf16.mxu1 %v5195_v13  ;;  %v5235_v12 = vld [vmem:[#allocation10 + $0x3c0] ss:$16 sps:$4 sm:$0xff]   ;;  %v5240_v13 = vld [vmem:[#allocation10 + $0x1a4] ss:$16 sps:$4 sm:$0xff]  }
  0xd4   :  { %1641 = vmatpush1.bf16.msra.mxu0 %v5190_v14  ;;  %1682 = vmatpush1.bf16.msra.mxu1 %v5193_v15  ;;  %v5243_v14 = vld [vmem:[#allocation10 + $0x3a4] ss:$16 sps:$4 sm:$0xff]   ;;  %v5238_v15 = vld [vmem:[#allocation10 + $0x1a0] ss:$16 sps:$4 sm:$0xff]  }
  0xd5   :  { %1642 = vmatprep.subr.bf16.mxu0 %v5198_v16  ;;  %1683 = vmatprep.subr.bf16.mxu1 %v5201_v18  ;;  %v5241_v16 = vld [vmem:[#allocation10 + $0x3a0] ss:$16 sps:$4 sm:$0xff]  }
  0xd6   :  { %v5244_v18 = vld [vmem:[#allocation10 + $0x180] ss:$16 sps:$4 sm:$0xff]  }
  0xd8   :  { %1643 = vmatpush1.bf16.msra.mxu0 %v5196_v17  ;;  %1684 = vmatpush1.bf16.msra.mxu1 %v5199_v19  ;;  %v5246_v17 = vld [vmem:[#allocation10 + $0x184] ss:$16 sps:$4 sm:$0xff]   ;;  %v5247_v19 = vld [vmem:[#allocation10 + $0x380] ss:$16 sps:$4 sm:$0xff]  }
  0xd9   :  { %1644 = vmatprep.subr.bf16.mxu0 %v5204_v20  ;;  %1685 = vmatprep.subr.bf16.mxu1 %v5207_v21  ;;  %v5249_v20 = vld [vmem:[#allocation10 + $0x384] ss:$16 sps:$4 sm:$0xff]  }
  0xda   :  { %v5252_v21 = vld [vmem:[#allocation10 + $0x164] ss:$16 sps:$4 sm:$0xff]  }
  0xdc   :  { %1645 = vmatpush1.bf16.msra.mxu0 %v5202_v22  ;;  %1686 = vmatpush1.bf16.msra.mxu1 %v5205_v23  ;;  %v5255_v22 = vld [vmem:[#allocation10 + $0x364] ss:$16 sps:$4 sm:$0xff]   ;;  %v5250_v23 = vld [vmem:[#allocation10 + $0x160] ss:$16 sps:$4 sm:$0xff]  }
  0xdd   :  { %1646 = vmatprep.subr.bf16.mxu0 %v5210_v24  ;;  %1687 = vmatprep.subr.bf16.mxu1 %v5213_v25  ;;  %v5253_v24 = vld [vmem:[#allocation10 + $0x360] ss:$16 sps:$4 sm:$0xff]   ;;  %v5258_v25 = vld [vmem:[#allocation10 + $0x144] ss:$16 sps:$4 sm:$0xff]  }
  0xe0   :  { %1647 = vmatpush1.bf16.msra.mxu0 %v5208_v26  ;;  %1688 = vmatpush1.bf16.msra.mxu1 %v5211_v27  ;;  %v5261_v26 = vld [vmem:[#allocation10 + $0x344] ss:$16 sps:$4 sm:$0xff]   ;;  %v5256_v27 = vld [vmem:[#allocation10 + $0x140] ss:$16 sps:$4 sm:$0xff]  }
  0xe1   :  { %1648 = vmatprep.subr.bf16.mxu0 %v5216_v28  ;;  %1689 = vmatprep.subr.bf16.mxu1 %v5219_v29  ;;  %v5259_v28 = vld [vmem:[#allocation10 + $0x340] ss:$16 sps:$4 sm:$0xff]   ;;  %v5264_v29 = vld [vmem:[#allocation10 + $0x124] ss:$16 sps:$4 sm:$0xff]  }
  0xe4   :  { %1649 = vmatpush1.bf16.msra.mxu0 %v5214_v30  ;;  %1690 = vmatpush1.bf16.msra.mxu1 %v5217_v31  ;;  %v5267_v30 = vld [vmem:[#allocation10 + $0x324] ss:$16 sps:$4 sm:$0xff]   ;;  %v5262_v31 = vld [vmem:[#allocation10 + $0x120] ss:$16 sps:$4 sm:$0xff]  }
  0xe5   :  { %1650 = vmatprep.subr.bf16.mxu0 %v5222_v1  ;;  %1691 = vmatprep.subr.bf16.mxu1 %v5225_v2 }
  0xe8   :  { %1651 = vmatpush1.bf16.msra.mxu0 %v5220_v3  ;;  %1692 = vmatpush1.bf16.msra.mxu1 %v5223_v4 }
  0xe9   :  { %1652 = vmatprep.subr.bf16.mxu0 %v5228_v5  ;;  %1693 = vmatprep.subr.bf16.mxu1 %v5231_v6 }
  0xec   :  { %1653 = vmatpush2.bf16.msra.mxu0 %v5226_v7  ;;  %1694 = vmatpush2.bf16.msra.mxu1 %v5229_v8 }
  0xed   :  { %1654 = vmatprep.subr.bf16.mxu0 %v5234_v9  ;;  %1695 = vmatprep.subr.bf16.mxu1 %v5237_v10 }
  0xf0   :  { %1655 = vmatpush2.bf16.msra.mxu0 %v5232_v11  ;;  %1696 = vmatpush2.bf16.msra.mxu1 %v5235_v12 }
  0xf1   :  { %1656 = vmatprep.subr.bf16.mxu0 %v5240_v13  ;;  %1697 = vmatprep.subr.bf16.mxu1 %v5243_v14 }
  0xf4   :  { %1657 = vmatpush2.bf16.msra.mxu0 %v5238_v15  ;;  %1698 = vmatpush2.bf16.msra.mxu1 %v5241_v16 }
  0xf5   :  { %1658 = vmatprep.subr.bf16.mxu0 %v5246_v17  ;;  %1699 = vmatprep.subr.bf16.mxu1 %v5249_v20 }
  0xf8   :  { %1659 = vmatpush2.bf16.msra.mxu0 %v5244_v18  ;;  %1700 = vmatpush2.bf16.msra.mxu1 %v5247_v19 }
  0xf9   :  { %1660 = vmatprep.subr.bf16.mxu0 %v5252_v21  ;;  %1701 = vmatprep.subr.bf16.mxu1 %v5255_v22 }
  0xfc   :  { %1661 = vmatpush2.bf16.msra.mxu0 %v5250_v23  ;;  %1702 = vmatpush2.bf16.msra.mxu1 %v5253_v24 }
  0xfd   :  { %1662 = vmatprep.subr.bf16.mxu0 %v5258_v25  ;;  %1703 = vmatprep.subr.bf16.mxu1 %v5261_v26 }
 0x100   :  { %1663 = vmatpush2.bf16.msra.mxu0 %v5256_v27  ;;  %1704 = vmatpush2.bf16.msra.mxu1 %v5259_v28 }
 0x101   :  { %1664 = vmatprep.subr.bf16.mxu0 %v5264_v29  ;;  %1705 = vmatprep.subr.bf16.mxu1 %v5267_v30 }
 0x104   :  { %1665 = vmatpush2.bf16.msra.mxu0 %v5262_v31  ;;  %1706 = vmatpush2.bf16.msra.mxu1 %v5265_v32 }
 0x105   :  { %1666 = vmatprep.subr.bf16.mxu0 %v5270_v36 }
 0x18b   :  { %v645_v42 = vpop.f32.mrf.mxu0  ;;  %v686_v43 = vpop.f32.mrf.mxu1 }
 0x18c   :  { %v6228_v44 = vadd.f32 %v645_v42, %v274_v38  ;;  %v6230_v45 = vadd.f32 %v686_v43, %v282_v39  ;;  %v5273_v38 = vld [vmem:[#allocation10 + $0x304] ss:$16 sps:$4 sm:$0xff]   ;;  %v5268_v39 = vld [vmem:[#allocation10 + $0x100] ss:$16 sps:$4 sm:$0xff]   ;;  %v5276_v42 = vld [vmem:[#allocation10 + $0xec] ss:$16 sps:$4 sm:$0xff]  }
 0x18d   :  { %v647_v46 = vpop.f32.mrf.mxu0  ;;  %v688_v47 = vpop.f32.mrf.mxu1  ;;  %1707 = vmatprep.subr.bf16.mxu1 %v5273_v38  ;;  %1667 = vmatpush2.bf16.msra.mxu0 %v5268_v39  ;;  %v5279_v43 = vld [vmem:[#allocation10 + $0x2ec] ss:$16 sps:$4 sm:$0xff]  }
 0x18e   :  { %v6232_v48 = vadd.f32 %v647_v46, %v278_v40  ;;  %v698_v52 = vmul.f32 %v6228_v44, %v6228_v44  ;;  %v700_v53 = vmul.f32 %v6230_v45, %v6230_v45  ;;  %v6243_v58 = vadd.f32 %v688_v47, %v286_v49  ;;  %v5271_v40 = vld [vmem:[#allocation10 + $0x300] ss:$16 sps:$4 sm:$0xff]   ;;  %1718 = vmatprep.subr.bf16.mxu0 %v5276_v42 }
 0x18f   :  { %v649_v50 = vpop.f32.mrf.mxu0  ;;  %v690_v51 = vpop.f32.mrf.mxu1  ;;  %1708 = vmatpush2.bf16.msra.mxu1 %v5271_v40  ;;  %v6063_v49 = vmov 1966171168  }
 0x190   :  { %v699_v54 = vmul.f32 %v6232_v48, %v6232_v48  ;;  %v693_v55 = vadd.f32 %v6232_v48, %v6228_v44  ;;  %v701_v63 = vmul.f32 %v6243_v58, %v6243_v58  ;;  %1759 = vmatprep.subr.bf16.mxu1 %v5279_v43  ;;  %v737_v50 = vunpack.c.l.s4 %v6063_v49 }
 0x191   :  { %v650_v56 = vpop.f32.mrf.mxu0  ;;  %v691_v57 = vpop.f32.mrf.mxu1 }
 0x192   :  { %v694_v59 = vadd.f32 %v693_v55, %v6230_v45  ;;  %v702_v60 = vadd.f32 %v699_v54, %v698_v52  ;;  %v738_v54 = vunpack.c.0.s8 %v737_v50  ;;  %v4595_v56 = vld.sshfl [vmem:[%s6482_s21] sm:$0x33 pattern:$0x75316420] }
 0x194   :  { %v695_v61 = vadd.f32 %v694_v59, %v6243_v58  ;;  %v703_v62 = vadd.f32 %v702_v60, %v700_v53  ;;  %v4596_v59 = vld.sshfl [vmem:[#allocation8] sm:$0x33 pattern:$0x75316420]  ;;  %v6253_v60 = vsub.s32 %v738_v54, %v6211_v33 }
 0x196   :  { %696 = vadd.xlane.f32.xlu0 %v695_v61  ;;  %v704_v0 = vadd.f32 %v703_v62, %v701_v63  ;;  %v735_v61 = vcombine.high %v4595_v56, %v4595_v56  ;;  %v793_v63 = vcombine.high %v4596_v59, %v4596_v59  ;;  %v742_v1 = vrot.slane %v4595_v56, %v6253_v60  ;;  %v5285_v56 = vld [vmem:[#allocation10 + $0x2cc] ss:$16 sps:$4 sm:$0xff]  }
 0x197   :  { %v800_v3 = vrot.slane %v4596_v59, %v6253_v60  ;;  %v5283_v59 = vld [vmem:[#allocation10 + $0x2c8] ss:$16 sps:$4 sm:$0xff]  }
 0x198   :  { %v807_v2 = vrot.slane %v793_v63, %v6253_v60  ;;  %v750_v5 = vcombine.high %v742_v1, %v742_v1  ;;  %v753_v33 = vpack.i.b16 %v742_v1, %v742_v1  ;;  %v5286_v63 = vld [vmem:[#allocation10 + $0xa8] ss:$16 sps:$4 sm:$0xff]   ;;  %v5294_v1 = vld [vmem:[#allocation10 + $0x8c] ss:$16 sps:$4 sm:$0xff]  }
 0x199   :  { %v808_v7 = vcombine.high %v800_v3, %v800_v3  ;;  %v811_v13 = vpack.i.b16 %v800_v3, %v800_v3  ;;  %v5292_v3 = vld [vmem:[#allocation10 + $0x88] ss:$16 sps:$4 sm:$0xff]  }
 0x19a   :  { %705 = vadd.xlane.f32.xlu0 %v704_v0  ;;  %v749_v0 = vrot.slane %v735_v61, %v6253_v60  ;;  %v809_v6 = vcombine.high %v807_v2, %v807_v2  ;;  %v767_v10 = vpack.i.b16 %v750_v5, %v750_v5  ;;  %v818_v11 = vpack.i.b16 %v807_v2, %v807_v2  ;;  %v5288_v61 = vld [vmem:[#allocation10 + $0xac] ss:$16 sps:$4 sm:$0xff]  }
 0x19b   :  { %v825_v14 = vpack.i.b16 %v808_v7, %v808_v7  ;;  %v758_v22 = vrot.slane %v753_v33, %v6214_v34  ;;  %v5297_v2 = vld [vmem:[#allocation10 + $0x28c] ss:$16 sps:$4 sm:$0xff]   ;;  %v5298_v7 = vld [vmem:[#allocation10 + $0x68] ss:$16 sps:$4 sm:$0xff]  }
 0x19c   :  { %v751_v4 = vcombine.high %v749_v0, %v749_v0  ;;  %v760_v8 = vpack.i.b16 %v749_v0, %v749_v0  ;;  %v832_v12 = vpack.i.b16 %v809_v6, %v809_v6  ;;  %v772_v23 = vrot.slane %v767_v10, %v6214_v34  ;;  %v5289_v0 = vld [vmem:[#allocation10 + $0x2a8] ss:$16 sps:$4 sm:$0xff]   ;;  %v5300_v5 = vld [vmem:[#allocation10 + $0x6c] ss:$16 sps:$4 sm:$0xff]  }
 0x19d   :  { %v5303_v6 = vld [vmem:[#allocation10 + $0x26c] ss:$16 sps:$4 sm:$0xff]   ;;  %v5304_v10 = vld [vmem:[#allocation10 + $0x48] ss:$16 sps:$4 sm:$0xff]  }
 0x19e   :  { %v774_v9 = vpack.i.b16 %v751_v4, %v751_v4  ;;  %v765_v20 = vrot.slane %v760_v8, %v6214_v34  ;;  %v5295_v4 = vld [vmem:[#allocation10 + $0x288] ss:$16 sps:$4 sm:$0xff]   ;;  %v5309_v33 = vld [vmem:[#allocation10 + $0x24c] ss:$16 sps:$4 sm:$0xff]  }
 0x19f   :  { %v5301_v8 = vld [vmem:[#allocation10 + $0x268] ss:$16 sps:$4 sm:$0xff]  }
 0x1a0   :  { %v779_v21 = vrot.slane %v774_v9, %v6214_v34  ;;  %v5306_v9 = vld [vmem:[#allocation10 + $0x4c] ss:$16 sps:$4 sm:$0xff]  }
 0x21f   :  { %v697_v46 = vpop.xlane.xlu0 %696 }
 0x220   :  { %v707_v47 = vmul.f32 0.001953125, %v697_v46 }
 0x222   :  { %v709_v52 = vmul.f32 %v707_v47, %v707_v47  ;;  %v712_v15 = vsub.f32 %v6228_v44, %v707_v47  ;;  %v714_v16 = vsub.f32 %v6230_v45, %v707_v47  ;;  %v713_v17 = vsub.f32 %v6232_v48, %v707_v47 }
 0x223   :  { %v706_v51 = vpop.xlane.xlu0 %705  ;;  %v715_v18 = vsub.f32 %v6243_v58, %v707_v47  ;;  %v823_v44 = vrot.slane %v818_v11, %v6214_v34  ;;  %v837_v45 = vrot.slane %v832_v12, %v6214_v34  ;;  %v816_v48 = vrot.slane %v811_v13, %v6214_v34  ;;  %v5307_v11 = vld [vmem:[#allocation10 + $0x248] ss:$16 sps:$4 sm:$0xff]   ;;  %v5312_v12 = vld [vmem:[#allocation10 + $0x2c] ss:$16 sps:$4 sm:$0xff]  }
 0x224   :  { %v708_v53 = vmul.f32 0.001953125, %v706_v51  ;;  %v830_v58 = vrot.slane %v825_v14, %v6214_v34  ;;  %v6064_v47 = vmov 0   ;;  %v5274_v51 = vld [vmem:[#allocation10 + $0xe8] ss:$16 sps:$4 sm:$0xff]   ;;  %v5315_v13 = vld [vmem:[#allocation10 + $0x22c] ss:$16 sps:$4 sm:$0xff]  }
 0x225   :  { %v5310_v14 = vld [vmem:[#allocation10 + $0x28] ss:$16 sps:$4 sm:$0xff]  }
 0x226   :  { %v710_v55 = vsub.f32 %v708_v53, %v709_v52  ;;  %v5277_v52 = vld [vmem:[#allocation10 + $0x2e8] ss:$16 sps:$4 sm:$0xff]  }
 0x228   :  { %v711_v57 = vmax.f32 %v710_v55, 0.0  ;;  %v5282_v55 = vld [vmem:[#allocation10 + $0xcc] ss:$16 sps:$4 sm:$0xff]  }
 0x22a   :  { %v716_v62 = vadd.f32 1e-05, %v711_v57  ;;  %v5280_v57 = vld [vmem:[#allocation10 + $0xc8] ss:$16 sps:$4 sm:$0xff]  }
 0x22c   :  { %5786 = vrsqrt.f32 %v716_v62  ;;  %v5291_v62 = vld [vmem:[#allocation10 + $0x2ac] ss:$16 sps:$4 sm:$0xff]  }
 0x239   :  { %v5787_v19 = vpop.eup %5786 }
 0x23a   :  { %v719_v24 = vmul.f32 %v5787_v19, %v713_v17  ;;  %v721_v25 = vmul.f32 %v5787_v19, %v715_v18  ;;  %v718_v26 = vmul.f32 %v5787_v19, %v712_v15  ;;  %v720_v27 = vmul.f32 %v5787_v19, %v714_v16  ;;  %v5313_v15 = vld [vmem:[#allocation10 + $0x228] ss:$16 sps:$4 sm:$0xff]   ;;  %v5318_v16 = vld [vmem:[#allocation10 + $0xc] ss:$16 sps:$4 sm:$0xff]  }
 0x23b   :  { %v5321_v17 = vld [vmem:[#allocation10 + $0x20c] ss:$16 sps:$4 sm:$0xff]   ;;  %v5316_v18 = vld [vmem:[#allocation10 + $0x8] ss:$16 sps:$4 sm:$0xff]  }
 0x23c   :  { %v723_v28 = vpack.c.bf16 %v719_v24, %v719_v24  ;;  %v725_v29 = vpack.c.bf16 %v721_v25, %v721_v25  ;;  %v722_v30 = vpack.c.bf16 %v718_v26, %v718_v26  ;;  %v724_v31 = vpack.c.bf16 %v720_v27, %v720_v27  ;;  %v5319_v19 = vld [vmem:[#allocation10 + $0x208] ss:$16 sps:$4 sm:$0xff]   ;;  %v5330_v24 = vld [vmem:[#allocation10 + $0x1cc] ss:$16 sps:$4 sm:$0xff]  }
 0x23d   :  { %v5333_v25 = vld [vmem:[#allocation10 + $0x3cc] ss:$16 sps:$4 sm:$0xff]   ;;  %v5328_v26 = vld [vmem:[#allocation10 + $0x1c8] ss:$16 sps:$4 sm:$0xff]  }
 0x23e   :  { %v781_v32 = vmul.bf16 %v765_v20, %v723_v28  ;;  %v783_v36 = vmul.bf16 %v779_v21, %v725_v29  ;;  %v780_v38 = vmul.bf16 %v758_v22, %v722_v30  ;;  %v782_v39 = vmul.bf16 %v772_v23, %v724_v31  ;;  %v5324_v20 = vld [vmem:[#allocation10 + $0x1ec] ss:$16 sps:$4 sm:$0xff]   ;;  %v5322_v22 = vld [vmem:[#allocation10 + $0x1e8] ss:$16 sps:$4 sm:$0xff]  }
 0x23f   :  { %v5327_v21 = vld [vmem:[#allocation10 + $0x3ec] ss:$16 sps:$4 sm:$0xff]   ;;  %v5325_v23 = vld [vmem:[#allocation10 + $0x3e8] ss:$16 sps:$4 sm:$0xff]  }
 0x240   :  { %v839_v40 = vadd.bf16 %v823_v44, %v781_v32  ;;  %v841_v42 = vadd.bf16 %v837_v45, %v783_v36  ;;  %v838_v43 = vadd.bf16 %v816_v48, %v780_v38  ;;  %v840_v46 = vadd.bf16 %v830_v58, %v782_v39  ;;  %v5331_v27 = vld [vmem:[#allocation10 + $0x3c8] ss:$16 sps:$4 sm:$0xff]   ;;  %v5336_v44 = vld [vmem:[#allocation10 + $0x1ac] ss:$16 sps:$4 sm:$0xff]  }
 0x241   :  { %v5339_v45 = vld [vmem:[#allocation10 + $0x3ac] ss:$16 sps:$4 sm:$0xff]   ;;  %v5334_v48 = vld [vmem:[#allocation10 + $0x1a8] ss:$16 sps:$4 sm:$0xff]  }
 0x242   :  { %v843_v49 = vmax.bf16 %v6064_v47, %v839_v40  ;;  %v845_v50 = vmax.bf16 %v6064_v47, %v841_v42  ;;  %v6274_v53 = vmax.bf16 %v6064_v47, %v838_v43  ;;  %v6277_v54 = vmax.bf16 %v6064_v47, %v840_v46  ;;  %v5337_v58 = vld [vmem:[#allocation10 + $0x3a8] ss:$16 sps:$4 sm:$0xff]   ;;  %v5342_v28 = vld [vmem:[#allocation10 + $0x18c] ss:$16 sps:$4 sm:$0xff]  }
 0x243   :  { %v5345_v29 = vld [vmem:[#allocation10 + $0x38c] ss:$16 sps:$4 sm:$0xff]   ;;  %v5340_v30 = vld [vmem:[#allocation10 + $0x188] ss:$16 sps:$4 sm:$0xff]  }
 0x244   :  { %1668 = vmatprep.mubr.bf16.mxu0 %v843_v49  ;;  %1709 = vmatprep.mubr.bf16.mxu1 %v845_v50  ;;  %v5343_v31 = vld [vmem:[#allocation10 + $0x388] ss:$16 sps:$4 sm:$0xff]   ;;  %v5348_v32 = vld [vmem:[#allocation10 + $0x16c] ss:$16 sps:$4 sm:$0xff]  }
 0x245   :  { %1669 = vmatmul.mubr.bf16.vlgmr.msra.gmra.mxu0 %v6274_v53  ;;  %1710 = vmatmul.mubr.bf16.vlgmr.msra.gmra.mxu1 %v6277_v54  ;;  %v5351_v36 = vld [vmem:[#allocation10 + $0x36c] ss:$16 sps:$4 sm:$0xff]   ;;  %v5346_v38 = vld [vmem:[#allocation10 + $0x168] ss:$16 sps:$4 sm:$0xff]  }
 0x246   :  { %1719 = vmatpush1.bf16.msra.mxu0 %v5274_v51  ;;  %1760 = vmatpush1.bf16.msra.mxu1 %v5277_v52  ;;  %v5349_v39 = vld [vmem:[#allocation10 + $0x368] ss:$16 sps:$4 sm:$0xff]   ;;  %v5354_v40 = vld [vmem:[#allocation10 + $0x14c] ss:$16 sps:$4 sm:$0xff]  }
 0x247   :  { %1750 = vmatprep.mubr.bf16.mxu0 %v843_v49  ;;  %1791 = vmatprep.mubr.bf16.mxu1 %v845_v50  ;;  %v5357_v42 = vld [vmem:[#allocation10 + $0x34c] ss:$16 sps:$4 sm:$0xff]   ;;  %v5352_v43 = vld [vmem:[#allocation10 + $0x148] ss:$16 sps:$4 sm:$0xff]  }
 0x248   :  { %1720 = vmatprep.subr.bf16.mxu0 %v5282_v55  ;;  %1761 = vmatprep.subr.bf16.mxu1 %v5285_v56  ;;  %v5355_v46 = vld [vmem:[#allocation10 + $0x348] ss:$16 sps:$4 sm:$0xff]   ;;  %v5360_v49 = vld [vmem:[#allocation10 + $0x12c] ss:$16 sps:$4 sm:$0xff]  }
 0x249   :  { %v5363_v50 = vld [vmem:[#allocation10 + $0x32c] ss:$16 sps:$4 sm:$0xff]   ;;  %v5358_v51 = vld [vmem:[#allocation10 + $0x128] ss:$16 sps:$4 sm:$0xff]  }
 0x24a   :  { %1721 = vmatpush1.bf16.msra.mxu0 %v5280_v57  ;;  %1762 = vmatpush1.bf16.msra.mxu1 %v5283_v59  ;;  %v5361_v52 = vld [vmem:[#allocation10 + $0x328] ss:$16 sps:$4 sm:$0xff]   ;;  %v5366_v55 = vld [vmem:[#allocation10 + $0x10c] ss:$16 sps:$4 sm:$0xff]  }
 0x24b   :  { %1722 = vmatprep.subr.bf16.mxu0 %v5288_v61  ;;  %1763 = vmatprep.subr.bf16.mxu1 %v5291_v62  ;;  %v5369_v56 = vld [vmem:[#allocation10 + $0x30c] ss:$16 sps:$4 sm:$0xff]   ;;  %v5364_v57 = vld [vmem:[#allocation10 + $0x108] ss:$16 sps:$4 sm:$0xff]   ;;  %v5370_v61 = vld [vmem:[#allocation13 + $0xe0] ss:$16 sps:$4 sm:$0xff]  }
 0x24c   :  { %v5367_v59 = vld [vmem:[#allocation10 + $0x308] ss:$16 sps:$4 sm:$0xff]  }
 0x24d   :  { %v5372_v62 = vld [vmem:[#allocation13 + $0xe4] ss:$16 sps:$4 sm:$0xff]  }
 0x24e   :  { %1723 = vmatpush1.bf16.msra.mxu0 %v5286_v63  ;;  %1764 = vmatpush1.bf16.msra.mxu1 %v5289_v0  ;;  %v5373_v63 = vld [vmem:[#allocation13 + $0x2e0] ss:$16 sps:$4 sm:$0xff]   ;;  %v5375_v0 = vld [vmem:[#allocation13 + $0x2e4] ss:$16 sps:$4 sm:$0xff]  }
 0x24f   :  { %1724 = vmatprep.subr.bf16.mxu0 %v5294_v1  ;;  %1765 = vmatprep.subr.bf16.mxu1 %v5297_v2  ;;  %v5378_v1 = vld [vmem:[#allocation13 + $0xc4] ss:$16 sps:$4 sm:$0xff]  }
 0x250   :  { %v5381_v2 = vld [vmem:[#allocation13 + $0x2c4] ss:$16 sps:$4 sm:$0xff]  }
 0x252   :  { %1725 = vmatpush1.bf16.msra.mxu0 %v5292_v3  ;;  %1766 = vmatpush1.bf16.msra.mxu1 %v5295_v4  ;;  %v5376_v3 = vld [vmem:[#allocation13 + $0xc0] ss:$16 sps:$4 sm:$0xff]  }
 0x253   :  { %1726 = vmatprep.subr.bf16.mxu0 %v5300_v5  ;;  %1767 = vmatprep.subr.bf16.mxu1 %v5303_v6  ;;  %v5379_v4 = vld [vmem:[#allocation13 + $0x2c0] ss:$16 sps:$4 sm:$0xff]   ;;  %v5384_v5 = vld [vmem:[#allocation13 + $0xa4] ss:$16 sps:$4 sm:$0xff]  }
 0x254   :  { %v5387_v6 = vld [vmem:[#allocation13 + $0x2a4] ss:$16 sps:$4 sm:$0xff]  }
 0x256   :  { %1727 = vmatpush1.bf16.msra.mxu0 %v5298_v7  ;;  %1768 = vmatpush1.bf16.msra.mxu1 %v5301_v8  ;;  %v5390_v7 = vld [vmem:[#allocation13 + $0x84] ss:$16 sps:$4 sm:$0xff]  }
 0x257   :  { %1728 = vmatprep.subr.bf16.mxu0 %v5306_v9  ;;  %1769 = vmatprep.subr.bf16.mxu1 %v5309_v33  ;;  %v5393_v8 = vld [vmem:[#allocation13 + $0x284] ss:$16 sps:$4 sm:$0xff]   ;;  %v5388_v9 = vld [vmem:[#allocation13 + $0x80] ss:$16 sps:$4 sm:$0xff]  }
 0x258   :  { %v5391_v33 = vld [vmem:[#allocation13 + $0x280] ss:$16 sps:$4 sm:$0xff]  }
 0x25a   :  { %1729 = vmatpush1.bf16.msra.mxu0 %v5304_v10  ;;  %1770 = vmatpush1.bf16.msra.mxu1 %v5307_v11  ;;  %v5396_v10 = vld [vmem:[#allocation13 + $0x64] ss:$16 sps:$4 sm:$0xff]  }
 0x25b   :  { %1730 = vmatprep.subr.bf16.mxu0 %v5312_v12  ;;  %1771 = vmatprep.subr.bf16.mxu1 %v5315_v13  ;;  %v5399_v11 = vld [vmem:[#allocation13 + $0x264] ss:$16 sps:$4 sm:$0xff]   ;;  %v5394_v12 = vld [vmem:[#allocation13 + $0x60] ss:$16 sps:$4 sm:$0xff]  }
 0x25c   :  { %v5397_v13 = vld [vmem:[#allocation13 + $0x260] ss:$16 sps:$4 sm:$0xff]  }
 0x25e   :  { %1731 = vmatpush1.bf16.msra.mxu0 %v5310_v14  ;;  %1772 = vmatpush1.bf16.msra.mxu1 %v5313_v15  ;;  %v5402_v14 = vld [vmem:[#allocation13 + $0x44] ss:$16 sps:$4 sm:$0xff]  }
 0x25f   :  { %1732 = vmatprep.subr.bf16.mxu0 %v5318_v16  ;;  %1773 = vmatprep.subr.bf16.mxu1 %v5321_v17  ;;  %v5405_v15 = vld [vmem:[#allocation13 + $0x244] ss:$16 sps:$4 sm:$0xff]   ;;  %v5400_v16 = vld [vmem:[#allocation13 + $0x40] ss:$16 sps:$4 sm:$0xff]  }
 0x260   :  { %v5403_v17 = vld [vmem:[#allocation13 + $0x240] ss:$16 sps:$4 sm:$0xff]  }
 0x262   :  { %1733 = vmatpush1.bf16.msra.mxu0 %v5316_v18  ;;  %1774 = vmatpush1.bf16.msra.mxu1 %v5319_v19  ;;  %v5408_v18 = vld [vmem:[#allocation13 + $0x24] ss:$16 sps:$4 sm:$0xff]  }
 0x263   :  { %1734 = vmatprep.subr.bf16.mxu0 %v5324_v20  ;;  %1775 = vmatprep.subr.bf16.mxu1 %v5327_v21  ;;  %v5411_v19 = vld [vmem:[#allocation13 + $0x224] ss:$16 sps:$4 sm:$0xff]   ;;  %v5406_v20 = vld [vmem:[#allocation13 + $0x20] ss:$16 sps:$4 sm:$0xff]  }
 0x264   :  { %v5409_v21 = vld [vmem:[#allocation13 + $0x220] ss:$16 sps:$4 sm:$0xff]  }
 0x266   :  { %1735 = vmatpush2.bf16.msra.mxu0 %v5322_v22  ;;  %1776 = vmatpush2.bf16.msra.mxu1 %v5325_v23 }
 0x267   :  { %1736 = vmatprep.subr.bf16.mxu0 %v5330_v24  ;;  %1777 = vmatprep.subr.bf16.mxu1 %v5333_v25 }
 0x26a   :  { %1737 = vmatpush2.bf16.msra.mxu0 %v5328_v26  ;;  %1778 = vmatpush2.bf16.msra.mxu1 %v5331_v27 }
 0x26b   :  { %1738 = vmatprep.subr.bf16.mxu0 %v5336_v44  ;;  %1779 = vmatprep.subr.bf16.mxu1 %v5339_v45 }
 0x26e   :  { %1739 = vmatpush2.bf16.msra.mxu0 %v5334_v48  ;;  %1780 = vmatpush2.bf16.msra.mxu1 %v5337_v58  ;;  %v974_v48 = vld [vmem:[%s6461_s6] sm:$0xf] }
 0x26f   :  { %1740 = vmatprep.subr.bf16.mxu0 %v5342_v28  ;;  %1781 = vmatprep.subr.bf16.mxu1 %v5345_v29  ;;  %v983_v58 = vrot.slane %v974_v48, %v6220_v37  ;;  %v979_v28 = vrot.slane %v974_v48, %v6214_v34 }
 0x272   :  { %1741 = vmatpush2.bf16.msra.mxu0 %v5340_v30  ;;  %1782 = vmatpush2.bf16.msra.mxu1 %v5343_v31 }
 0x273   :  { %1742 = vmatprep.subr.bf16.mxu0 %v5348_v32  ;;  %1783 = vmatprep.subr.bf16.mxu1 %v5351_v36  ;;  %v987_v32 = vrot.slane %v974_v48, %v6217_v35 }
 0x276   :  { %1743 = vmatpush2.bf16.msra.mxu0 %v5346_v38  ;;  %1784 = vmatpush2.bf16.msra.mxu1 %v5349_v39  ;;  %v991_v38 = vrot.slane %v974_v48, %v6226_v41  ;;  %v5451_v48 = vld [vmem:[#allocation13 + $0x340] ss:$16 sps:$4 sm:$0xff]  }
 0x277   :  { %1744 = vmatprep.subr.bf16.mxu0 %v5354_v40  ;;  %1785 = vmatprep.subr.bf16.mxu1 %v5357_v42 }
 0x27a   :  { %1745 = vmatpush2.bf16.msra.mxu0 %v5352_v43  ;;  %1786 = vmatpush2.bf16.msra.mxu1 %v5355_v46 }
 0x27b   :  { %1746 = vmatprep.subr.bf16.mxu0 %v5360_v49  ;;  %1787 = vmatprep.subr.bf16.mxu1 %v5363_v50 }
 0x27e   :  { %1747 = vmatpush2.bf16.msra.mxu0 %v5358_v51  ;;  %1788 = vmatpush2.bf16.msra.mxu1 %v5361_v52 }
 0x27f   :  { %1748 = vmatprep.subr.bf16.mxu0 %v5366_v55  ;;  %1789 = vmatprep.subr.bf16.mxu1 %v5369_v56 }
 0x282   :  { %1749 = vmatpush2.bf16.msra.mxu0 %v5364_v57  ;;  %1790 = vmatpush2.bf16.msra.mxu1 %v5367_v59 }
 0x283   :  { %2743 = vmatprep.subr.bf16.mxu0 %v5372_v62  ;;  %2784 = vmatprep.subr.bf16.mxu1 %v5375_v0 }
 0x285   :  { %1751 = vmatmul.mubr.bf16.vlgmr.msra.gmra.mxu0 %v6274_v53  ;;  %1792 = vmatmul.mubr.bf16.vlgmr.msra.gmra.mxu1 %v6277_v54  ;;  %v5382_v53 = vld [vmem:[#allocation13 + $0xa0] ss:$16 sps:$4 sm:$0xff]  }
 0x286   :  { %2744 = vmatpush1.bf16.msra.mxu0 %v5370_v61  ;;  %2785 = vmatpush1.bf16.msra.mxu1 %v5373_v63  ;;  %v5385_v54 = vld [vmem:[#allocation13 + $0x2a0] ss:$16 sps:$4 sm:$0xff]  }
 0x287   :  { %2745 = vmatprep.subr.bf16.mxu0 %v5378_v1  ;;  %2786 = vmatprep.subr.bf16.mxu1 %v5381_v2 }
 0x28a   :  { %2746 = vmatpush1.bf16.msra.mxu0 %v5376_v3  ;;  %2787 = vmatpush1.bf16.msra.mxu1 %v5379_v4 }
 0x28b   :  { %2747 = vmatprep.subr.bf16.mxu0 %v5384_v5  ;;  %2788 = vmatprep.subr.bf16.mxu1 %v5387_v6  ;;  %v5414_v6 = vld [vmem:[#allocation13 + $0x4] ss:$16 sps:$4 sm:$0xff]  }
 0x28e   :  { %2748 = vmatpush1.bf16.msra.mxu0 %v5382_v53  ;;  %2789 = vmatpush1.bf16.msra.mxu1 %v5385_v54  ;;  %v5417_v53 = vld [vmem:[#allocation13 + $0x204] ss:$16 sps:$4 sm:$0xff]   ;;  %v5412_v54 = vld [vmem:[#allocation13] ss:$16 sps:$4 sm:$0xff]  }
 0x28f   :  { %2749 = vmatprep.subr.bf16.mxu0 %v5390_v7  ;;  %2790 = vmatprep.subr.bf16.mxu1 %v5393_v8  ;;  %v5415_v7 = vld [vmem:[#allocation13 + $0x200] ss:$16 sps:$4 sm:$0xff]   ;;  %v5420_v8 = vld [vmem:[#allocation13 + $0x1e4] ss:$16 sps:$4 sm:$0xff]  }
 0x292   :  { %2750 = vmatpush1.bf16.msra.mxu0 %v5388_v9  ;;  %2791 = vmatpush1.bf16.msra.mxu1 %v5391_v33  ;;  %v5423_v9 = vld [vmem:[#allocation13 + $0x3e4] ss:$16 sps:$4 sm:$0xff]   ;;  %v5418_v33 = vld [vmem:[#allocation13 + $0x1e0] ss:$16 sps:$4 sm:$0xff]  }
 0x293   :  { %2751 = vmatprep.subr.bf16.mxu0 %v5396_v10  ;;  %2792 = vmatprep.subr.bf16.mxu1 %v5399_v11  ;;  %v5421_v10 = vld [vmem:[#allocation13 + $0x3e0] ss:$16 sps:$4 sm:$0xff]   ;;  %v5426_v11 = vld [vmem:[#allocation13 + $0x1c4] ss:$16 sps:$4 sm:$0xff]  }
 0x296   :  { %2752 = vmatpush1.bf16.msra.mxu0 %v5394_v12  ;;  %2793 = vmatpush1.bf16.msra.mxu1 %v5397_v13  ;;  %v5429_v12 = vld [vmem:[#allocation13 + $0x3c4] ss:$16 sps:$4 sm:$0xff]   ;;  %v5424_v13 = vld [vmem:[#allocation13 + $0x1c0] ss:$16 sps:$4 sm:$0xff]  }
 0x297   :  { %2753 = vmatprep.subr.bf16.mxu0 %v5402_v14  ;;  %2794 = vmatprep.subr.bf16.mxu1 %v5405_v15  ;;  %v5427_v14 = vld [vmem:[#allocation13 + $0x3c0] ss:$16 sps:$4 sm:$0xff]   ;;  %v5432_v15 = vld [vmem:[#allocation13 + $0x1a4] ss:$16 sps:$4 sm:$0xff]  }
 0x29a   :  { %2754 = vmatpush1.bf16.msra.mxu0 %v5400_v16  ;;  %2795 = vmatpush1.bf16.msra.mxu1 %v5403_v17  ;;  %v5435_v16 = vld [vmem:[#allocation13 + $0x3a4] ss:$16 sps:$4 sm:$0xff]   ;;  %v5430_v17 = vld [vmem:[#allocation13 + $0x1a0] ss:$16 sps:$4 sm:$0xff]  }
 0x29b   :  { %2755 = vmatprep.subr.bf16.mxu0 %v5408_v18  ;;  %2796 = vmatprep.subr.bf16.mxu1 %v5411_v19  ;;  %v5433_v18 = vld [vmem:[#allocation13 + $0x3a0] ss:$16 sps:$4 sm:$0xff]   ;;  %v5438_v19 = vld [vmem:[#allocation13 + $0x184] ss:$16 sps:$4 sm:$0xff]  }
 0x29e   :  { %2756 = vmatpush1.bf16.msra.mxu0 %v5406_v20  ;;  %2797 = vmatpush1.bf16.msra.mxu1 %v5409_v21  ;;  %v5436_v20 = vld [vmem:[#allocation13 + $0x180] ss:$16 sps:$4 sm:$0xff]  }
 0x29f   :  { %2757 = vmatprep.subr.bf16.mxu0 %v5414_v6  ;;  %2798 = vmatprep.subr.bf16.mxu1 %v5417_v53  ;;  %v5439_v21 = vld [vmem:[#allocation13 + $0x380] ss:$16 sps:$4 sm:$0xff]  }
 0x2a2   :  { %2758 = vmatpush1.bf16.msra.mxu0 %v5412_v54  ;;  %2799 = vmatpush1.bf16.msra.mxu1 %v5415_v7 }
 0x2a3   :  { %2759 = vmatprep.subr.bf16.mxu0 %v5420_v8  ;;  %2800 = vmatprep.subr.bf16.mxu1 %v5423_v9 }
 0x2a6   :  { %2760 = vmatpush2.bf16.msra.mxu0 %v5418_v33  ;;  %2801 = vmatpush2.bf16.msra.mxu1 %v5421_v10 }
 0x2a7   :  { %2761 = vmatprep.subr.bf16.mxu0 %v5426_v11  ;;  %2802 = vmatprep.subr.bf16.mxu1 %v5429_v12 }
 0x2aa   :  { %2762 = vmatpush2.bf16.msra.mxu0 %v5424_v13  ;;  %2803 = vmatpush2.bf16.msra.mxu1 %v5427_v14 }
 0x2ab   :  { %2763 = vmatprep.subr.bf16.mxu0 %v5432_v15  ;;  %2804 = vmatprep.subr.bf16.mxu1 %v5435_v16 }
 0x2ae   :  { %2764 = vmatpush2.bf16.msra.mxu0 %v5430_v17  ;;  %2805 = vmatpush2.bf16.msra.mxu1 %v5433_v18 }
 0x2af   :  { %2765 = vmatprep.subr.bf16.mxu0 %v5438_v19 }
 0x2b2   :  { %2766 = vmatpush2.bf16.msra.mxu0 %v5436_v20 }
 0x305   :  { %v1670_v22 = vpop.f32.mrf.mxu0  ;;  %v1711_v23 = vpop.f32.mrf.mxu1 }
 0x306   :  { %v1671_v30 = vadd.f32 %v1670_v22, %v979_v28  ;;  %v5441_v22 = vld [vmem:[#allocation13 + $0x384] ss:$16 sps:$4 sm:$0xff]  }
 0x307   :  { %v1672_v24 = vpop.f32.mrf.mxu0  ;;  %v1713_v25 = vpop.f32.mrf.mxu1  ;;  %2806 = vmatprep.subr.bf16.mxu1 %v5441_v22  ;;  %v5459_v28 = vld [vmem:[#allocation13 + $0x324] ss:$16 sps:$4 sm:$0xff]  }
 0x308   :  { %v1673_v29 = vadd.f32 %v1672_v24, %v983_v58  ;;  %v6291_v36 = vadd.f32 %v1711_v23, %v1671_v30  ;;  %v5444_v23 = vld [vmem:[#allocation13 + $0x164] ss:$16 sps:$4 sm:$0xff]   ;;  %2807 = vmatpush2.bf16.msra.mxu1 %v5439_v21  ;;  %v5457_v30 = vld [vmem:[#allocation13 + $0x320] ss:$16 sps:$4 sm:$0xff]  }
 0x309   :  { %v1674_v26 = vpop.f32.mrf.mxu0  ;;  %v1715_v27 = vpop.f32.mrf.mxu1  ;;  %v5447_v24 = vld [vmem:[#allocation13 + $0x364] ss:$16 sps:$4 sm:$0xff]   ;;  %2767 = vmatprep.subr.bf16.mxu0 %v5444_v23 }
 0x30a   :  { %v6288_v31 = vadd.f32 %v1713_v25, %v1673_v29  ;;  %v1805_v50 = vmul.f32 %v6291_v36, %v6291_v36  ;;  %v5442_v25 = vld [vmem:[#allocation13 + $0x160] ss:$16 sps:$4 sm:$0xff]   ;;  %2808 = vmatprep.subr.bf16.mxu1 %v5447_v24  ;;  %v5450_v27 = vld [vmem:[#allocation13 + $0x144] ss:$16 sps:$4 sm:$0xff]  }
 0x30b   :  { %v1675_v44 = vpop.f32.mrf.mxu0  ;;  %v1716_v45 = vpop.f32.mrf.mxu1  ;;  %v5445_v26 = vld [vmem:[#allocation13 + $0x360] ss:$16 sps:$4 sm:$0xff]   ;;  %2768 = vmatpush2.bf16.msra.mxu0 %v5442_v25  ;;  %v5456_v58 = vld [vmem:[#allocation13 + $0x124] ss:$16 sps:$4 sm:$0xff]  }
 0x30c   :  { %v1806_v42 = vmul.f32 %v6288_v31, %v6288_v31  ;;  %v1800_v55 = vadd.f32 %v6288_v31, %v6291_v36  ;;  %v5453_v44 = vld [vmem:[#allocation13 + $0x344] ss:$16 sps:$4 sm:$0xff]   ;;  %2809 = vmatpush2.bf16.msra.mxu1 %v5445_v26  ;;  %v5448_v45 = vld [vmem:[#allocation13 + $0x140] ss:$16 sps:$4 sm:$0xff]   ;;  %2769 = vmatprep.subr.bf16.mxu0 %v5450_v27 }
 0x30d   :  { %2810 = vmatprep.subr.bf16.mxu1 %v5453_v44  ;;  %v5454_v29 = vld [vmem:[#allocation13 + $0x120] ss:$16 sps:$4 sm:$0xff]  }
 0x30e   :  { %v1809_v63 = vadd.f32 %v1806_v42, %v1805_v50  ;;  %v5468_v42 = vld [vmem:[#allocation13 + $0xec] ss:$16 sps:$4 sm:$0xff]  }
 0x30f   :  { %2770 = vmatpush2.bf16.msra.mxu0 %v5448_v45 }
 0x310   :  { %2811 = vmatpush2.bf16.msra.mxu1 %v5451_v48  ;;  %2771 = vmatprep.subr.bf16.mxu0 %v5456_v58 }
 0x311   :  { %2812 = vmatprep.subr.bf16.mxu1 %v5459_v28 }
 0x313   :  { %2772 = vmatpush2.bf16.msra.mxu0 %v5454_v29 }
 0x314   :  { %2813 = vmatpush2.bf16.msra.mxu1 %v5457_v30 }
 0x345   :  { %v1752_v39 = vpop.f32.mrf.mxu0  ;;  %v1793_v40 = vpop.f32.mrf.mxu1 }
 0x346   :  { %v1753_v43 = vadd.f32 %v1752_v39, %v987_v32  ;;  %v5462_v32 = vld [vmem:[#allocation13 + $0x104] ss:$16 sps:$4 sm:$0xff]   ;;  %v5460_v39 = vld [vmem:[#allocation13 + $0x100] ss:$16 sps:$4 sm:$0xff]  }
 0x347   :  { %v1754_v46 = vpop.f32.mrf.mxu0  ;;  %v1795_v49 = vpop.f32.mrf.mxu1  ;;  %2773 = vmatprep.subr.bf16.mxu0 %v5462_v32 }
 0x348   :  { %v6298_v51 = vadd.f32 %v1793_v40, %v1753_v43  ;;  %v1755_v52 = vadd.f32 %v1754_v46, %v991_v38  ;;  %v5465_v38 = vld [vmem:[#allocation13 + $0x304] ss:$16 sps:$4 sm:$0xff]   ;;  %v5463_v40 = vld [vmem:[#allocation13 + $0x300] ss:$16 sps:$4 sm:$0xff]   ;;  %2774 = vmatpush2.bf16.msra.mxu0 %v5460_v39  ;;  %v5471_v43 = vld [vmem:[#allocation13 + $0x2ec] ss:$16 sps:$4 sm:$0xff]  }
 0x349   :  { %v1756_v56 = vpop.f32.mrf.mxu0  ;;  %v1797_v57 = vpop.f32.mrf.mxu1  ;;  %2814 = vmatprep.subr.bf16.mxu1 %v5465_v38  ;;  %2825 = vmatprep.subr.bf16.mxu0 %v5468_v42 }
 0x34a   :  { %v1807_v59 = vmul.f32 %v6298_v51, %v6298_v51  ;;  %v6304_v61 = vadd.f32 %v1795_v49, %v1755_v52  ;;  %v1801_v62 = vadd.f32 %v1800_v55, %v6298_v51  ;;  %2815 = vmatpush2.bf16.msra.mxu1 %v5463_v40  ;;  %v4725_v57 = vld.sshfl [vmem:[%s6462_s7] sm:$0x33 pattern:$0x75316420] }
 0x34b   :  { %v1757_v0 = vpop.f32.mrf.mxu0  ;;  %v1798_v1 = vpop.f32.mrf.mxu1  ;;  %2866 = vmatprep.subr.bf16.mxu1 %v5471_v43 }
 0x34c   :  { %v1802_v2 = vadd.f32 %v1801_v62, %v6304_v61  ;;  %v1808_v3 = vmul.f32 %v6304_v61, %v6304_v61  ;;  %v1810_v4 = vadd.f32 %v1809_v63, %v1807_v59  ;;  %v4726_v62 = vld.sshfl [vmem:[#allocation11] sm:$0x33 pattern:$0x75316420]  ;;  %v1842_v63 = vcombine.high %v4725_v57, %v4725_v57 }
 0x34d   :  { %v1900_v1 = vcombine.high %v4726_v62, %v4726_v62 }
 0x34e   :  { %1803 = vadd.xlane.f32.xlu1 %v1802_v2  ;;  %v1811_v5 = vadd.f32 %v1810_v4, %v1808_v3  ;;  %v1856_v2 = vrot.slane %v1842_v63, %v6253_v60  ;;  %v1849_v3 = vrot.slane %v4725_v57, %v6253_v60  ;;  %v5477_v57 = vld [vmem:[#allocation13 + $0x2cc] ss:$16 sps:$4 sm:$0xff]  }
 0x34f   :  { %v1914_v4 = vrot.slane %v1900_v1, %v6253_v60  ;;  %v5480_v63 = vld [vmem:[#allocation13 + $0xac] ss:$16 sps:$4 sm:$0xff]   ;;  %v5478_v1 = vld [vmem:[#allocation13 + $0xa8] ss:$16 sps:$4 sm:$0xff]  }
 0x350   :  { %v1858_v6 = vcombine.high %v1856_v2, %v1856_v2  ;;  %v1857_v53 = vcombine.high %v1849_v3, %v1849_v3  ;;  %v1867_v8 = vpack.i.b16 %v1856_v2, %v1856_v2  ;;  %v1860_v33 = vpack.i.b16 %v1849_v3, %v1849_v3  ;;  %v5481_v2 = vld [vmem:[#allocation13 + $0x2a8] ss:$16 sps:$4 sm:$0xff]   ;;  %v5486_v3 = vld [vmem:[#allocation13 + $0x8c] ss:$16 sps:$4 sm:$0xff]  }
 0x351   :  { %v1916_v54 = vcombine.high %v1914_v4, %v1914_v4  ;;  %v1925_v11 = vpack.i.b16 %v1914_v4, %v1914_v4  ;;  %v5489_v4 = vld [vmem:[#allocation13 + $0x28c] ss:$16 sps:$4 sm:$0xff]  }
 0x352   :  { %1812 = vadd.xlane.f32.xlu1 %v1811_v5  ;;  %v1907_v5 = vrot.slane %v4726_v62, %v6253_v60  ;;  %v1881_v9 = vpack.i.b16 %v1858_v6, %v1858_v6  ;;  %v1874_v10 = vpack.i.b16 %v1857_v53, %v1857_v53  ;;  %v1872_v20 = vrot.slane %v1867_v8, %v6214_v34  ;;  %v5475_v62 = vld [vmem:[#allocation13 + $0x2c8] ss:$16 sps:$4 sm:$0xff]   ;;  %v5492_v53 = vld [vmem:[#allocation13 + $0x6c] ss:$16 sps:$4 sm:$0xff]  }
 0x353   :  { %v1939_v12 = vpack.i.b16 %v1916_v54, %v1916_v54  ;;  %v1865_v22 = vrot.slane %v1860_v33, %v6214_v34  ;;  %v5487_v6 = vld [vmem:[#allocation13 + $0x288] ss:$16 sps:$4 sm:$0xff]   ;;  %v5495_v54 = vld [vmem:[#allocation13 + $0x26c] ss:$16 sps:$4 sm:$0xff]  }
 0x354   :  { %v1915_v7 = vcombine.high %v1907_v5, %v1907_v5  ;;  %v1918_v13 = vpack.i.b16 %v1907_v5, %v1907_v5  ;;  %v1886_v21 = vrot.slane %v1881_v9, %v6214_v34  ;;  %v1879_v23 = vrot.slane %v1874_v10, %v6214_v34  ;;  %v5484_v5 = vld [vmem:[#allocation13 + $0x88] ss:$16 sps:$4 sm:$0xff]   ;;  %v5498_v9 = vld [vmem:[#allocation13 + $0x4c] ss:$16 sps:$4 sm:$0xff]  }
 0x355   :  { %v5493_v8 = vld [vmem:[#allocation13 + $0x268] ss:$16 sps:$4 sm:$0xff]   ;;  %v5501_v33 = vld [vmem:[#allocation13 + $0x24c] ss:$16 sps:$4 sm:$0xff]  }
 0x356   :  { %v1932_v14 = vpack.i.b16 %v1915_v7, %v1915_v7  ;;  %v5490_v7 = vld [vmem:[#allocation13 + $0x68] ss:$16 sps:$4 sm:$0xff]  }
 0x357   :  { %v5496_v10 = vld [vmem:[#allocation13 + $0x48] ss:$16 sps:$4 sm:$0xff]  }
 0x3d7   :  { %v1804_v46 = vpop.xlane.xlu1 %1803 }
 0x3d8   :  { %v1814_v49 = vmul.f32 0.001953125, %v1804_v46 }
 0x3da   :  { %v1816_v52 = vmul.f32 %v1814_v49, %v1814_v49  ;;  %v1819_v15 = vsub.f32 %v6291_v36, %v1814_v49  ;;  %v1821_v16 = vsub.f32 %v6298_v51, %v1814_v49  ;;  %v1820_v17 = vsub.f32 %v6288_v31, %v1814_v49 }
 0x3db   :  { %v1813_v50 = vpop.xlane.xlu1 %1812  ;;  %v1822_v18 = vsub.f32 %v6304_v61, %v1814_v49  ;;  %v1930_v36 = vrot.slane %v1925_v11, %v6214_v34  ;;  %v1944_v51 = vrot.slane %v1939_v12, %v6214_v34  ;;  %v1923_v31 = vrot.slane %v1918_v13, %v6214_v34  ;;  %v5466_v49 = vld [vmem:[#allocation13 + $0xe8] ss:$16 sps:$4 sm:$0xff]   ;;  %v5504_v12 = vld [vmem:[#allocation13 + $0x2c] ss:$16 sps:$4 sm:$0xff]  }
 0x3dc   :  { %v1815_v55 = vmul.f32 0.001953125, %v1813_v50  ;;  %v1937_v61 = vrot.slane %v1932_v14, %v6214_v34  ;;  %v5469_v50 = vld [vmem:[#allocation13 + $0x2e8] ss:$16 sps:$4 sm:$0xff]   ;;  %v5507_v13 = vld [vmem:[#allocation13 + $0x22c] ss:$16 sps:$4 sm:$0xff]  }
 0x3dd   :  { %v5499_v11 = vld [vmem:[#allocation13 + $0x248] ss:$16 sps:$4 sm:$0xff]  }
 0x3de   :  { %v1817_v56 = vsub.f32 %v1815_v55, %v1816_v52  ;;  %v5502_v14 = vld [vmem:[#allocation13 + $0x28] ss:$16 sps:$4 sm:$0xff]  }
 0x3e0   :  { %v1818_v59 = vmax.f32 %v1817_v56, 0.0  ;;  %v5474_v56 = vld [vmem:[#allocation13 + $0xcc] ss:$16 sps:$4 sm:$0xff]  }
 0x3e2   :  { %v1823_v0 = vadd.f32 1e-05, %v1818_v59  ;;  %v5472_v59 = vld [vmem:[#allocation13 + $0xc8] ss:$16 sps:$4 sm:$0xff]  }
 0x3e4   :  { %5788 = vrsqrt.f32 %v1823_v0  ;;  %v5483_v0 = vld [vmem:[#allocation13 + $0x2ac] ss:$16 sps:$4 sm:$0xff]  }
 0x3f1   :  { %v5789_v19 = vpop.eup %5788 }
 0x3f2   :  { %v1826_v24 = vmul.f32 %v5789_v19, %v1820_v17  ;;  %v1828_v25 = vmul.f32 %v5789_v19, %v1822_v18  ;;  %v1825_v26 = vmul.f32 %v5789_v19, %v1819_v15  ;;  %v1827_v27 = vmul.f32 %v5789_v19, %v1821_v16  ;;  %v5505_v15 = vld [vmem:[#allocation13 + $0x228] ss:$16 sps:$4 sm:$0xff]   ;;  %v5510_v16 = vld [vmem:[#allocation13 + $0xc] ss:$16 sps:$4 sm:$0xff]  }
 0x3f3   :  { %v5513_v17 = vld [vmem:[#allocation13 + $0x20c] ss:$16 sps:$4 sm:$0xff]   ;;  %v5508_v18 = vld [vmem:[#allocation13 + $0x8] ss:$16 sps:$4 sm:$0xff]  }
 0x3f4   :  { %v1830_v44 = vpack.c.bf16 %v1826_v24, %v1826_v24  ;;  %v1832_v45 = vpack.c.bf16 %v1828_v25, %v1828_v25  ;;  %v1829_v48 = vpack.c.bf16 %v1825_v26, %v1825_v26  ;;  %v1831_v58 = vpack.c.bf16 %v1827_v27, %v1827_v27  ;;  %v5511_v19 = vld [vmem:[#allocation13 + $0x208] ss:$16 sps:$4 sm:$0xff]   ;;  %v5522_v24 = vld [vmem:[#allocation13 + $0x1cc] ss:$16 sps:$4 sm:$0xff]  }
 0x3f5   :  { %v5525_v25 = vld [vmem:[#allocation13 + $0x3cc] ss:$16 sps:$4 sm:$0xff]   ;;  %v5520_v26 = vld [vmem:[#allocation13 + $0x1c8] ss:$16 sps:$4 sm:$0xff]  }
 0x3f6   :  { %v1888_v28 = vmul.bf16 %v1872_v20, %v1830_v44  ;;  %v1890_v29 = vmul.bf16 %v1886_v21, %v1832_v45  ;;  %v1887_v30 = vmul.bf16 %v1865_v22, %v1829_v48  ;;  %v1889_v32 = vmul.bf16 %v1879_v23, %v1831_v58  ;;  %v5516_v20 = vld [vmem:[#allocation13 + $0x1ec] ss:$16 sps:$4 sm:$0xff]   ;;  %v5514_v22 = vld [vmem:[#allocation13 + $0x1e8] ss:$16 sps:$4 sm:$0xff]  }
 0x3f7   :  { %v5519_v21 = vld [vmem:[#allocation13 + $0x3ec] ss:$16 sps:$4 sm:$0xff]   ;;  %v5517_v23 = vld [vmem:[#allocation13 + $0x3e8] ss:$16 sps:$4 sm:$0xff]  }
 0x3f8   :  { %v1946_v38 = vadd.bf16 %v1930_v36, %v1888_v28  ;;  %v1948_v39 = vadd.bf16 %v1944_v51, %v1890_v29  ;;  %v1945_v40 = vadd.bf16 %v1923_v31, %v1887_v30  ;;  %v1947_v42 = vadd.bf16 %v1937_v61, %v1889_v32  ;;  %v5523_v27 = vld [vmem:[#allocation13 + $0x3c8] ss:$16 sps:$4 sm:$0xff]   ;;  %v5528_v36 = vld [vmem:[#allocation13 + $0x1ac] ss:$16 sps:$4 sm:$0xff]  }
 0x3f9   :  { %v5531_v51 = vld [vmem:[#allocation13 + $0x3ac] ss:$16 sps:$4 sm:$0xff]   ;;  %v5526_v31 = vld [vmem:[#allocation13 + $0x1a8] ss:$16 sps:$4 sm:$0xff]  }
 0x3fa   :  { %v1950_v43 = vmax.bf16 %v6064_v47, %v1946_v38  ;;  %v1952_v46 = vmax.bf16 %v6064_v47, %v1948_v39  ;;  %v6332_v52 = vmax.bf16 %v6064_v47, %v1945_v40  ;;  %v6335_v55 = vmax.bf16 %v6064_v47, %v1947_v42  ;;  %v5529_v61 = vld [vmem:[#allocation13 + $0x3a8] ss:$16 sps:$4 sm:$0xff]   ;;  %v5534_v44 = vld [vmem:[#allocation13 + $0x18c] ss:$16 sps:$4 sm:$0xff]  }
 0x3fb   :  { %v5537_v45 = vld [vmem:[#allocation13 + $0x38c] ss:$16 sps:$4 sm:$0xff]   ;;  %v5532_v48 = vld [vmem:[#allocation13 + $0x188] ss:$16 sps:$4 sm:$0xff]  }
 0x3fc   :  { %2775 = vmatprep.mubr.bf16.mxu0 %v1950_v43  ;;  %2816 = vmatprep.mubr.bf16.mxu1 %v1952_v46  ;;  %v5535_v58 = vld [vmem:[#allocation13 + $0x388] ss:$16 sps:$4 sm:$0xff]   ;;  %v5540_v28 = vld [vmem:[#allocation13 + $0x16c] ss:$16 sps:$4 sm:$0xff]  }
 0x3fd   :  { %2776 = vmatmul.mubr.bf16.vlgmr.msra.gmra.mxu0 %v6332_v52  ;;  %2817 = vmatmul.mubr.bf16.vlgmr.msra.gmra.mxu1 %v6335_v55  ;;  %v5543_v29 = vld [vmem:[#allocation13 + $0x36c] ss:$16 sps:$4 sm:$0xff]   ;;  %v5538_v30 = vld [vmem:[#allocation13 + $0x168] ss:$16 sps:$4 sm:$0xff]  }
 0x3fe   :  { %2826 = vmatpush1.bf16.msra.mxu0 %v5466_v49  ;;  %2867 = vmatpush1.bf16.msra.mxu1 %v5469_v50  ;;  %v5541_v32 = vld [vmem:[#allocation13 + $0x368] ss:$16 sps:$4 sm:$0xff]   ;;  %v5546_v38 = vld [vmem:[#allocation13 + $0x14c] ss:$16 sps:$4 sm:$0xff]  }
 0x3ff   :  { %2857 = vmatprep.mubr.bf16.mxu0 %v1950_v43  ;;  %2898 = vmatprep.mubr.bf16.mxu1 %v1952_v46  ;;  %v5549_v39 = vld [vmem:[#allocation13 + $0x34c] ss:$16 sps:$4 sm:$0xff]   ;;  %v5544_v40 = vld [vmem:[#allocation13 + $0x148] ss:$16 sps:$4 sm:$0xff]  }
 0x400   :  { %2827 = vmatprep.subr.bf16.mxu0 %v5474_v56  ;;  %2868 = vmatprep.subr.bf16.mxu1 %v5477_v57  ;;  %v5547_v42 = vld [vmem:[#allocation13 + $0x348] ss:$16 sps:$4 sm:$0xff]   ;;  %v5552_v43 = vld [vmem:[#allocation13 + $0x12c] ss:$16 sps:$4 sm:$0xff]  }
 0x401   :  { %v5555_v46 = vld [vmem:[#allocation13 + $0x32c] ss:$16 sps:$4 sm:$0xff]   ;;  %v5550_v49 = vld [vmem:[#allocation13 + $0x128] ss:$16 sps:$4 sm:$0xff]  }
 0x402   :  { %2828 = vmatpush1.bf16.msra.mxu0 %v5472_v59  ;;  %2869 = vmatpush1.bf16.msra.mxu1 %v5475_v62  ;;  %v5553_v50 = vld [vmem:[#allocation13 + $0x328] ss:$16 sps:$4 sm:$0xff]   ;;  %v5558_v56 = vld [vmem:[#allocation13 + $0x10c] ss:$16 sps:$4 sm:$0xff]  }
 0x403   :  { %2829 = vmatprep.subr.bf16.mxu0 %v5480_v63  ;;  %2870 = vmatprep.subr.bf16.mxu1 %v5483_v0  ;;  %v5561_v57 = vld [vmem:[#allocation13 + $0x30c] ss:$16 sps:$4 sm:$0xff]   ;;  %v5556_v59 = vld [vmem:[#allocation13 + $0x108] ss:$16 sps:$4 sm:$0xff]   ;;  %v5562_v63 = vld [vmem:[#allocation16 + $0xe0] ss:$16 sps:$4 sm:$0xff]  }
 0x404   :  { %v5559_v62 = vld [vmem:[#allocation13 + $0x308] ss:$16 sps:$4 sm:$0xff]  }
 0x405   :  { %v5564_v0 = vld [vmem:[#allocation16 + $0xe4] ss:$16 sps:$4 sm:$0xff]  }
 0x406   :  { %2830 = vmatpush1.bf16.msra.mxu0 %v5478_v1  ;;  %2871 = vmatpush1.bf16.msra.mxu1 %v5481_v2  ;;  %v5565_v1 = vld [vmem:[#allocation16 + $0x2e0] ss:$16 sps:$4 sm:$0xff]   ;;  %v5567_v2 = vld [vmem:[#allocation16 + $0x2e4] ss:$16 sps:$4 sm:$0xff]  }
 0x407   :  { %2831 = vmatprep.subr.bf16.mxu0 %v5486_v3  ;;  %2872 = vmatprep.subr.bf16.mxu1 %v5489_v4  ;;  %v5570_v3 = vld [vmem:[#allocation16 + $0xc4] ss:$16 sps:$4 sm:$0xff]  }
 0x408   :  { %v5573_v4 = vld [vmem:[#allocation16 + $0x2c4] ss:$16 sps:$4 sm:$0xff]  }
 0x40a   :  { %2832 = vmatpush1.bf16.msra.mxu0 %v5484_v5  ;;  %2873 = vmatpush1.bf16.msra.mxu1 %v5487_v6  ;;  %v5568_v5 = vld [vmem:[#allocation16 + $0xc0] ss:$16 sps:$4 sm:$0xff]  }
 0x40b   :  { %2833 = vmatprep.subr.bf16.mxu0 %v5492_v53  ;;  %2874 = vmatprep.subr.bf16.mxu1 %v5495_v54  ;;  %v5571_v6 = vld [vmem:[#allocation16 + $0x2c0] ss:$16 sps:$4 sm:$0xff]   ;;  %v5576_v53 = vld [vmem:[#allocation16 + $0xa4] ss:$16 sps:$4 sm:$0xff]  }
 0x40c   :  { %v5579_v54 = vld [vmem:[#allocation16 + $0x2a4] ss:$16 sps:$4 sm:$0xff]  }
 0x40e   :  { %2834 = vmatpush1.bf16.msra.mxu0 %v5490_v7  ;;  %2875 = vmatpush1.bf16.msra.mxu1 %v5493_v8  ;;  %v5582_v7 = vld [vmem:[#allocation16 + $0x84] ss:$16 sps:$4 sm:$0xff]  }
 0x40f   :  { %2835 = vmatprep.subr.bf16.mxu0 %v5498_v9  ;;  %2876 = vmatprep.subr.bf16.mxu1 %v5501_v33  ;;  %v5585_v8 = vld [vmem:[#allocation16 + $0x284] ss:$16 sps:$4 sm:$0xff]   ;;  %v5580_v9 = vld [vmem:[#allocation16 + $0x80] ss:$16 sps:$4 sm:$0xff]  }
 0x410   :  { %v5583_v33 = vld [vmem:[#allocation16 + $0x280] ss:$16 sps:$4 sm:$0xff]  }
 0x412   :  { %2836 = vmatpush1.bf16.msra.mxu0 %v5496_v10  ;;  %2877 = vmatpush1.bf16.msra.mxu1 %v5499_v11  ;;  %v5588_v10 = vld [vmem:[#allocation16 + $0x64] ss:$16 sps:$4 sm:$0xff]  }
 0x413   :  { %2837 = vmatprep.subr.bf16.mxu0 %v5504_v12  ;;  %2878 = vmatprep.subr.bf16.mxu1 %v5507_v13  ;;  %v5591_v11 = vld [vmem:[#allocation16 + $0x264] ss:$16 sps:$4 sm:$0xff]   ;;  %v5586_v12 = vld [vmem:[#allocation16 + $0x60] ss:$16 sps:$4 sm:$0xff]  }
 0x414   :  { %v5589_v13 = vld [vmem:[#allocation16 + $0x260] ss:$16 sps:$4 sm:$0xff]  }
 0x416   :  { %2838 = vmatpush1.bf16.msra.mxu0 %v5502_v14  ;;  %2879 = vmatpush1.bf16.msra.mxu1 %v5505_v15  ;;  %v5594_v14 = vld [vmem:[#allocation16 + $0x44] ss:$16 sps:$4 sm:$0xff]  }
 0x417   :  { %2839 = vmatprep.subr.bf16.mxu0 %v5510_v16  ;;  %2880 = vmatprep.subr.bf16.mxu1 %v5513_v17  ;;  %v5597_v15 = vld [vmem:[#allocation16 + $0x244] ss:$16 sps:$4 sm:$0xff]   ;;  %v5592_v16 = vld [vmem:[#allocation16 + $0x40] ss:$16 sps:$4 sm:$0xff]  }
 0x418   :  { %v5595_v17 = vld [vmem:[#allocation16 + $0x240] ss:$16 sps:$4 sm:$0xff]  }
 0x41a   :  { %2840 = vmatpush1.bf16.msra.mxu0 %v5508_v18  ;;  %2881 = vmatpush1.bf16.msra.mxu1 %v5511_v19  ;;  %v5600_v18 = vld [vmem:[#allocation16 + $0x24] ss:$16 sps:$4 sm:$0xff]  }
 0x41b   :  { %2841 = vmatprep.subr.bf16.mxu0 %v5516_v20  ;;  %2882 = vmatprep.subr.bf16.mxu1 %v5519_v21  ;;  %v5603_v19 = vld [vmem:[#allocation16 + $0x224] ss:$16 sps:$4 sm:$0xff]   ;;  %v5598_v20 = vld [vmem:[#allocation16 + $0x20] ss:$16 sps:$4 sm:$0xff]  }
 0x41c   :  { %v5601_v21 = vld [vmem:[#allocation16 + $0x220] ss:$16 sps:$4 sm:$0xff]  }
 0x41e   :  { %2842 = vmatpush2.bf16.msra.mxu0 %v5514_v22  ;;  %2883 = vmatpush2.bf16.msra.mxu1 %v5517_v23  ;;  %v5606_v22 = vld [vmem:[#allocation16 + $0x4] ss:$16 sps:$4 sm:$0xff]  }
 0x41f   :  { %2843 = vmatprep.subr.bf16.mxu0 %v5522_v24  ;;  %2884 = vmatprep.subr.bf16.mxu1 %v5525_v25  ;;  %v5609_v23 = vld [vmem:[#allocation16 + $0x204] ss:$16 sps:$4 sm:$0xff]   ;;  %v5604_v24 = vld [vmem:[#allocation16] ss:$16 sps:$4 sm:$0xff]  }
 0x420   :  { %v5607_v25 = vld [vmem:[#allocation16 + $0x200] ss:$16 sps:$4 sm:$0xff]  }
 0x422   :  { %2844 = vmatpush2.bf16.msra.mxu0 %v5520_v26  ;;  %2885 = vmatpush2.bf16.msra.mxu1 %v5523_v27 }
 0x423   :  { %2845 = vmatprep.subr.bf16.mxu0 %v5528_v36  ;;  %2886 = vmatprep.subr.bf16.mxu1 %v5531_v51 }
 0x426   :  { %2846 = vmatpush2.bf16.msra.mxu0 %v5526_v31  ;;  %2887 = vmatpush2.bf16.msra.mxu1 %v5529_v61 }
 0x427   :  { %2847 = vmatprep.subr.bf16.mxu0 %v5534_v44  ;;  %2888 = vmatprep.subr.bf16.mxu1 %v5537_v45 }
 0x42a   :  { %2848 = vmatpush2.bf16.msra.mxu0 %v5532_v48  ;;  %2889 = vmatpush2.bf16.msra.mxu1 %v5535_v58  ;;  %v2081_v48 = vld [vmem:[%s6465_s10] sm:$0xf] }
 0x42b   :  { %2849 = vmatprep.subr.bf16.mxu0 %v5540_v28  ;;  %2890 = vmatprep.subr.bf16.mxu1 %v5543_v29  ;;  %v2090_v58 = vrot.slane %v2081_v48, %v6220_v37  ;;  %v2086_v28 = vrot.slane %v2081_v48, %v6214_v34 }
 0x42e   :  { %2850 = vmatpush2.bf16.msra.mxu0 %v5538_v30  ;;  %2891 = vmatpush2.bf16.msra.mxu1 %v5541_v32 }
 0x42f   :  { %2851 = vmatprep.subr.bf16.mxu0 %v5546_v38  ;;  %2892 = vmatprep.subr.bf16.mxu1 %v5549_v39  ;;  %v2094_v38 = vrot.slane %v2081_v48, %v6217_v35 }
 0x432   :  { %2852 = vmatpush2.bf16.msra.mxu0 %v5544_v40  ;;  %2893 = vmatpush2.bf16.msra.mxu1 %v5547_v42  ;;  %v2098_v40 = vrot.slane %v2081_v48, %v6226_v41  ;;  %v5649_v48 = vld [vmem:[#allocation16 + $0x320] ss:$16 sps:$4 sm:$0xff]  }
 0x433   :  { %2853 = vmatprep.subr.bf16.mxu0 %v5552_v43  ;;  %2894 = vmatprep.subr.bf16.mxu1 %v5555_v46 }
 0x436   :  { %2854 = vmatpush2.bf16.msra.mxu0 %v5550_v49  ;;  %2895 = vmatpush2.bf16.msra.mxu1 %v5553_v50 }
 0x437   :  { %2855 = vmatprep.subr.bf16.mxu0 %v5558_v56  ;;  %2896 = vmatprep.subr.bf16.mxu1 %v5561_v57 }
 0x43a   :  { %2856 = vmatpush2.bf16.msra.mxu0 %v5556_v59  ;;  %2897 = vmatpush2.bf16.msra.mxu1 %v5559_v62 }
 0x43b   :  { %3850 = vmatprep.subr.bf16.mxu0 %v5564_v0  ;;  %3891 = vmatprep.subr.bf16.mxu1 %v5567_v2 }
 0x43d   :  { %2858 = vmatmul.mubr.bf16.vlgmr.msra.gmra.mxu0 %v6332_v52  ;;  %2899 = vmatmul.mubr.bf16.vlgmr.msra.gmra.mxu1 %v6335_v55  ;;  %v5574_v52 = vld [vmem:[#allocation16 + $0xa0] ss:$16 sps:$4 sm:$0xff]  }
 0x43e   :  { %3851 = vmatpush1.bf16.msra.mxu0 %v5562_v63  ;;  %3892 = vmatpush1.bf16.msra.mxu1 %v5565_v1  ;;  %v5577_v55 = vld [vmem:[#allocation16 + $0x2a0] ss:$16 sps:$4 sm:$0xff]  }
 0x43f   :  { %3852 = vmatprep.subr.bf16.mxu0 %v5570_v3  ;;  %3893 = vmatprep.subr.bf16.mxu1 %v5573_v4 }
 0x442   :  { %3853 = vmatpush1.bf16.msra.mxu0 %v5568_v5  ;;  %3894 = vmatpush1.bf16.msra.mxu1 %v5571_v6 }
 0x443   :  { %3854 = vmatprep.subr.bf16.mxu0 %v5576_v53  ;;  %3895 = vmatprep.subr.bf16.mxu1 %v5579_v54 }
 0x446   :  { %3855 = vmatpush1.bf16.msra.mxu0 %v5574_v52  ;;  %3896 = vmatpush1.bf16.msra.mxu1 %v5577_v55 }
 0x447   :  { %3856 = vmatprep.subr.bf16.mxu0 %v5582_v7  ;;  %3897 = vmatprep.subr.bf16.mxu1 %v5585_v8  ;;  %v5612_v8 = vld [vmem:[#allocation16 + $0x1e4] ss:$16 sps:$4 sm:$0xff]  }
 0x44a   :  { %3857 = vmatpush1.bf16.msra.mxu0 %v5580_v9  ;;  %3898 = vmatpush1.bf16.msra.mxu1 %v5583_v33  ;;  %v5615_v9 = vld [vmem:[#allocation16 + $0x3e4] ss:$16 sps:$4 sm:$0xff]   ;;  %v5610_v33 = vld [vmem:[#allocation16 + $0x1e0] ss:$16 sps:$4 sm:$0xff]  }
 0x44b   :  { %3858 = vmatprep.subr.bf16.mxu0 %v5588_v10  ;;  %3899 = vmatprep.subr.bf16.mxu1 %v5591_v11  ;;  %v5613_v10 = vld [vmem:[#allocation16 + $0x3e0] ss:$16 sps:$4 sm:$0xff]   ;;  %v5618_v11 = vld [vmem:[#allocation16 + $0x1c4] ss:$16 sps:$4 sm:$0xff]  }
 0x44e   :  { %3859 = vmatpush1.bf16.msra.mxu0 %v5586_v12  ;;  %3900 = vmatpush1.bf16.msra.mxu1 %v5589_v13  ;;  %v5621_v12 = vld [vmem:[#allocation16 + $0x3c4] ss:$16 sps:$4 sm:$0xff]   ;;  %v5616_v13 = vld [vmem:[#allocation16 + $0x1c0] ss:$16 sps:$4 sm:$0xff]  }
 0x44f   :  { %3860 = vmatprep.subr.bf16.mxu0 %v5594_v14  ;;  %3901 = vmatprep.subr.bf16.mxu1 %v5597_v15  ;;  %v5619_v14 = vld [vmem:[#allocation16 + $0x3c0] ss:$16 sps:$4 sm:$0xff]   ;;  %v5624_v15 = vld [vmem:[#allocation16 + $0x1a4] ss:$16 sps:$4 sm:$0xff]  }
 0x452   :  { %3861 = vmatpush1.bf16.msra.mxu0 %v5592_v16  ;;  %3902 = vmatpush1.bf16.msra.mxu1 %v5595_v17  ;;  %v5627_v16 = vld [vmem:[#allocation16 + $0x3a4] ss:$16 sps:$4 sm:$0xff]   ;;  %v5622_v17 = vld [vmem:[#allocation16 + $0x1a0] ss:$16 sps:$4 sm:$0xff]  }
 0x453   :  { %3862 = vmatprep.subr.bf16.mxu0 %v5600_v18  ;;  %3903 = vmatprep.subr.bf16.mxu1 %v5603_v19  ;;  %v5625_v18 = vld [vmem:[#allocation16 + $0x3a0] ss:$16 sps:$4 sm:$0xff]   ;;  %v5630_v19 = vld [vmem:[#allocation16 + $0x184] ss:$16 sps:$4 sm:$0xff]  }
 0x456   :  { %3863 = vmatpush1.bf16.msra.mxu0 %v5598_v20  ;;  %3904 = vmatpush1.bf16.msra.mxu1 %v5601_v21  ;;  %v5628_v20 = vld [vmem:[#allocation16 + $0x180] ss:$16 sps:$4 sm:$0xff]  }
 0x457   :  { %3864 = vmatprep.subr.bf16.mxu0 %v5606_v22  ;;  %3905 = vmatprep.subr.bf16.mxu1 %v5609_v23  ;;  %v5631_v21 = vld [vmem:[#allocation16 + $0x380] ss:$16 sps:$4 sm:$0xff]   ;;  %v5633_v22 = vld [vmem:[#allocation16 + $0x384] ss:$16 sps:$4 sm:$0xff]  }
 0x458   :  { %v5636_v23 = vld [vmem:[#allocation16 + $0x164] ss:$16 sps:$4 sm:$0xff]  }
 0x45a   :  { %3865 = vmatpush1.bf16.msra.mxu0 %v5604_v24  ;;  %3906 = vmatpush1.bf16.msra.mxu1 %v5607_v25  ;;  %v5639_v24 = vld [vmem:[#allocation16 + $0x364] ss:$16 sps:$4 sm:$0xff]   ;;  %v5634_v25 = vld [vmem:[#allocation16 + $0x160] ss:$16 sps:$4 sm:$0xff]  }
 0x45b   :  { %3866 = vmatprep.subr.bf16.mxu0 %v5612_v8  ;;  %3907 = vmatprep.subr.bf16.mxu1 %v5615_v9 }
 0x45e   :  { %3867 = vmatpush2.bf16.msra.mxu0 %v5610_v33  ;;  %3908 = vmatpush2.bf16.msra.mxu1 %v5613_v10 }
 0x45f   :  { %3868 = vmatprep.subr.bf16.mxu0 %v5618_v11  ;;  %3909 = vmatprep.subr.bf16.mxu1 %v5621_v12 }
 0x462   :  { %3869 = vmatpush2.bf16.msra.mxu0 %v5616_v13  ;;  %3910 = vmatpush2.bf16.msra.mxu1 %v5619_v14 }
 0x463   :  { %3870 = vmatprep.subr.bf16.mxu0 %v5624_v15  ;;  %3911 = vmatprep.subr.bf16.mxu1 %v5627_v16 }
 0x466   :  { %3871 = vmatpush2.bf16.msra.mxu0 %v5622_v17  ;;  %3912 = vmatpush2.bf16.msra.mxu1 %v5625_v18 }
 0x467   :  { %3872 = vmatprep.subr.bf16.mxu0 %v5630_v19  ;;  %3913 = vmatprep.subr.bf16.mxu1 %v5633_v22 }
 0x46a   :  { %3873 = vmatpush2.bf16.msra.mxu0 %v5628_v20  ;;  %3914 = vmatpush2.bf16.msra.mxu1 %v5631_v21 }
 0x46b   :  { %3874 = vmatprep.subr.bf16.mxu0 %v5636_v23  ;;  %3915 = vmatprep.subr.bf16.mxu1 %v5639_v24 }
 0x46e   :  { %3875 = vmatpush2.bf16.msra.mxu0 %v5634_v25 }
 0x4bd   :  { %v2777_v26 = vpop.f32.mrf.mxu0  ;;  %v2818_v27 = vpop.f32.mrf.mxu1 }
 0x4be   :  { %v2778_v30 = vadd.f32 %v2777_v26, %v2086_v28  ;;  %v5637_v26 = vld [vmem:[#allocation16 + $0x360] ss:$16 sps:$4 sm:$0xff]   ;;  %v5657_v28 = vld [vmem:[#allocation16 + $0x304] ss:$16 sps:$4 sm:$0xff]  }
 0x4bf   :  { %v2779_v36 = vpop.f32.mrf.mxu0  ;;  %v2820_v51 = vpop.f32.mrf.mxu1  ;;  %3916 = vmatpush2.bf16.msra.mxu1 %v5637_v26 }
 0x4c0   :  { %v2780_v29 = vadd.f32 %v2779_v36, %v2090_v58  ;;  %v6349_v39 = vadd.f32 %v2818_v27, %v2778_v30  ;;  %v5642_v27 = vld [vmem:[#allocation16 + $0x144] ss:$16 sps:$4 sm:$0xff]   ;;  %v5655_v30 = vld [vmem:[#allocation16 + $0x300] ss:$16 sps:$4 sm:$0xff]  }
 0x4c1   :  { %v2781_v31 = vpop.f32.mrf.mxu0  ;;  %v2822_v61 = vpop.f32.mrf.mxu1  ;;  %v5645_v36 = vld [vmem:[#allocation16 + $0x344] ss:$16 sps:$4 sm:$0xff]   ;;  %3876 = vmatprep.subr.bf16.mxu0 %v5642_v27 }
 0x4c2   :  { %v6346_v32 = vadd.f32 %v2820_v51, %v2780_v29  ;;  %v2912_v57 = vmul.f32 %v6349_v39, %v6349_v39  ;;  %v5640_v51 = vld [vmem:[#allocation16 + $0x140] ss:$16 sps:$4 sm:$0xff]   ;;  %3917 = vmatprep.subr.bf16.mxu1 %v5645_v36  ;;  %v5648_v61 = vld [vmem:[#allocation16 + $0x124] ss:$16 sps:$4 sm:$0xff]  }
 0x4c3   :  { %v2782_v44 = vpop.f32.mrf.mxu0  ;;  %v2823_v45 = vpop.f32.mrf.mxu1  ;;  %v5643_v31 = vld [vmem:[#allocation16 + $0x340] ss:$16 sps:$4 sm:$0xff]   ;;  %3877 = vmatpush2.bf16.msra.mxu0 %v5640_v51  ;;  %v5654_v58 = vld [vmem:[#allocation16 + $0x104] ss:$16 sps:$4 sm:$0xff]  }
 0x4c4   :  { %v2913_v46 = vmul.f32 %v6346_v32, %v6346_v32  ;;  %v2907_v59 = vadd.f32 %v6346_v32, %v6349_v39  ;;  %v5651_v44 = vld [vmem:[#allocation16 + $0x324] ss:$16 sps:$4 sm:$0xff]   ;;  %3918 = vmatpush2.bf16.msra.mxu1 %v5643_v31  ;;  %v5646_v45 = vld [vmem:[#allocation16 + $0x120] ss:$16 sps:$4 sm:$0xff]   ;;  %3878 = vmatprep.subr.bf16.mxu0 %v5648_v61 }
 0x4c5   :  { %3919 = vmatprep.subr.bf16.mxu1 %v5651_v44  ;;  %v5652_v29 = vld [vmem:[#allocation16 + $0x100] ss:$16 sps:$4 sm:$0xff]  }
 0x4c6   :  { %v2916_v5 = vadd.f32 %v2913_v46, %v2912_v57  ;;  %v4855_v57 = vld.sshfl [vmem:[%s6466_s11] sm:$0x33 pattern:$0x75316420] }
 0x4c7   :  { %3879 = vmatpush2.bf16.msra.mxu0 %v5646_v45 }
 0x4c8   :  { %3920 = vmatpush2.bf16.msra.mxu1 %v5649_v48  ;;  %3880 = vmatprep.subr.bf16.mxu0 %v5654_v58 }
 0x4c9   :  { %3921 = vmatprep.subr.bf16.mxu1 %v5657_v28 }
 0x4cb   :  { %3881 = vmatpush2.bf16.msra.mxu0 %v5652_v29 }
 0x4cc   :  { %3922 = vmatpush2.bf16.msra.mxu1 %v5655_v30 }
 0x4fd   :  { %v2859_v42 = vpop.f32.mrf.mxu0  ;;  %v2900_v43 = vpop.f32.mrf.mxu1 }
 0x4fe   :  { %v2860_v49 = vadd.f32 %v2859_v42, %v2094_v38  ;;  %v5660_v38 = vld [vmem:[#allocation16 + $0xec] ss:$16 sps:$4 sm:$0xff]  }
 0x4ff   :  { %v2861_v50 = vpop.f32.mrf.mxu0  ;;  %v2902_v56 = vpop.f32.mrf.mxu1  ;;  %3932 = vmatprep.subr.bf16.mxu0 %v5660_v38 }
 0x500   :  { %v6358_v62 = vadd.f32 %v2900_v43, %v2860_v49  ;;  %v2862_v63 = vadd.f32 %v2861_v50, %v2098_v40  ;;  %v5663_v40 = vld [vmem:[#allocation16 + $0x2ec] ss:$16 sps:$4 sm:$0xff]  }
 0x501   :  { %v2863_v0 = vpop.f32.mrf.mxu0  ;;  %v2904_v1 = vpop.f32.mrf.mxu1  ;;  %3973 = vmatprep.subr.bf16.mxu1 %v5663_v40 }
 0x502   :  { %v2914_v2 = vmul.f32 %v6358_v62, %v6358_v62  ;;  %v6362_v3 = vadd.f32 %v2902_v56, %v2862_v63  ;;  %v2908_v4 = vadd.f32 %v2907_v59, %v6358_v62  ;;  %v4856_v63 = vld.sshfl [vmem:[#allocation14] sm:$0x33 pattern:$0x75316420]  ;;  %v2949_v0 = vcombine.high %v4855_v57, %v4855_v57 }
 0x503   :  { %v2864_v6 = vpop.f32.mrf.mxu0  ;;  %v2905_v53 = vpop.f32.mrf.mxu1 }
 0x504   :  { %v2909_v54 = vadd.f32 %v2908_v4, %v6362_v3  ;;  %v2915_v52 = vmul.f32 %v6362_v3, %v6362_v3  ;;  %v2917_v55 = vadd.f32 %v2916_v5, %v2914_v2  ;;  %v3007_v2 = vcombine.high %v4856_v63, %v4856_v63 }
 0x505   :  { %v2963_v4 = vrot.slane %v2949_v0, %v6253_v60  ;;  %v2956_v5 = vrot.slane %v4855_v57, %v6253_v60  ;;  %v3014_v53 = vrot.slane %v4856_v63, %v6253_v60  ;;  %v5669_v57 = vld [vmem:[#allocation16 + $0x2cc] ss:$16 sps:$4 sm:$0xff]   ;;  %v5667_v63 = vld [vmem:[#allocation16 + $0x2c8] ss:$16 sps:$4 sm:$0xff]  }
 0x506   :  { %2910 = vadd.xlane.f32.xlu0 %v2909_v54  ;;  %v2918_v7 = vadd.f32 %v2917_v55, %v2915_v52  ;;  %v3021_v6 = vrot.slane %v3007_v2, %v6253_v60  ;;  %v5672_v0 = vld [vmem:[#allocation16 + $0xac] ss:$16 sps:$4 sm:$0xff]   ;;  %v5670_v2 = vld [vmem:[#allocation16 + $0xa8] ss:$16 sps:$4 sm:$0xff]  }
 0x507   :  { %v2965_v54 = vcombine.high %v2963_v4, %v2963_v4  ;;  %v2964_v52 = vcombine.high %v2956_v5, %v2956_v5  ;;  %v2974_v8 = vpack.i.b16 %v2963_v4, %v2963_v4  ;;  %v2967_v33 = vpack.i.b16 %v2956_v5, %v2956_v5  ;;  %v5673_v4 = vld [vmem:[#allocation16 + $0x2a8] ss:$16 sps:$4 sm:$0xff]   ;;  %v5678_v5 = vld [vmem:[#allocation16 + $0x8c] ss:$16 sps:$4 sm:$0xff]  }
 0x508   :  { %2919 = vadd.xlane.f32.xlu1 %v2918_v7  ;;  %v3023_v55 = vcombine.high %v3021_v6, %v3021_v6  ;;  %v3022_v7 = vcombine.high %v3014_v53, %v3014_v53  ;;  %v3032_v11 = vpack.i.b16 %v3021_v6, %v3021_v6  ;;  %v3025_v13 = vpack.i.b16 %v3014_v53, %v3014_v53  ;;  %v5681_v6 = vld [vmem:[#allocation16 + $0x28c] ss:$16 sps:$4 sm:$0xff]   ;;  %v5676_v53 = vld [vmem:[#allocation16 + $0x88] ss:$16 sps:$4 sm:$0xff]  }
 0x509   :  { %v2988_v9 = vpack.i.b16 %v2965_v54, %v2965_v54  ;;  %v2981_v10 = vpack.i.b16 %v2964_v52, %v2964_v52  ;;  %v2979_v20 = vrot.slane %v2974_v8, %v6214_v34  ;;  %v2972_v22 = vrot.slane %v2967_v33, %v6214_v34  ;;  %v5679_v54 = vld [vmem:[#allocation16 + $0x288] ss:$16 sps:$4 sm:$0xff]   ;;  %v5684_v52 = vld [vmem:[#allocation16 + $0x6c] ss:$16 sps:$4 sm:$0xff]  }
 0x50a   :  { %v3046_v12 = vpack.i.b16 %v3023_v55, %v3023_v55  ;;  %v3039_v14 = vpack.i.b16 %v3022_v7, %v3022_v7  ;;  %v5687_v55 = vld [vmem:[#allocation16 + $0x26c] ss:$16 sps:$4 sm:$0xff]   ;;  %v5682_v7 = vld [vmem:[#allocation16 + $0x68] ss:$16 sps:$4 sm:$0xff]  }
 0x50b   :  { %v2993_v21 = vrot.slane %v2988_v9, %v6214_v34  ;;  %v2986_v23 = vrot.slane %v2981_v10, %v6214_v34  ;;  %v5685_v8 = vld [vmem:[#allocation16 + $0x268] ss:$16 sps:$4 sm:$0xff]   ;;  %v5690_v9 = vld [vmem:[#allocation16 + $0x4c] ss:$16 sps:$4 sm:$0xff]  }
 0x50c   :  { %v5693_v33 = vld [vmem:[#allocation16 + $0x24c] ss:$16 sps:$4 sm:$0xff]   ;;  %v5688_v10 = vld [vmem:[#allocation16 + $0x48] ss:$16 sps:$4 sm:$0xff]  }
 0x58f   :  { %v2911_v42 = vpop.xlane.xlu0 %2910 }
 0x590   :  { %v2921_v43 = vmul.f32 0.001953125, %v2911_v42 }
 0x591   :  { %v2920_v46 = vpop.xlane.xlu1 %2919 }
 0x592   :  { %v2922_v49 = vmul.f32 0.001953125, %v2920_v46  ;;  %v2923_v50 = vmul.f32 %v2921_v43, %v2921_v43  ;;  %v2926_v15 = vsub.f32 %v6349_v39, %v2921_v43  ;;  %v2928_v16 = vsub.f32 %v6358_v62, %v2921_v43  ;;  %v5661_v46 = vld [vmem:[#allocation16 + $0x2e8] ss:$16 sps:$4 sm:$0xff]  }
 0x593   :  { %v2927_v17 = vsub.f32 %v6346_v32, %v2921_v43  ;;  %v2929_v18 = vsub.f32 %v6362_v3, %v2921_v43  ;;  %v3037_v39 = vrot.slane %v3032_v11, %v6214_v34  ;;  %v3051_v62 = vrot.slane %v3046_v12, %v6214_v34  ;;  %v5658_v43 = vld [vmem:[#allocation16 + $0xe8] ss:$16 sps:$4 sm:$0xff]   ;;  %v5696_v12 = vld [vmem:[#allocation16 + $0x2c] ss:$16 sps:$4 sm:$0xff]  }
 0x594   :  { %v2924_v56 = vsub.f32 %v2922_v49, %v2923_v50  ;;  %v3030_v32 = vrot.slane %v3025_v13, %v6214_v34  ;;  %v3044_v3 = vrot.slane %v3039_v14, %v6214_v34  ;;  %v5691_v11 = vld [vmem:[#allocation16 + $0x248] ss:$16 sps:$4 sm:$0xff]   ;;  %v5699_v13 = vld [vmem:[#allocation16 + $0x22c] ss:$16 sps:$4 sm:$0xff]  }
 0x595   :  { %v5694_v14 = vld [vmem:[#allocation16 + $0x28] ss:$16 sps:$4 sm:$0xff]  }
 0x596   :  { %v2925_v59 = vmax.f32 %v2924_v56, 0.0  ;;  %v5666_v56 = vld [vmem:[#allocation16 + $0xcc] ss:$16 sps:$4 sm:$0xff]  }
 0x598   :  { %v2930_v1 = vadd.f32 1e-05, %v2925_v59  ;;  %v5664_v59 = vld [vmem:[#allocation16 + $0xc8] ss:$16 sps:$4 sm:$0xff]  }
 0x59a   :  { %5790 = vrsqrt.f32 %v2930_v1  ;;  %v5675_v1 = vld [vmem:[#allocation16 + $0x2ac] ss:$16 sps:$4 sm:$0xff]  }
 0x5a7   :  { %v5791_v19 = vpop.eup %5790 }
 0x5a8   :  { %v2933_v24 = vmul.f32 %v5791_v19, %v2927_v17  ;;  %v2935_v25 = vmul.f32 %v5791_v19, %v2929_v18  ;;  %v2932_v26 = vmul.f32 %v5791_v19, %v2926_v15  ;;  %v2934_v27 = vmul.f32 %v5791_v19, %v2928_v16  ;;  %v5697_v15 = vld [vmem:[#allocation16 + $0x228] ss:$16 sps:$4 sm:$0xff]   ;;  %v5702_v16 = vld [vmem:[#allocation16 + $0xc] ss:$16 sps:$4 sm:$0xff]  }
 0x5a9   :  { %v5705_v17 = vld [vmem:[#allocation16 + $0x20c] ss:$16 sps:$4 sm:$0xff]   ;;  %v5700_v18 = vld [vmem:[#allocation16 + $0x8] ss:$16 sps:$4 sm:$0xff]  }
 0x5aa   :  { %v2937_v36 = vpack.c.bf16 %v2933_v24, %v2933_v24  ;;  %v2939_v51 = vpack.c.bf16 %v2935_v25, %v2935_v25  ;;  %v2936_v31 = vpack.c.bf16 %v2932_v26, %v2932_v26  ;;  %v2938_v61 = vpack.c.bf16 %v2934_v27, %v2934_v27  ;;  %v5703_v19 = vld [vmem:[#allocation16 + $0x208] ss:$16 sps:$4 sm:$0xff]   ;;  %v5714_v24 = vld [vmem:[#allocation16 + $0x1cc] ss:$16 sps:$4 sm:$0xff]  }
 0x5ab   :  { %v5717_v25 = vld [vmem:[#allocation16 + $0x3cc] ss:$16 sps:$4 sm:$0xff]   ;;  %v5712_v26 = vld [vmem:[#allocation16 + $0x1c8] ss:$16 sps:$4 sm:$0xff]  }
 0x5ac   :  { %v2995_v44 = vmul.bf16 %v2979_v20, %v2937_v36  ;;  %v2997_v45 = vmul.bf16 %v2993_v21, %v2939_v51  ;;  %v2994_v48 = vmul.bf16 %v2972_v22, %v2936_v31  ;;  %v2996_v58 = vmul.bf16 %v2986_v23, %v2938_v61  ;;  %v5708_v20 = vld [vmem:[#allocation16 + $0x1ec] ss:$16 sps:$4 sm:$0xff]   ;;  %v5706_v22 = vld [vmem:[#allocation16 + $0x1e8] ss:$16 sps:$4 sm:$0xff]  }
 0x5ad   :  { %v5711_v21 = vld [vmem:[#allocation16 + $0x3ec] ss:$16 sps:$4 sm:$0xff]   ;;  %v5709_v23 = vld [vmem:[#allocation16 + $0x3e8] ss:$16 sps:$4 sm:$0xff]  }
 0x5ae   :  { %v3053_v28 = vadd.bf16 %v3037_v39, %v2995_v44  ;;  %v3055_v29 = vadd.bf16 %v3051_v62, %v2997_v45  ;;  %v3052_v30 = vadd.bf16 %v3030_v32, %v2994_v48  ;;  %v3054_v38 = vadd.bf16 %v3044_v3, %v2996_v58  ;;  %v5715_v27 = vld [vmem:[#allocation16 + $0x3c8] ss:$16 sps:$4 sm:$0xff]   ;;  %v5720_v39 = vld [vmem:[#allocation16 + $0x1ac] ss:$16 sps:$4 sm:$0xff]  }
 0x5af   :  { %v5723_v62 = vld [vmem:[#allocation16 + $0x3ac] ss:$16 sps:$4 sm:$0xff]   ;;  %v5718_v32 = vld [vmem:[#allocation16 + $0x1a8] ss:$16 sps:$4 sm:$0xff]  }
 0x5b0   :  { %v3057_v40 = vmax.bf16 %v6064_v47, %v3053_v28  ;;  %v3059_v42 = vmax.bf16 %v6064_v47, %v3055_v29  ;;  %v6390_v49 = vmax.bf16 %v6064_v47, %v3052_v30  ;;  %v6393_v50 = vmax.bf16 %v6064_v47, %v3054_v38  ;;  %v5721_v3 = vld [vmem:[#allocation16 + $0x3a8] ss:$16 sps:$4 sm:$0xff]   ;;  %v5726_v36 = vld [vmem:[#allocation16 + $0x18c] ss:$16 sps:$4 sm:$0xff]  }
 0x5b1   :  { %v5729_v51 = vld [vmem:[#allocation16 + $0x38c] ss:$16 sps:$4 sm:$0xff]   ;;  %v5724_v31 = vld [vmem:[#allocation16 + $0x188] ss:$16 sps:$4 sm:$0xff]  }
 0x5b2   :  { %3882 = vmatprep.mubr.bf16.mxu0 %v3057_v40  ;;  %3923 = vmatprep.mubr.bf16.mxu1 %v3059_v42  ;;  %v5727_v61 = vld [vmem:[#allocation16 + $0x388] ss:$16 sps:$4 sm:$0xff]   ;;  %v5732_v44 = vld [vmem:[#allocation16 + $0x16c] ss:$16 sps:$4 sm:$0xff]  }
 0x5b3   :  { %3883 = vmatmul.mubr.bf16.vlgmr.msra.gmra.mxu0 %v6390_v49  ;;  %3924 = vmatmul.mubr.bf16.vlgmr.msra.gmra.mxu1 %v6393_v50  ;;  %v5735_v45 = vld [vmem:[#allocation16 + $0x36c] ss:$16 sps:$4 sm:$0xff]   ;;  %v5730_v48 = vld [vmem:[#allocation16 + $0x168] ss:$16 sps:$4 sm:$0xff]  }
 0x5b4   :  { %3933 = vmatpush1.bf16.msra.mxu0 %v5658_v43  ;;  %3974 = vmatpush1.bf16.msra.mxu1 %v5661_v46  ;;  %v5733_v58 = vld [vmem:[#allocation16 + $0x368] ss:$16 sps:$4 sm:$0xff]   ;;  %v5738_v28 = vld [vmem:[#allocation16 + $0x14c] ss:$16 sps:$4 sm:$0xff]  }
 0x5b5   :  { %3964 = vmatprep.mubr.bf16.mxu0 %v3057_v40  ;;  %4005 = vmatprep.mubr.bf16.mxu1 %v3059_v42  ;;  %v5741_v29 = vld [vmem:[#allocation16 + $0x34c] ss:$16 sps:$4 sm:$0xff]   ;;  %v5736_v30 = vld [vmem:[#allocation16 + $0x148] ss:$16 sps:$4 sm:$0xff]  }
 0x5b6   :  { %3934 = vmatprep.subr.bf16.mxu0 %v5666_v56  ;;  %3975 = vmatprep.subr.bf16.mxu1 %v5669_v57  ;;  %v5739_v38 = vld [vmem:[#allocation16 + $0x348] ss:$16 sps:$4 sm:$0xff]   ;;  %v5744_v40 = vld [vmem:[#allocation16 + $0x12c] ss:$16 sps:$4 sm:$0xff]  }
 0x5b7   :  { %v5747_v42 = vld [vmem:[#allocation16 + $0x32c] ss:$16 sps:$4 sm:$0xff]   ;;  %v5742_v43 = vld [vmem:[#allocation16 + $0x128] ss:$16 sps:$4 sm:$0xff]  }
 0x5b8   :  { %3935 = vmatpush1.bf16.msra.mxu0 %v5664_v59  ;;  %3976 = vmatpush1.bf16.msra.mxu1 %v5667_v63  ;;  %v5745_v46 = vld [vmem:[#allocation16 + $0x328] ss:$16 sps:$4 sm:$0xff]   ;;  %v5750_v56 = vld [vmem:[#allocation16 + $0x10c] ss:$16 sps:$4 sm:$0xff]  }
 0x5b9   :  { %3936 = vmatprep.subr.bf16.mxu0 %v5672_v0  ;;  %3977 = vmatprep.subr.bf16.mxu1 %v5675_v1  ;;  %v5753_v57 = vld [vmem:[#allocation16 + $0x30c] ss:$16 sps:$4 sm:$0xff]   ;;  %v5748_v59 = vld [vmem:[#allocation16 + $0x108] ss:$16 sps:$4 sm:$0xff]  }
 0x5ba   :  { %v5751_v63 = vld [vmem:[#allocation16 + $0x308] ss:$16 sps:$4 sm:$0xff]  }
 0x5bc   :  { %3937 = vmatpush1.bf16.msra.mxu0 %v5670_v2  ;;  %3978 = vmatpush1.bf16.msra.mxu1 %v5673_v4 }
 0x5bd   :  { %3938 = vmatprep.subr.bf16.mxu0 %v5678_v5  ;;  %3979 = vmatprep.subr.bf16.mxu1 %v5681_v6 }
 0x5c0   :  { %3939 = vmatpush1.bf16.msra.mxu0 %v5676_v53  ;;  %3980 = vmatpush1.bf16.msra.mxu1 %v5679_v54 }
 0x5c1   :  { %3940 = vmatprep.subr.bf16.mxu0 %v5684_v52  ;;  %3981 = vmatprep.subr.bf16.mxu1 %v5687_v55  ;;  %v3188_v52 = vld [vmem:[%s6469_s14] sm:$0xf] }
 0x5c2   :  { %v3197_v55 = vrot.slane %v3188_v52, %v6220_v37 }
 0x5c4   :  { %3941 = vmatpush1.bf16.msra.mxu0 %v5682_v7  ;;  %3982 = vmatpush1.bf16.msra.mxu1 %v5685_v8  ;;  %v3193_v7 = vrot.slane %v3188_v52, %v6214_v34 }
 0x5c5   :  { %3942 = vmatprep.subr.bf16.mxu0 %v5690_v9  ;;  %3983 = vmatprep.subr.bf16.mxu1 %v5693_v33 }
 0x5c8   :  { %3943 = vmatpush1.bf16.msra.mxu0 %v5688_v10  ;;  %3984 = vmatpush1.bf16.msra.mxu1 %v5691_v11  ;;  %v3205_v10 = vrot.slane %v3188_v52, %v6226_v41 }
 0x5c9   :  { %3944 = vmatprep.subr.bf16.mxu0 %v5696_v12  ;;  %3985 = vmatprep.subr.bf16.mxu1 %v5699_v13 }
 0x5cc   :  { %3945 = vmatpush1.bf16.msra.mxu0 %v5694_v14  ;;  %3986 = vmatpush1.bf16.msra.mxu1 %v5697_v15 }
 0x5cd   :  { %3946 = vmatprep.subr.bf16.mxu0 %v5702_v16  ;;  %3987 = vmatprep.subr.bf16.mxu1 %v5705_v17 }
 0x5d0   :  { %3947 = vmatpush1.bf16.msra.mxu0 %v5700_v18  ;;  %3988 = vmatpush1.bf16.msra.mxu1 %v5703_v19 }
 0x5d1   :  { %3948 = vmatprep.subr.bf16.mxu0 %v5708_v20  ;;  %3989 = vmatprep.subr.bf16.mxu1 %v5711_v21 }
 0x5d4   :  { %3949 = vmatpush2.bf16.msra.mxu0 %v5706_v22  ;;  %3990 = vmatpush2.bf16.msra.mxu1 %v5709_v23 }
 0x5d5   :  { %3950 = vmatprep.subr.bf16.mxu0 %v5714_v24  ;;  %3991 = vmatprep.subr.bf16.mxu1 %v5717_v25 }
 0x5d8   :  { %3951 = vmatpush2.bf16.msra.mxu0 %v5712_v26  ;;  %3992 = vmatpush2.bf16.msra.mxu1 %v5715_v27 }
 0x5d9   :  { %3952 = vmatprep.subr.bf16.mxu0 %v5720_v39  ;;  %3993 = vmatprep.subr.bf16.mxu1 %v5723_v62 }
 0x5dc   :  { %3953 = vmatpush2.bf16.msra.mxu0 %v5718_v32  ;;  %3994 = vmatpush2.bf16.msra.mxu1 %v5721_v3  ;;  %v5754_v32 = vld [vmem:[#allocation19 + $0x78] sm:$0xff]  }
 0x5dd   :  { %3954 = vmatprep.subr.bf16.mxu0 %v5726_v36  ;;  %3995 = vmatprep.subr.bf16.mxu1 %v5729_v51  ;;  %v5755_v3 = vld [vmem:[#allocation19 + $0xf8] sm:$0xff]  }
 0x5de   :  { %v5756_v36 = vld [vmem:[#allocation19 + $0x38] sm:$0xff]  }
 0x5df   :  { %v5757_v51 = vld [vmem:[#allocation19 + $0xb8] sm:$0xff]  }
 0x5e0   :  { %3955 = vmatpush2.bf16.msra.mxu0 %v5724_v31  ;;  %3996 = vmatpush2.bf16.msra.mxu1 %v5727_v61  ;;  %v5758_v31 = vld [vmem:[#allocation19 + $0x70] sm:$0xff]  }
 0x5e1   :  { %3956 = vmatprep.subr.bf16.mxu0 %v5732_v44  ;;  %3997 = vmatprep.subr.bf16.mxu1 %v5735_v45  ;;  %v5759_v61 = vld [vmem:[#allocation19 + $0xf0] sm:$0xff]  }
 0x5e2   :  { %v5760_v44 = vld [vmem:[#allocation19 + $0x30] sm:$0xff]  }
 0x5e3   :  { %v5761_v45 = vld [vmem:[#allocation19 + $0xb0] sm:$0xff]  }
 0x5e4   :  { %3957 = vmatpush2.bf16.msra.mxu0 %v5730_v48  ;;  %3998 = vmatpush2.bf16.msra.mxu1 %v5733_v58  ;;  %v5762_v48 = vld [vmem:[#allocation19 + $0x68] sm:$0xff]  }
 0x5e5   :  { %3958 = vmatprep.subr.bf16.mxu0 %v5738_v28  ;;  %3999 = vmatprep.subr.bf16.mxu1 %v5741_v29  ;;  %v5763_v58 = vld [vmem:[#allocation19 + $0xe8] sm:$0xff]  }
 0x5e6   :  { %v5764_v28 = vld [vmem:[#allocation19 + $0x28] sm:$0xff]  }
 0x5e7   :  { %v5765_v29 = vld [vmem:[#allocation19 + $0xa8] sm:$0xff]  }
 0x5e8   :  { %3959 = vmatpush2.bf16.msra.mxu0 %v5736_v30  ;;  %4000 = vmatpush2.bf16.msra.mxu1 %v5739_v38  ;;  %v5766_v30 = vld [vmem:[#allocation19 + $0x60] sm:$0xff]  }
 0x5e9   :  { %3960 = vmatprep.subr.bf16.mxu0 %v5744_v40  ;;  %4001 = vmatprep.subr.bf16.mxu1 %v5747_v42  ;;  %v5767_v38 = vld [vmem:[#allocation19 + $0xe0] sm:$0xff]  }
 0x5ea   :  { %v5768_v40 = vld [vmem:[#allocation19 + $0x20] sm:$0xff]  }
 0x5eb   :  { %v5769_v42 = vld [vmem:[#allocation19 + $0xa0] sm:$0xff]  }
 0x5ec   :  { %3961 = vmatpush2.bf16.msra.mxu0 %v5742_v43  ;;  %4002 = vmatpush2.bf16.msra.mxu1 %v5745_v46  ;;  %v5770_v43 = vld [vmem:[#allocation19 + $0x58] sm:$0xff]  }
 0x5ed   :  { %3962 = vmatprep.subr.bf16.mxu0 %v5750_v56  ;;  %4003 = vmatprep.subr.bf16.mxu1 %v5753_v57  ;;  %v5771_v46 = vld [vmem:[#allocation19 + $0xd8] sm:$0xff]  }
 0x5ee   :  { %v5772_v56 = vld [vmem:[#allocation19 + $0x18] sm:$0xff]  }
 0x5ef   :  { %v5773_v57 = vld [vmem:[#allocation19 + $0x98] sm:$0xff]  }
 0x5f0   :  { %3963 = vmatpush2.bf16.msra.mxu0 %v5748_v59  ;;  %4004 = vmatpush2.bf16.msra.mxu1 %v5751_v63  ;;  %v5774_v59 = vld [vmem:[#allocation19 + $0x50] sm:$0xff]  }
 0x5f1   :  { %5020 = vmatprep.subr.bf16.mxu0 %v5754_v32  ;;  %5042 = vmatprep.subr.bf16.mxu1 %v5755_v3  ;;  %v5775_v63 = vld [vmem:[#allocation19 + $0xd0] sm:$0xff]  }
 0x5f3   :  { %3965 = vmatmul.mubr.bf16.vlgmr.msra.gmra.mxu0 %v6390_v49  ;;  %4006 = vmatmul.mubr.bf16.vlgmr.msra.gmra.mxu1 %v6393_v50  ;;  %v3201_v50 = vrot.slane %v3188_v52, %v6217_v35  ;;  %v5784_v52 = vld [vmem:[#allocation19] sm:$0xff]  }
 0x5f4   :  { %5021 = vmatpush3.bf16.msra.mxu0 %v5756_v36  ;;  %5043 = vmatpush3.bf16.msra.mxu1 %v5757_v51 }
 0x5f5   :  { %5022 = vmatprep.subr.bf16.mxu0 %v5758_v31  ;;  %5044 = vmatprep.subr.bf16.mxu1 %v5759_v61 }
 0x5f8   :  { %5023 = vmatpush3.bf16.msra.mxu0 %v5760_v44  ;;  %5045 = vmatpush3.bf16.msra.mxu1 %v5761_v45 }
 0x5f9   :  { %5024 = vmatprep.subr.bf16.mxu0 %v5762_v48  ;;  %5046 = vmatprep.subr.bf16.mxu1 %v5763_v58 }
 0x5fc   :  { %5025 = vmatpush3.bf16.msra.mxu0 %v5764_v28  ;;  %5047 = vmatpush3.bf16.msra.mxu1 %v5765_v29 }
 0x5fd   :  { %5026 = vmatprep.subr.bf16.mxu0 %v5766_v30  ;;  %5048 = vmatprep.subr.bf16.mxu1 %v5767_v38 }
 0x600   :  { %5027 = vmatpush3.bf16.msra.mxu0 %v5768_v40  ;;  %5049 = vmatpush3.bf16.msra.mxu1 %v5769_v42 }
 0x601   :  { %5028 = vmatprep.subr.bf16.mxu0 %v5770_v43  ;;  %5050 = vmatprep.subr.bf16.mxu1 %v5771_v46 }
 0x604   :  { %5029 = vmatpush3.bf16.msra.mxu0 %v5772_v56  ;;  %5051 = vmatpush3.bf16.msra.mxu1 %v5773_v57 }
 0x605   :  { %5030 = vmatprep.subr.bf16.mxu0 %v5774_v59  ;;  %5052 = vmatprep.subr.bf16.mxu1 %v5775_v63 }
 0x673   :  { %v3884_v0 = vpop.f32.mrf.mxu0  ;;  %v3925_v1 = vpop.f32.mrf.mxu1 }
 0x674   :  { %v3885_v49 = vadd.f32 %v3884_v0, %v3193_v7  ;;  %v5776_v0 = vld [vmem:[#allocation19 + $0x10] sm:$0xff]  }
 0x675   :  { %v3886_v2 = vpop.f32.mrf.mxu0  ;;  %v3927_v4 = vpop.f32.mrf.mxu1  ;;  %5031 = vmatpush3.bf16.msra.mxu0 %v5776_v0 }
 0x676   :  { %v3887_v8 = vadd.f32 %v3886_v2, %v3197_v55  ;;  %v6407_v33 = vadd.f32 %v3925_v1, %v3885_v49  ;;  %v5777_v1 = vld [vmem:[#allocation19 + $0x90] sm:$0xff]   ;;  %v5778_v2 = vld [vmem:[#allocation19 + $0x48] sm:$0xff]   ;;  %v5785_v55 = vld [vmem:[#allocation19 + $0x80] sm:$0xff]  }
 0x677   :  { %v3888_v5 = vpop.f32.mrf.mxu0  ;;  %v3929_v6 = vpop.f32.mrf.mxu1  ;;  %5053 = vmatpush3.bf16.msra.mxu1 %v5777_v1  ;;  %5032 = vmatprep.subr.bf16.mxu0 %v5778_v2 }
 0x678   :  { %v6404_v9 = vadd.f32 %v3927_v4, %v3887_v8  ;;  %v4019_v16 = vmul.f32 %v6407_v33, %v6407_v33  ;;  %v5779_v4 = vld [vmem:[#allocation19 + $0xc8] sm:$0xff]  }
 0x679   :  { %v3889_v53 = vpop.f32.mrf.mxu0  ;;  %v3930_v54 = vpop.f32.mrf.mxu1  ;;  %v5780_v5 = vld [vmem:[#allocation19 + $0x8] sm:$0xff]   ;;  %5054 = vmatprep.subr.bf16.mxu1 %v5779_v4 }
 0x67a   :  { %v4020_v13 = vmul.f32 %v6404_v9, %v6404_v9  ;;  %v4014_v17 = vadd.f32 %v6404_v9, %v6407_v33  ;;  %v5781_v6 = vld [vmem:[#allocation19 + $0x88] sm:$0xff]   ;;  %v5782_v53 = vld [vmem:[#allocation19 + $0x40] sm:$0xff]   ;;  %5033 = vmatpush3.bf16.msra.mxu0 %v5780_v5 }
 0x67b   :  { %v5783_v54 = vld [vmem:[#allocation19 + $0xc0] sm:$0xff]   ;;  %5055 = vmatpush3.bf16.msra.mxu1 %v5781_v6  ;;  %5034 = vmatprep.subr.bf16.mxu0 %v5782_v53 }
 0x67c   :  { %v4023_v23 = vadd.f32 %v4020_v13, %v4019_v16  ;;  %5056 = vmatprep.subr.bf16.mxu1 %v5783_v54 }
 0x67e   :  { %5035 = vmatpush3.bf16.msra.mxu0 %v5784_v52 }
 0x67f   :  { %5057 = vmatpush3.bf16.msra.mxu1 %v5785_v55 }
 0x6b3   :  { %v3966_v11 = vpop.f32.mrf.mxu0  ;;  %v4007_v12 = vpop.f32.mrf.mxu1 }
 0x6b4   :  { %v3967_v14 = vadd.f32 %v3966_v11, %v3201_v50 }
 0x6b5   :  { %v3968_v15 = vpop.f32.mrf.mxu0  ;;  %v4009_v37 = vpop.f32.mrf.mxu1 }
 0x6b6   :  { %v6416_v18 = vadd.f32 %v4007_v12, %v3967_v14  ;;  %v3969_v35 = vadd.f32 %v3968_v15, %v3205_v10  ;;  %v4985_v12 = vld.sshfl [vmem:[#allocation17] sm:$0x33 pattern:$0x75316420] }
 0x6b7   :  { %v3970_v19 = vpop.f32.mrf.mxu0  ;;  %v4011_v20 = vpop.f32.mrf.mxu1  ;;  %v4986_v14 = vld.sshfl [vmem:[%s6471_s16] sm:$0x33 pattern:$0x75316420]  ;;  %v4056_v15 = vcombine.high %v4985_v12, %v4985_v12 }
 0x6b8   :  { %v4021_v41 = vmul.f32 %v6416_v18, %v6416_v18  ;;  %v6420_v21 = vadd.f32 %v4009_v37, %v3969_v35  ;;  %v4015_v22 = vadd.f32 %v4014_v17, %v6416_v18  ;;  %v4114_v16 = vcombine.high %v4986_v14, %v4986_v14 }
 0x6b9   :  { %v3971_v24 = vpop.f32.mrf.mxu0  ;;  %v4012_v25 = vpop.f32.mrf.mxu1  ;;  %v4070_v17 = vrot.slane %v4056_v15, %v6253_v60  ;;  %v4063_v35 = vrot.slane %v4985_v12, %v6253_v60  ;;  %v4121_v20 = vrot.slane %v4986_v14, %v6253_v60 }
 0x6ba   :  { %v4016_v26 = vadd.f32 %v4015_v22, %v6420_v21  ;;  %v4022_v27 = vmul.f32 %v6420_v21, %v6420_v21  ;;  %v4024_v39 = vadd.f32 %v4023_v23, %v4021_v41  ;;  %v4128_v19 = vrot.slane %v4114_v16, %v6253_v60 }
 0x6bb   :  { %v4072_v41 = vcombine.high %v4070_v17, %v4070_v17  ;;  %v4071_v22 = vcombine.high %v4063_v35, %v4063_v35  ;;  %v4129_v24 = vcombine.high %v4121_v20, %v4121_v20  ;;  %v4081_v25 = vpack.i.b16 %v4070_v17, %v4070_v17 }
 0x6bc   :  { %4017 = vadd.xlane.f32.xlu0 %v4016_v26  ;;  %v4025_v62 = vadd.f32 %v4024_v39, %v4022_v27  ;;  %v4130_v23 = vcombine.high %v4128_v19, %v4128_v19  ;;  %v4074_v27 = vpack.i.b16 %v4063_v35, %v4063_v35  ;;  %v4132_v3 = vpack.i.b16 %v4121_v20, %v4121_v20 }
 0x6bd   :  { %v4095_v26 = vpack.i.b16 %v4072_v41, %v4072_v41  ;;  %v4088_v39 = vpack.i.b16 %v4071_v22, %v4071_v22  ;;  %v4146_v36 = vpack.i.b16 %v4129_v24, %v4129_v24  ;;  %v4086_v45 = vrot.slane %v4081_v25, %v6214_v34 }
 0x6be   :  { %4026 = vadd.xlane.f32.xlu1 %v4025_v62  ;;  %v4139_v62 = vpack.i.b16 %v4128_v19, %v4128_v19  ;;  %v4153_v32 = vpack.i.b16 %v4130_v23, %v4130_v23  ;;  %v4079_v58 = vrot.slane %v4074_v27, %v6214_v34 }
 0x6bf   :  { %v4100_v48 = vrot.slane %v4095_v26, %v6214_v34  ;;  %v4093_v28 = vrot.slane %v4088_v39, %v6214_v34 }
 0x745   :  { %v4018_v7 = vpop.xlane.xlu0 %4017 }
 0x746   :  { %v4028_v8 = vmul.f32 0.001953125, %v4018_v7  ;;  %v4987_v7 = vld [vmem:[%s6473_s18] ss:$0 sm:$0xff] }
 0x747   :  { %v4027_v49 = vpop.xlane.xlu1 %4026 }
 0x748   :  { %v4029_v50 = vmul.f32 0.001953125, %v4027_v49  ;;  %v4030_v10 = vmul.f32 %v4028_v8, %v4028_v8  ;;  %v4033_v51 = vsub.f32 %v6407_v33, %v4028_v8  ;;  %v4034_v31 = vsub.f32 %v6404_v9, %v4028_v8 }
 0x749   :  { %v4035_v61 = vsub.f32 %v6416_v18, %v4028_v8  ;;  %v4036_v60 = vsub.f32 %v6420_v21, %v4028_v8  ;;  %v4144_v33 = vrot.slane %v4139_v62, %v6214_v34  ;;  %v4158_v9 = vrot.slane %v4153_v32, %v6214_v34 }
 0x74a   :  { %v4031_v11 = vsub.f32 %v4029_v50, %v4030_v10  ;;  %v4137_v18 = vrot.slane %v4132_v3, %v6214_v34  ;;  %v4151_v21 = vrot.slane %v4146_v36, %v6214_v34 }
 0x74c   :  { %v4032_v13 = vmax.f32 %v4031_v11, 0.0 }
 0x74e   :  { %v4037_v37 = vadd.f32 1e-05, %v4032_v13 }
 0x750   :  { %5792 = vrsqrt.f32 %v4037_v37 }
 0x75d   :  { %v5793_v44 = vpop.eup %5792 }
 0x75e   :  { %v4040_v29 = vmul.f32 %v5793_v44, %v4034_v31  ;;  %v4042_v30 = vmul.f32 %v5793_v44, %v4036_v60  ;;  %v4039_v38 = vmul.f32 %v5793_v44, %v4033_v51  ;;  %v4041_v40 = vmul.f32 %v5793_v44, %v4035_v61 }
 0x760   :  { %v4044_v42 = vpack.c.bf16 %v4040_v29, %v4040_v29  ;;  %v4046_v43 = vpack.c.bf16 %v4042_v30, %v4042_v30  ;;  %v4043_v46 = vpack.c.bf16 %v4039_v38, %v4039_v38  ;;  %v4045_v56 = vpack.c.bf16 %v4041_v40, %v4041_v40 }
 0x762   :  { %v4102_v57 = vmul.bf16 %v4086_v45, %v4044_v42  ;;  %v4104_v59 = vmul.bf16 %v4100_v48, %v4046_v43  ;;  %v4101_v63 = vmul.bf16 %v4079_v58, %v4043_v46  ;;  %v4103_v0 = vmul.bf16 %v4093_v28, %v4045_v56 }
 0x764   :  { %v4160_v1 = vadd.bf16 %v4144_v33, %v4102_v57  ;;  %v4162_v2 = vadd.bf16 %v4158_v9, %v4104_v59  ;;  %v4159_v4 = vadd.bf16 %v4137_v18, %v4101_v63  ;;  %v4161_v5 = vadd.bf16 %v4151_v21, %v4103_v0 }
 0x766   :  { %v4164_v6 = vmax.bf16 %v6064_v47, %v4160_v1  ;;  %v4166_v53 = vmax.bf16 %v6064_v47, %v4162_v2  ;;  %v4163_v54 = vmax.bf16 %v6064_v47, %v4159_v4  ;;  %v4165_v34 = vmax.bf16 %v6064_v47, %v4161_v5 }
 0x768   :  { %4462 = vmatprep.mubr.bf16.mxu0 %v4164_v6  ;;  %4502 = vmatprep.mubr.bf16.mxu1 %v4166_v53 }
 0x769   :  { %4463 = vmatmul.mubr.bf16.vlgmr.msra.gmra.mxu0 %v4163_v54  ;;  %4503 = vmatmul.mubr.bf16.vlgmr.msra.gmra.mxu1 %v4165_v34 }
 0x829   :  { %v5036_v52 = vpop.f32.mrf.mxu0  ;;  %v5058_v55 = vpop.f32.mrf.mxu1 }
 0x82b   :  { %v5037_v8 = vpop.f32.mrf.mxu0  ;;  %v5059_v49 = vpop.f32.mrf.mxu1 }
 0x82c   :  { %v5038_v50 = vadd.f32 %v5037_v8, %v5036_v52  ;;  %v5060_v13 = vadd.f32 %v5059_v49, %v5058_v55 }
 0x82d   :  { %v5039_v10 = vpop.f32.mrf.mxu0  ;;  %v5061_v11 = vpop.f32.mrf.mxu1 }
 0x82e   :  { %v4465_v12 = vadd.f32 %v5038_v50, %v4987_v7 }
 0x82f   :  { %v5040_v47 = vpop.f32.mrf.mxu0  ;;  %v5062_v14 = vpop.f32.mrf.mxu1 }
 0x830   :  { %v4505_v15 = vadd.f32 %v5060_v13, %v4465_v12 }
 0x832   :  { %4510 = vst [vmem:[#allocation20] sm:$0xff] %v4505_v15 }
 0x833   :  { %6025 = shalt.err (!%p6022_p3)
}
 0x834   :  { %4520 = dma.vmem_to_hbm [thread:$0]  %s4518_s22, 128, %s6474_s19, [#allocation4]  }
 0x835   :  { %6046 = dma.done.wait [#allocation4], 128  }
 0x836   :  { %6047 = vsyncadd [#allocation4], 4294967168 }
 0x837   :  { %4524 = vsyncpa [#allocation3], 1 }
 0x838   :  { %4525 = vsyncpa [#allocation6], 1 }
 0x839   :  { %4526 = vsyncpa [#allocation9], 1 }
 0x83a   :  { %4527 = vsyncpa [#allocation12], 1 }
 0x83b   :  { %4528 = vsyncpa [#allocation15], 1 }
 0x83c   :  { %4529 = vsyncpa [#allocation18], 1 }
 0x83d   :  { %4530 = vsyncpa [#allocation4], 1 }

</bundles_post_ra>
